<compile_context>
chip_gen: v6e
topology: v6e:2x2x1
jax: 0.10.0
libtpu: 0.0.40
codegen_flags: <defaults>
</compile_context>

<pallas_src>
import jax
import jax.numpy as jnp
from jax import lax
from jax.experimental import pallas as pl
from jax.experimental.pallas import tpu as pltpu

# Model dimensions (fixed by the module definition)
B = 2                    # batch
CIN, COUT, K = 13, 32, 3
L = 100                  # sequence length (module probes with (1,13,100))
LP = L // 2              # 50 after MaxPool1d(2)
FLAT = COUT * LP         # 1600 = flattened_size
HID = 64
RPAD = L + 4             # padded positions per batch (1 left, 3 right) -> 104
POOL_ROWS = B * L - B    # 198 rows of pair-max (rows 4p+b are pooled[p, b])


# ----------------------------- fused Pallas kernel ---------------------------

def _fused_kernel(x_ref, wc_ref, bc_ref, w1_ref, b1_ref, w2_ref, b2_ref,
                  out_ref, pooled_ref):
    """conv1(3 shifted matmuls) + bias + ReLU + MaxPool1d(2)
       + fc1 (accumulated block dots) + ReLU + fc2 (VPU) + sigmoid."""
    # --- conv1: rows of x_ref are (padded_time * B + batch); output row
    #     t*B + b = conv output for (batch b, position t). 3 MXU dots. -------
    y = jnp.dot(x_ref[0:B * L, :], wc_ref[0],
                preferred_element_type=jnp.float32)
    y += jnp.dot(x_ref[B:B + B * L, :], wc_ref[1],
                 preferred_element_type=jnp.float32)
    y += jnp.dot(x_ref[2 * B:2 * B + B * L, :], wc_ref[2],
                 preferred_element_type=jnp.float32)                # (200, 32)

    # --- bias + ReLU (f32 epilogue) ------------------------------------------
    y = jnp.maximum(y + bc_ref[...], 0.0)

    # --- MaxPool1d(2): position t pairs with t+1 => row i pairs with i+B.
    #     Rows 4p+b of the result are pooled[p] for batch b; stored bf16 so the
    #     fc1 MXU dots consume it directly (no per-iteration casts). ----------
    pooled_ref[...] = jnp.maximum(y[:B * L - B, :], y[B:, :]).astype(
        pooled_ref.dtype)                                            # (198, 32)

    # --- fc1 as accumulated block dots: h += pooled[p] @ W1_block[p] ---------
    #     (replaces the old 50-store flatten; work lands on the MXU slot)
    def fc1_step(p, h):
        lhs = pooled_ref[pl.ds(p * 2 * B, B), :]                     # (2, 32)
        off = pl.multiple_of(p * COUT, COUT)
        rhs = w1_ref[pl.ds(off, COUT), :]                            # (32, 64)
        return h + jnp.dot(lhs, rhs, preferred_element_type=jnp.float32)

    h = lax.fori_loop(0, LP, fc1_step, jnp.zeros((B, HID), jnp.float32),
                      unroll=True)
    h = jnp.maximum(h + b1_ref[...], 0.0)                            # (2, 64)

    # --- fc2 on the VPU (64-wide mul + lane reduce) + sigmoid ----------------
    z = jnp.sum(h * w2_ref[...], axis=-1, keepdims=True)             # (2, 1)
    out_ref[...] = jax.nn.sigmoid(z + b2_ref[...])


# ---------------------- one-time parameter preprocessing ---------------------

def prepare_params(params):
    """Hoisted out of the forward path: layout permutes + bf16 casts, done once."""
    wc, bc, w1, b1, w2, b2 = params
    # conv weight (Cout,Cin,K) -> (K, Cin, Cout): tap-k slab feeds dot k
    w_conv = jnp.transpose(wc, (2, 1, 0)).astype(jnp.bfloat16)       # (3,13,32)
    # fc1 weight: PyTorch flatten order is (c*50 + p); kernel block order is
    # (p*32 + c) -> permute once so block p is rows [p*32:(p+1)*32).
    w1p = (w1.reshape(HID, COUT, LP).transpose(2, 1, 0)
             .reshape(FLAT, HID).astype(jnp.bfloat16))               # (1600,64)
    return (w_conv,
            bc.reshape(1, COUT).astype(jnp.float32),
            w1p,
            b1.reshape(1, HID).astype(jnp.float32),
            w2.reshape(1, HID).astype(jnp.float32),                  # VPU row
            b2.reshape(1, 1).astype(jnp.float32))


# ------------------------------- forward wrapper -----------------------------

def audio_spelling_forward(x, prepped):
    """x: (B, 13, 100) — same axis convention as the PyTorch module."""
    w_conv, bc, w1p, b1, w2row, b2 = prepped

    # Minimal glue: transpose -> pad -> reshape -> cast (4 tiny fusable ops).
    # Row layout of x2 is (padded_time * B + batch), so the in-kernel shifted
    # slices x2[k*B : k*B + B*L] are exactly the conv taps for every output.
    xt = jnp.transpose(x.astype(jnp.float32), (2, 0, 1))             # (L, B, 13)
    xp = jnp.pad(xt, ((1, RPAD - L - 1), (0, 0), (0, 0)))            # (104, B, 13)
    x2 = xp.reshape(RPAD * B, CIN).astype(jnp.bfloat16)              # (208, 13)

    return pl.pallas_call(
        _fused_kernel,
        out_shape=jax.ShapeDtypeStruct((B, 1), jnp.float32),
        grid=(1,),
        in_specs=[
            pl.BlockSpec((RPAD * B, CIN), lambda i: (0, 0)),   # padded input
            pl.BlockSpec((K, CIN, COUT), lambda i: (0, 0, 0)),  # conv weight
            pl.BlockSpec((1, COUT), lambda i: (0, 0)),          # conv bias
            pl.BlockSpec((FLAT, HID), lambda i: (0, 0)),        # fc1 weight (perm, bf16)
            pl.BlockSpec((1, HID), lambda i: (0, 0)),           # fc1 bias
            pl.BlockSpec((1, HID), lambda i: (0, 0)),           # fc2 weight row
            pl.BlockSpec((1, 1), lambda i: (0, 0)),             # fc2 bias
        ],
        out_specs=pl.BlockSpec((B, 1), lambda i: (0, 0)),
        scratch_shapes=[pltpu.VMEM((POOL_ROWS, COUT), jnp.bfloat16)],
        compiler_params=pltpu.CompilerParams(
            dimension_semantics=("arbitrary",)),
    )(x2, w_conv, bc, w1p, b1, w2row, b2)


# -------------------------- pure-JAX f32 reference ---------------------------

def reference(x, params):
    wc, bc, w1, b1, w2, b2 = params
    x = x.astype(jnp.float32)
    y = lax.conv_general_dilated(
        x, wc, window_strides=(1,), padding=[(1, 1)],
        dimension_numbers=("NCH", "OIH", "NCH"))
    y = jnp.maximum(y + bc[None, :, None], 0.0)              # (B, 32, 100)
    y = y.reshape(B, COUT, LP, 2).max(axis=3)                 # MaxPool1d(2)
    flat = y.reshape(B, -1)                                   # PyTorch view(B,-1)
    h = jnp.maximum(flat @ w1.T + b1, 0.0)
    z = h @ w2.T + b2
    return jax.nn.sigmoid(z)


# ------------------------------- params --------------------------------------

def init_params(key):
    """Deterministic init (PyTorch-style uniform bounds), PyTorch weight shapes."""
    ks = jax.random.split(key, 6)

    def u(k, shape, bound):
        return jax.random.uniform(k, shape, jnp.float32, -bound, bound)

    wc = u(ks[0], (COUT, CIN, K), 1.0 / (CIN * K) ** 0.5)    # conv1.weight
    bc = u(ks[1], (COUT,), 1.0 / (CIN * K) ** 0.5)           # conv1.bias
    w1 = u(ks[2], (HID, FLAT), 1.0 / FLAT ** 0.5)            # fc1.weight
    b1 = u(ks[3], (HID,), 1.0 / FLAT ** 0.5)                 # fc1.bias
    w2 = u(ks[4], (1, HID), 1.0 / HID ** 0.5)                # fc2.weight
    b2 = u(ks[5], (1,), 1.0 / HID ** 0.5)                    # fc2.bias
    return (wc, bc, w1, b1, w2, b2)


if __name__ == "__main__":
    key = jax.random.PRNGKey(0)
    kx, kp = jax.random.split(key)
    x = jax.random.normal(kx, (B, CIN, L), jnp.float32)       # (2, 13, 100) NCW
    params = init_params(kp)
    prepped = prepare_params(params)                          # hoisted, one-time

    fwd = jax.jit(audio_spelling_forward)
    out = jax.block_until_ready(fwd(x, prepped))
    ref = jax.block_until_ready(reference(x, params))

    assert out.shape == (B, 1), out.shape
    # bf16 MXU operands / f32 accumulation: ~1e-3 expected error on a sigmoid
    # output -> tightened from the previous 1e-2 gate.
    assert jnp.allclose(out, ref, atol=3e-3, rtol=3e-3), (out, ref)
    print("KERNEL_OK")
</pallas_src>

<mosaic_0001>
module attributes {stable_mosaic.version = 11 : i64} {
  func.func @_fused_kernel(%arg0: i32, %arg1: memref<208x13xbf16, #tpu.memory_space<vmem>>, %arg2: memref<3x13x32xbf16, #tpu.memory_space<vmem>>, %arg3: memref<1x32xf32, #tpu.memory_space<vmem>>, %arg4: memref<1600x64xbf16, #tpu.memory_space<vmem>>, %arg5: memref<1x64xf32, #tpu.memory_space<vmem>>, %arg6: memref<1x64xf32, #tpu.memory_space<vmem>>, %arg7: memref<1x1xf32, #tpu.memory_space<vmem>>, %arg8: memref<2x1xf32, #tpu.memory_space<vmem>>, %arg9: memref<198x32xbf16, #tpu.memory_space<vmem>>) attributes {dimension_semantics = [#tpu.dimension_semantics<arbitrary>], iteration_bounds = array<i64: 1>, scalar_prefetch = 0 : i64, scratch_operands = 1 : i64, tpu.core_type = #tpu.core_type<tc>, window_params = [{pipeline_mode = #tpu.pipeline_mode<synchronous>, transform_indices = @transform_0, window_bounds = array<i64: 208, 13>}, {pipeline_mode = #tpu.pipeline_mode<synchronous>, transform_indices = @transform_1, window_bounds = array<i64: 3, 13, 32>}, {pipeline_mode = #tpu.pipeline_mode<synchronous>, transform_indices = @transform_2, window_bounds = array<i64: 1, 32>}, {pipeline_mode = #tpu.pipeline_mode<synchronous>, transform_indices = @transform_3, window_bounds = array<i64: 1600, 64>}, {pipeline_mode = #tpu.pipeline_mode<synchronous>, transform_indices = @transform_4, window_bounds = array<i64: 1, 64>}, {pipeline_mode = #tpu.pipeline_mode<synchronous>, transform_indices = @transform_5, window_bounds = array<i64: 1, 64>}, {pipeline_mode = #tpu.pipeline_mode<synchronous>, transform_indices = @transform_6, window_bounds = array<i64: 1, 1>}, {pipeline_mode = #tpu.pipeline_mode<synchronous>, transform_indices = @transform_7, window_bounds = array<i64: 2, 1>}]} {
    %c0 = arith.constant 0 : index
    %c0_0 = arith.constant 0 : index
    %0 = vector.load %arg1[%c0, %c0_0] : memref<208x13xbf16, #tpu.memory_space<vmem>>, vector<200x13xbf16>
    %c0_1 = arith.constant 0 : index
    %c0_2 = arith.constant 0 : index
    %c0_3 = arith.constant 0 : index
    %1 = vector.load %arg2[%c0_1, %c0_2, %c0_3] : memref<3x13x32xbf16, #tpu.memory_space<vmem>>, vector<1x13x32xbf16>
    %2 = vector.shape_cast %1 : vector<1x13x32xbf16> to vector<13x32xbf16>
    %cst = arith.constant dense<0.000000e+00> : vector<200x32xf32>
    %3 = tpu.matmul %0, %2, %cst {dimension_numbers = #tpu.dot_dimension_numbers<[1], [0], [0], [1], [0, 0, 1, 1], [], []>} : vector<200x13xbf16>, vector<13x32xbf16>, vector<200x32xf32> -> vector<200x32xf32>
    %c2 = arith.constant 2 : index
    %c0_4 = arith.constant 0 : index
    %4 = vector.load %arg1[%c2, %c0_4] : memref<208x13xbf16, #tpu.memory_space<vmem>>, vector<200x13xbf16>
    %c1 = arith.constant 1 : index
    %c0_5 = arith.constant 0 : index
    %c0_6 = arith.constant 0 : index
    %5 = vector.load %arg2[%c1, %c0_5, %c0_6] : memref<3x13x32xbf16, #tpu.memory_space<vmem>>, vector<1x13x32xbf16>
    %6 = vector.shape_cast %5 : vector<1x13x32xbf16> to vector<13x32xbf16>
    %cst_7 = arith.constant dense<0.000000e+00> : vector<200x32xf32>
    %7 = tpu.matmul %4, %6, %cst_7 {dimension_numbers = #tpu.dot_dimension_numbers<[1], [0], [0], [1], [0, 0, 1, 1], [], []>} : vector<200x13xbf16>, vector<13x32xbf16>, vector<200x32xf32> -> vector<200x32xf32>
    %8 = arith.addf %3, %7 : vector<200x32xf32>
    %c4 = arith.constant 4 : index
    %c0_8 = arith.constant 0 : index
    %9 = vector.load %arg1[%c4, %c0_8] : memref<208x13xbf16, #tpu.memory_space<vmem>>, vector<200x13xbf16>
    %c2_9 = arith.constant 2 : index
    %c0_10 = arith.constant 0 : index
    %c0_11 = arith.constant 0 : index
    %10 = vector.load %arg2[%c2_9, %c0_10, %c0_11] : memref<3x13x32xbf16, #tpu.memory_space<vmem>>, vector<1x13x32xbf16>
    %11 = vector.shape_cast %10 : vector<1x13x32xbf16> to vector<13x32xbf16>
    %cst_12 = arith.constant dense<0.000000e+00> : vector<200x32xf32>
    %12 = tpu.matmul %9, %11, %cst_12 {dimension_numbers = #tpu.dot_dimension_numbers<[1], [0], [0], [1], [0, 0, 1, 1], [], []>} : vector<200x13xbf16>, vector<13x32xbf16>, vector<200x32xf32> -> vector<200x32xf32>
    %13 = arith.addf %8, %12 : vector<200x32xf32>
    %c0_13 = arith.constant 0 : index
    %c0_14 = arith.constant 0 : index
    %14 = vector.load %arg3[%c0_13, %c0_14] : memref<1x32xf32, #tpu.memory_space<vmem>>, vector<1x32xf32>
    %15 = vector.broadcast %14 : vector<1x32xf32> to vector<200x32xf32>
    %16 = arith.addf %13, %15 : vector<200x32xf32>
    %cst_15 = arith.constant 0.000000e+00 : f32
    %17 = vector.broadcast %cst_15 : f32 to vector<200x32xf32>
    %18 = arith.maximumf %16, %17 : vector<200x32xf32>
    %19 = vector.extract_strided_slice %18 {offsets = [0, 0], sizes = [198, 32], strides = [1, 1]} : vector<200x32xf32> to vector<198x32xf32>
    %20 = vector.extract_strided_slice %18 {offsets = [2, 0], sizes = [198, 32], strides = [1, 1]} : vector<200x32xf32> to vector<198x32xf32>
    %21 = arith.maximumf %19, %20 : vector<198x32xf32>
    %22 = arith.truncf %21 : vector<198x32xf32> to vector<198x32xbf16>
    %c0_16 = arith.constant 0 : index
    %c0_17 = arith.constant 0 : index
    %23 = vector.load %arg9[%c0_16, %c0_17] : memref<198x32xbf16, #tpu.memory_space<vmem>>, vector<198x32xbf16>
    tpu.vector_store %arg9[%c0_16, %c0_17], %22 {strides = array<i32>} : memref<198x32xbf16, #tpu.memory_space<vmem>>, vector<198x32xbf16>,
    %cst_18 = arith.constant 0.000000e+00 : f32
    %24 = vector.broadcast %cst_18 : f32 to vector<2x64xf32>
    %c0_i32 = arith.constant 0 : i32
    %c2_i32 = arith.constant 2 : i32
    %25 = arith.muli %c0_i32, %c2_i32 : i32
    %c2_i32_19 = arith.constant 2 : i32
    %26 = arith.muli %25, %c2_i32_19 : i32
    %27 = arith.index_cast %26 : i32 to index
    %c0_20 = arith.constant 0 : index
    %28 = vector.load %arg9[%27, %c0_20] : memref<198x32xbf16, #tpu.memory_space<vmem>>, vector<2x32xbf16>
    %c32_i32 = arith.constant 32 : i32
    %29 = arith.muli %c0_i32, %c32_i32 : i32
    %30 = tpu.assume_multiple %29, 32 : i32
    %31 = arith.index_cast %30 : i32 to index
    %c0_21 = arith.constant 0 : index
    %32 = vector.load %arg4[%31, %c0_21] : memref<1600x64xbf16, #tpu.memory_space<vmem>>, vector<32x64xbf16>
    %cst_22 = arith.constant dense<0.000000e+00> : vector<2x64xf32>
    %33 = tpu.matmul %28, %32, %cst_22 {dimension_numbers = #tpu.dot_dimension_numbers<[1], [0], [0], [1], [0, 0, 1, 1], [], []>} : vector<2x32xbf16>, vector<32x64xbf16>, vector<2x64xf32> -> vector<2x64xf32>
    %34 = arith.addf %24, %33 : vector<2x64xf32>
    %c1_i32 = arith.constant 1 : i32
    %c2_i32_23 = arith.constant 2 : i32
    %35 = arith.muli %c1_i32, %c2_i32_23 : i32
    %c2_i32_24 = arith.constant 2 : i32
    %36 = arith.muli %35, %c2_i32_24 : i32
    %37 = arith.index_cast %36 : i32 to index
    %c0_25 = arith.constant 0 : index
    %38 = vector.load %arg9[%37, %c0_25] : memref<198x32xbf16, #tpu.memory_space<vmem>>, vector<2x32xbf16>
    %c32_i32_26 = arith.constant 32 : i32
    %39 = arith.muli %c1_i32, %c32_i32_26 : i32
    %40 = tpu.assume_multiple %39, 32 : i32
    %41 = arith.index_cast %40 : i32 to index
    %c0_27 = arith.constant 0 : index
    %42 = vector.load %arg4[%41, %c0_27] : memref<1600x64xbf16, #tpu.memory_space<vmem>>, vector<32x64xbf16>
    %cst_28 = arith.constant dense<0.000000e+00> : vector<2x64xf32>
    %43 = tpu.matmul %38, %42, %cst_28 {dimension_numbers = #tpu.dot_dimension_numbers<[1], [0], [0], [1], [0, 0, 1, 1], [], []>} : vector<2x32xbf16>, vector<32x64xbf16>, vector<2x64xf32> -> vector<2x64xf32>
    %44 = arith.addf %34, %43 : vector<2x64xf32>
    %c2_i32_29 = arith.constant 2 : i32
    %c2_i32_30 = arith.constant 2 : i32
    %45 = arith.muli %c2_i32_29, %c2_i32_30 : i32
    %c2_i32_31 = arith.constant 2 : i32
    %46 = arith.muli %45, %c2_i32_31 : i32
    %47 = arith.index_cast %46 : i32 to index
    %c0_32 = arith.constant 0 : index
    %48 = vector.load %arg9[%47, %c0_32] : memref<198x32xbf16, #tpu.memory_space<vmem>>, vector<2x32xbf16>
    %c32_i32_33 = arith.constant 32 : i32
    %49 = arith.muli %c2_i32_29, %c32_i32_33 : i32
    %50 = tpu.assume_multiple %49, 32 : i32
    %51 = arith.index_cast %50 : i32 to index
    %c0_34 = arith.constant 0 : index
    %52 = vector.load %arg4[%51, %c0_34] : memref<1600x64xbf16, #tpu.memory_space<vmem>>, vector<32x64xbf16>
    %cst_35 = arith.constant dense<0.000000e+00> : vector<2x64xf32>
    %53 = tpu.matmul %48, %52, %cst_35 {dimension_numbers = #tpu.dot_dimension_numbers<[1], [0], [0], [1], [0, 0, 1, 1], [], []>} : vector<2x32xbf16>, vector<32x64xbf16>, vector<2x64xf32> -> vector<2x64xf32>
    %54 = arith.addf %44, %53 : vector<2x64xf32>
    %c3_i32 = arith.constant 3 : i32
    %c2_i32_36 = arith.constant 2 : i32
    %55 = arith.muli %c3_i32, %c2_i32_36 : i32
    %c2_i32_37 = arith.constant 2 : i32
    %56 = arith.muli %55, %c2_i32_37 : i32
    %57 = arith.index_cast %56 : i32 to index
    %c0_38 = arith.constant 0 : index
    %58 = vector.load %arg9[%57, %c0_38] : memref<198x32xbf16, #tpu.memory_space<vmem>>, vector<2x32xbf16>
    %c32_i32_39 = arith.constant 32 : i32
    %59 = arith.muli %c3_i32, %c32_i32_39 : i32
    %60 = tpu.assume_multiple %59, 32 : i32
    %61 = arith.index_cast %60 : i32 to index
    %c0_40 = arith.constant 0 : index
    %62 = vector.load %arg4[%61, %c0_40] : memref<1600x64xbf16, #tpu.memory_space<vmem>>, vector<32x64xbf16>
    %cst_41 = arith.constant dense<0.000000e+00> : vector<2x64xf32>
    %63 = tpu.matmul %58, %62, %cst_41 {dimension_numbers = #tpu.dot_dimension_numbers<[1], [0], [0], [1], [0, 0, 1, 1], [], []>} : vector<2x32xbf16>, vector<32x64xbf16>, vector<2x64xf32> -> vector<2x64xf32>
    %64 = arith.addf %54, %63 : vector<2x64xf32>
    %c4_i32 = arith.constant 4 : i32
    %c2_i32_42 = arith.constant 2 : i32
    %65 = arith.muli %c4_i32, %c2_i32_42 : i32
    %c2_i32_43 = arith.constant 2 : i32
    %66 = arith.muli %65, %c2_i32_43 : i32
    %67 = arith.index_cast %66 : i32 to index
    %c0_44 = arith.constant 0 : index
    %68 = vector.load %arg9[%67, %c0_44] : memref<198x32xbf16, #tpu.memory_space<vmem>>, vector<2x32xbf16>
    %c32_i32_45 = arith.constant 32 : i32
    %69 = arith.muli %c4_i32, %c32_i32_45 : i32
    %70 = tpu.assume_multiple %69, 32 : i32
    %71 = arith.index_cast %70 : i32 to index
    %c0_46 = arith.constant 0 : index
    %72 = vector.load %arg4[%71, %c0_46] : memref<1600x64xbf16, #tpu.memory_space<vmem>>, vector<32x64xbf16>
    %cst_47 = arith.constant dense<0.000000e+00> : vector<2x64xf32>
    %73 = tpu.matmul %68, %72, %cst_47 {dimension_numbers = #tpu.dot_dimension_numbers<[1], [0], [0], [1], [0, 0, 1, 1], [], []>} : vector<2x32xbf16>, vector<32x64xbf16>, vector<2x64xf32> -> vector<2x64xf32>
    %74 = arith.addf %64, %73 : vector<2x64xf32>
    %c5_i32 = arith.constant 5 : i32
    %c2_i32_48 = arith.constant 2 : i32
    %75 = arith.muli %c5_i32, %c2_i32_48 : i32
    %c2_i32_49 = arith.constant 2 : i32
    %76 = arith.muli %75, %c2_i32_49 : i32
    %77 = arith.index_cast %76 : i32 to index
    %c0_50 = arith.constant 0 : index
    %78 = vector.load %arg9[%77, %c0_50] : memref<198x32xbf16, #tpu.memory_space<vmem>>, vector<2x32xbf16>
    %c32_i32_51 = arith.constant 32 : i32
    %79 = arith.muli %c5_i32, %c32_i32_51 : i32
    %80 = tpu.assume_multiple %79, 32 : i32
    %81 = arith.index_cast %80 : i32 to index
    %c0_52 = arith.constant 0 : index
    %82 = vector.load %arg4[%81, %c0_52] : memref<1600x64xbf16, #tpu.memory_space<vmem>>, vector<32x64xbf16>
    %cst_53 = arith.constant dense<0.000000e+00> : vector<2x64xf32>
    %83 = tpu.matmul %78, %82, %cst_53 {dimension_numbers = #tpu.dot_dimension_numbers<[1], [0], [0], [1], [0, 0, 1, 1], [], []>} : vector<2x32xbf16>, vector<32x64xbf16>, vector<2x64xf32> -> vector<2x64xf32>
    %84 = arith.addf %74, %83 : vector<2x64xf32>
    %c6_i32 = arith.constant 6 : i32
    %c2_i32_54 = arith.constant 2 : i32
    %85 = arith.muli %c6_i32, %c2_i32_54 : i32
    %c2_i32_55 = arith.constant 2 : i32
    %86 = arith.muli %85, %c2_i32_55 : i32
    %87 = arith.index_cast %86 : i32 to index
    %c0_56 = arith.constant 0 : index
    %88 = vector.load %arg9[%87, %c0_56] : memref<198x32xbf16, #tpu.memory_space<vmem>>, vector<2x32xbf16>
    %c32_i32_57 = arith.constant 32 : i32
    %89 = arith.muli %c6_i32, %c32_i32_57 : i32
    %90 = tpu.assume_multiple %89, 32 : i32
    %91 = arith.index_cast %90 : i32 to index
    %c0_58 = arith.constant 0 : index
    %92 = vector.load %arg4[%91, %c0_58] : memref<1600x64xbf16, #tpu.memory_space<vmem>>, vector<32x64xbf16>
    %cst_59 = arith.constant dense<0.000000e+00> : vector<2x64xf32>
    %93 = tpu.matmul %88, %92, %cst_59 {dimension_numbers = #tpu.dot_dimension_numbers<[1], [0], [0], [1], [0, 0, 1, 1], [], []>} : vector<2x32xbf16>, vector<32x64xbf16>, vector<2x64xf32> -> vector<2x64xf32>
    %94 = arith.addf %84, %93 : vector<2x64xf32>
    %c7_i32 = arith.constant 7 : i32
    %c2_i32_60 = arith.constant 2 : i32
    %95 = arith.muli %c7_i32, %c2_i32_60 : i32
    %c2_i32_61 = arith.constant 2 : i32
    %96 = arith.muli %95, %c2_i32_61 : i32
    %97 = arith.index_cast %96 : i32 to index
    %c0_62 = arith.constant 0 : index
    %98 = vector.load %arg9[%97, %c0_62] : memref<198x32xbf16, #tpu.memory_space<vmem>>, vector<2x32xbf16>
    %c32_i32_63 = arith.constant 32 : i32
    %99 = arith.muli %c7_i32, %c32_i32_63 : i32
    %100 = tpu.assume_multiple %99, 32 : i32
    %101 = arith.index_cast %100 : i32 to index
    %c0_64 = arith.constant 0 : index
    %102 = vector.load %arg4[%101, %c0_64] : memref<1600x64xbf16, #tpu.memory_space<vmem>>, vector<32x64xbf16>
    %cst_65 = arith.constant dense<0.000000e+00> : vector<2x64xf32>
    %103 = tpu.matmul %98, %102, %cst_65 {dimension_numbers = #tpu.dot_dimension_numbers<[1], [0], [0], [1], [0, 0, 1, 1], [], []>} : vector<2x32xbf16>, vector<32x64xbf16>, vector<2x64xf32> -> vector<2x64xf32>
    %104 = arith.addf %94, %103 : vector<2x64xf32>
    %c8_i32 = arith.constant 8 : i32
    %c2_i32_66 = arith.constant 2 : i32
    %105 = arith.muli %c8_i32, %c2_i32_66 : i32
    %c2_i32_67 = arith.constant 2 : i32
    %106 = arith.muli %105, %c2_i32_67 : i32
    %107 = arith.index_cast %106 : i32 to index
    %c0_68 = arith.constant 0 : index
    %108 = vector.load %arg9[%107, %c0_68] : memref<198x32xbf16, #tpu.memory_space<vmem>>, vector<2x32xbf16>
    %c32_i32_69 = arith.constant 32 : i32
    %109 = arith.muli %c8_i32, %c32_i32_69 : i32
    %110 = tpu.assume_multiple %109, 32 : i32
    %111 = arith.index_cast %110 : i32 to index
    %c0_70 = arith.constant 0 : index
    %112 = vector.load %arg4[%111, %c0_70] : memref<1600x64xbf16, #tpu.memory_space<vmem>>, vector<32x64xbf16>
    %cst_71 = arith.constant dense<0.000000e+00> : vector<2x64xf32>
    %113 = tpu.matmul %108, %112, %cst_71 {dimension_numbers = #tpu.dot_dimension_numbers<[1], [0], [0], [1], [0, 0, 1, 1], [], []>} : vector<2x32xbf16>, vector<32x64xbf16>, vector<2x64xf32> -> vector<2x64xf32>
    %114 = arith.addf %104, %113 : vector<2x64xf32>
    %c9_i32 = arith.constant 9 : i32
    %c2_i32_72 = arith.constant 2 : i32
    %115 = arith.muli %c9_i32, %c2_i32_72 : i32
    %c2_i32_73 = arith.constant 2 : i32
    %116 = arith.muli %115, %c2_i32_73 : i32
    %117 = arith.index_cast %116 : i32 to index
    %c0_74 = arith.constant 0 : index
    %118 = vector.load %arg9[%117, %c0_74] : memref<198x32xbf16, #tpu.memory_space<vmem>>, vector<2x32xbf16>
    %c32_i32_75 = arith.constant 32 : i32
    %119 = arith.muli %c9_i32, %c32_i32_75 : i32
    %120 = tpu.assume_multiple %119, 32 : i32
    %121 = arith.index_cast %120 : i32 to index
    %c0_76 = arith.constant 0 : index
    %122 = vector.load %arg4[%121, %c0_76] : memref<1600x64xbf16, #tpu.memory_space<vmem>>, vector<32x64xbf16>
    %cst_77 = arith.constant dense<0.000000e+00> : vector<2x64xf32>
    %123 = tpu.matmul %118, %122, %cst_77 {dimension_numbers = #tpu.dot_dimension_numbers<[1], [0], [0], [1], [0, 0, 1, 1], [], []>} : vector<2x32xbf16>, vector<32x64xbf16>, vector<2x64xf32> -> vector<2x64xf32>
    %124 = arith.addf %114, %123 : vector<2x64xf32>
    %c10_i32 = arith.constant 10 : i32
    %c2_i32_78 = arith.constant 2 : i32
    %125 = arith.muli %c10_i32, %c2_i32_78 : i32
    %c2_i32_79 = arith.constant 2 : i32
    %126 = arith.muli %125, %c2_i32_79 : i32
    %127 = arith.index_cast %126 : i32 to index
    %c0_80 = arith.constant 0 : index
    %128 = vector.load %arg9[%127, %c0_80] : memref<198x32xbf16, #tpu.memory_space<vmem>>, vector<2x32xbf16>
    %c32_i32_81 = arith.constant 32 : i32
    %129 = arith.muli %c10_i32, %c32_i32_81 : i32
    %130 = tpu.assume_multiple %129, 32 : i32
    %131 = arith.index_cast %130 : i32 to index
    %c0_82 = arith.constant 0 : index
    %132 = vector.load %arg4[%131, %c0_82] : memref<1600x64xbf16, #tpu.memory_space<vmem>>, vector<32x64xbf16>
    %cst_83 = arith.constant dense<0.000000e+00> : vector<2x64xf32>
    %133 = tpu.matmul %128, %132, %cst_83 {dimension_numbers = #tpu.dot_dimension_numbers<[1], [0], [0], [1], [0, 0, 1, 1], [], []>} : vector<2x32xbf16>, vector<32x64xbf16>, vector<2x64xf32> -> vector<2x64xf32>
    %134 = arith.addf %124, %133 : vector<2x64xf32>
    %c11_i32 = arith.constant 11 : i32
    %c2_i32_84 = arith.constant 2 : i32
    %135 = arith.muli %c11_i32, %c2_i32_84 : i32
    %c2_i32_85 = arith.constant 2 : i32
    %136 = arith.muli %135, %c2_i32_85 : i32
    %137 = arith.index_cast %136 : i32 to index
    %c0_86 = arith.constant 0 : index
    %138 = vector.load %arg9[%137, %c0_86] : memref<198x32xbf16, #tpu.memory_space<vmem>>, vector<2x32xbf16>
    %c32_i32_87 = arith.constant 32 : i32
    %139 = arith.muli %c11_i32, %c32_i32_87 : i32
    %140 = tpu.assume_multiple %139, 32 : i32
    %141 = arith.index_cast %140 : i32 to index
    %c0_88 = arith.constant 0 : index
    %142 = vector.load %arg4[%141, %c0_88] : memref<1600x64xbf16, #tpu.memory_space<vmem>>, vector<32x64xbf16>
    %cst_89 = arith.constant dense<0.000000e+00> : vector<2x64xf32>
    %143 = tpu.matmul %138, %142, %cst_89 {dimension_numbers = #tpu.dot_dimension_numbers<[1], [0], [0], [1], [0, 0, 1, 1], [], []>} : vector<2x32xbf16>, vector<32x64xbf16>, vector<2x64xf32> -> vector<2x64xf32>
    %144 = arith.addf %134, %143 : vector<2x64xf32>
    %c12_i32 = arith.constant 12 : i32
    %c2_i32_90 = arith.constant 2 : i32
    %145 = arith.muli %c12_i32, %c2_i32_90 : i32
    %c2_i32_91 = arith.constant 2 : i32
    %146 = arith.muli %145, %c2_i32_91 : i32
    %147 = arith.index_cast %146 : i32 to index
    %c0_92 = arith.constant 0 : index
    %148 = vector.load %arg9[%147, %c0_92] : memref<198x32xbf16, #tpu.memory_space<vmem>>, vector<2x32xbf16>
    %c32_i32_93 = arith.constant 32 : i32
    %149 = arith.muli %c12_i32, %c32_i32_93 : i32
    %150 = tpu.assume_multiple %149, 32 : i32
    %151 = arith.index_cast %150 : i32 to index
    %c0_94 = arith.constant 0 : index
    %152 = vector.load %arg4[%151, %c0_94] : memref<1600x64xbf16, #tpu.memory_space<vmem>>, vector<32x64xbf16>
    %cst_95 = arith.constant dense<0.000000e+00> : vector<2x64xf32>
    %153 = tpu.matmul %148, %152, %cst_95 {dimension_numbers = #tpu.dot_dimension_numbers<[1], [0], [0], [1], [0, 0, 1, 1], [], []>} : vector<2x32xbf16>, vector<32x64xbf16>, vector<2x64xf32> -> vector<2x64xf32>
    %154 = arith.addf %144, %153 : vector<2x64xf32>
    %c13_i32 = arith.constant 13 : i32
    %c2_i32_96 = arith.constant 2 : i32
    %155 = arith.muli %c13_i32, %c2_i32_96 : i32
    %c2_i32_97 = arith.constant 2 : i32
    %156 = arith.muli %155, %c2_i32_97 : i32
    %157 = arith.index_cast %156 : i32 to index
    %c0_98 = arith.constant 0 : index
    %158 = vector.load %arg9[%157, %c0_98] : memref<198x32xbf16, #tpu.memory_space<vmem>>, vector<2x32xbf16>
    %c32_i32_99 = arith.constant 32 : i32
    %159 = arith.muli %c13_i32, %c32_i32_99 : i32
    %160 = tpu.assume_multiple %159, 32 : i32
    %161 = arith.index_cast %160 : i32 to index
    %c0_100 = arith.constant 0 : index
    %162 = vector.load %arg4[%161, %c0_100] : memref<1600x64xbf16, #tpu.memory_space<vmem>>, vector<32x64xbf16>
    %cst_101 = arith.constant dense<0.000000e+00> : vector<2x64xf32>
    %163 = tpu.matmul %158, %162, %cst_101 {dimension_numbers = #tpu.dot_dimension_numbers<[1], [0], [0], [1], [0, 0, 1, 1], [], []>} : vector<2x32xbf16>, vector<32x64xbf16>, vector<2x64xf32> -> vector<2x64xf32>
    %164 = arith.addf %154, %163 : vector<2x64xf32>
    %c14_i32 = arith.constant 14 : i32
    %c2_i32_102 = arith.constant 2 : i32
    %165 = arith.muli %c14_i32, %c2_i32_102 : i32
    %c2_i32_103 = arith.constant 2 : i32
    %166 = arith.muli %165, %c2_i32_103 : i32
    %167 = arith.index_cast %166 : i32 to index
    %c0_104 = arith.constant 0 : index
    %168 = vector.load %arg9[%167, %c0_104] : memref<198x32xbf16, #tpu.memory_space<vmem>>, vector<2x32xbf16>
    %c32_i32_105 = arith.constant 32 : i32
    %169 = arith.muli %c14_i32, %c32_i32_105 : i32
    %170 = tpu.assume_multiple %169, 32 : i32
    %171 = arith.index_cast %170 : i32 to index
    %c0_106 = arith.constant 0 : index
    %172 = vector.load %arg4[%171, %c0_106] : memref<1600x64xbf16, #tpu.memory_space<vmem>>, vector<32x64xbf16>
    %cst_107 = arith.constant dense<0.000000e+00> : vector<2x64xf32>
    %173 = tpu.matmul %168, %172, %cst_107 {dimension_numbers = #tpu.dot_dimension_numbers<[1], [0], [0], [1], [0, 0, 1, 1], [], []>} : vector<2x32xbf16>, vector<32x64xbf16>, vector<2x64xf32> -> vector<2x64xf32>
    %174 = arith.addf %164, %173 : vector<2x64xf32>
    %c15_i32 = arith.constant 15 : i32
    %c2_i32_108 = arith.constant 2 : i32
    %175 = arith.muli %c15_i32, %c2_i32_108 : i32
    %c2_i32_109 = arith.constant 2 : i32
    %176 = arith.muli %175, %c2_i32_109 : i32
    %177 = arith.index_cast %176 : i32 to index
    %c0_110 = arith.constant 0 : index
    %178 = vector.load %arg9[%177, %c0_110] : memref<198x32xbf16, #tpu.memory_space<vmem>>, vector<2x32xbf16>
    %c32_i32_111 = arith.constant 32 : i32
    %179 = arith.muli %c15_i32, %c32_i32_111 : i32
    %180 = tpu.assume_multiple %179, 32 : i32
    %181 = arith.index_cast %180 : i32 to index
    %c0_112 = arith.constant 0 : index
    %182 = vector.load %arg4[%181, %c0_112] : memref<1600x64xbf16, #tpu.memory_space<vmem>>, vector<32x64xbf16>
    %cst_113 = arith.constant dense<0.000000e+00> : vector<2x64xf32>
    %183 = tpu.matmul %178, %182, %cst_113 {dimension_numbers = #tpu.dot_dimension_numbers<[1], [0], [0], [1], [0, 0, 1, 1], [], []>} : vector<2x32xbf16>, vector<32x64xbf16>, vector<2x64xf32> -> vector<2x64xf32>
    %184 = arith.addf %174, %183 : vector<2x64xf32>
    %c16_i32 = arith.constant 16 : i32
    %c2_i32_114 = arith.constant 2 : i32
    %185 = arith.muli %c16_i32, %c2_i32_114 : i32
    %c2_i32_115 = arith.constant 2 : i32
    %186 = arith.muli %185, %c2_i32_115 : i32
    %187 = arith.index_cast %186 : i32 to index
    %c0_116 = arith.constant 0 : index
    %188 = vector.load %arg9[%187, %c0_116] : memref<198x32xbf16, #tpu.memory_space<vmem>>, vector<2x32xbf16>
    %c32_i32_117 = arith.constant 32 : i32
    %189 = arith.muli %c16_i32, %c32_i32_117 : i32
    %190 = tpu.assume_multiple %189, 32 : i32
    %191 = arith.index_cast %190 : i32 to index
    %c0_118 = arith.constant 0 : index
    %192 = vector.load %arg4[%191, %c0_118] : memref<1600x64xbf16, #tpu.memory_space<vmem>>, vector<32x64xbf16>
    %cst_119 = arith.constant dense<0.000000e+00> : vector<2x64xf32>
    %193 = tpu.matmul %188, %192, %cst_119 {dimension_numbers = #tpu.dot_dimension_numbers<[1], [0], [0], [1], [0, 0, 1, 1], [], []>} : vector<2x32xbf16>, vector<32x64xbf16>, vector<2x64xf32> -> vector<2x64xf32>
    %194 = arith.addf %184, %193 : vector<2x64xf32>
    %c17_i32 = arith.constant 17 : i32
    %c2_i32_120 = arith.constant 2 : i32
    %195 = arith.muli %c17_i32, %c2_i32_120 : i32
    %c2_i32_121 = arith.constant 2 : i32
    %196 = arith.muli %195, %c2_i32_121 : i32
    %197 = arith.index_cast %196 : i32 to index
    %c0_122 = arith.constant 0 : index
    %198 = vector.load %arg9[%197, %c0_122] : memref<198x32xbf16, #tpu.memory_space<vmem>>, vector<2x32xbf16>
    %c32_i32_123 = arith.constant 32 : i32
    %199 = arith.muli %c17_i32, %c32_i32_123 : i32
    %200 = tpu.assume_multiple %199, 32 : i32
    %201 = arith.index_cast %200 : i32 to index
    %c0_124 = arith.constant 0 : index
    %202 = vector.load %arg4[%201, %c0_124] : memref<1600x64xbf16, #tpu.memory_space<vmem>>, vector<32x64xbf16>
    %cst_125 = arith.constant dense<0.000000e+00> : vector<2x64xf32>
    %203 = tpu.matmul %198, %202, %cst_125 {dimension_numbers = #tpu.dot_dimension_numbers<[1], [0], [0], [1], [0, 0, 1, 1], [], []>} : vector<2x32xbf16>, vector<32x64xbf16>, vector<2x64xf32> -> vector<2x64xf32>
    %204 = arith.addf %194, %203 : vector<2x64xf32>
    %c18_i32 = arith.constant 18 : i32
    %c2_i32_126 = arith.constant 2 : i32
    %205 = arith.muli %c18_i32, %c2_i32_126 : i32
    %c2_i32_127 = arith.constant 2 : i32
    %206 = arith.muli %205, %c2_i32_127 : i32
    %207 = arith.index_cast %206 : i32 to index
    %c0_128 = arith.constant 0 : index
    %208 = vector.load %arg9[%207, %c0_128] : memref<198x32xbf16, #tpu.memory_space<vmem>>, vector<2x32xbf16>
    %c32_i32_129 = arith.constant 32 : i32
    %209 = arith.muli %c18_i32, %c32_i32_129 : i32
    %210 = tpu.assume_multiple %209, 32 : i32
    %211 = arith.index_cast %210 : i32 to index
    %c0_130 = arith.constant 0 : index
    %212 = vector.load %arg4[%211, %c0_130] : memref<1600x64xbf16, #tpu.memory_space<vmem>>, vector<32x64xbf16>
    %cst_131 = arith.constant dense<0.000000e+00> : vector<2x64xf32>
    %213 = tpu.matmul %208, %212, %cst_131 {dimension_numbers = #tpu.dot_dimension_numbers<[1], [0], [0], [1], [0, 0, 1, 1], [], []>} : vector<2x32xbf16>, vector<32x64xbf16>, vector<2x64xf32> -> vector<2x64xf32>
    %214 = arith.addf %204, %213 : vector<2x64xf32>
    %c19_i32 = arith.constant 19 : i32
    %c2_i32_132 = arith.constant 2 : i32
    %215 = arith.muli %c19_i32, %c2_i32_132 : i32
    %c2_i32_133 = arith.constant 2 : i32
    %216 = arith.muli %215, %c2_i32_133 : i32
    %217 = arith.index_cast %216 : i32 to index
    %c0_134 = arith.constant 0 : index
    %218 = vector.load %arg9[%217, %c0_134] : memref<198x32xbf16, #tpu.memory_space<vmem>>, vector<2x32xbf16>
    %c32_i32_135 = arith.constant 32 : i32
    %219 = arith.muli %c19_i32, %c32_i32_135 : i32
    %220 = tpu.assume_multiple %219, 32 : i32
    %221 = arith.index_cast %220 : i32 to index
    %c0_136 = arith.constant 0 : index
    %222 = vector.load %arg4[%221, %c0_136] : memref<1600x64xbf16, #tpu.memory_space<vmem>>, vector<32x64xbf16>
    %cst_137 = arith.constant dense<0.000000e+00> : vector<2x64xf32>
    %223 = tpu.matmul %218, %222, %cst_137 {dimension_numbers = #tpu.dot_dimension_numbers<[1], [0], [0], [1], [0, 0, 1, 1], [], []>} : vector<2x32xbf16>, vector<32x64xbf16>, vector<2x64xf32> -> vector<2x64xf32>
    %224 = arith.addf %214, %223 : vector<2x64xf32>
    %c20_i32 = arith.constant 20 : i32
    %c2_i32_138 = arith.constant 2 : i32
    %225 = arith.muli %c20_i32, %c2_i32_138 : i32
    %c2_i32_139 = arith.constant 2 : i32
    %226 = arith.muli %225, %c2_i32_139 : i32
    %227 = arith.index_cast %226 : i32 to index
    %c0_140 = arith.constant 0 : index
    %228 = vector.load %arg9[%227, %c0_140] : memref<198x32xbf16, #tpu.memory_space<vmem>>, vector<2x32xbf16>
    %c32_i32_141 = arith.constant 32 : i32
    %229 = arith.muli %c20_i32, %c32_i32_141 : i32
    %230 = tpu.assume_multiple %229, 32 : i32
    %231 = arith.index_cast %230 : i32 to index
    %c0_142 = arith.constant 0 : index
    %232 = vector.load %arg4[%231, %c0_142] : memref<1600x64xbf16, #tpu.memory_space<vmem>>, vector<32x64xbf16>
    %cst_143 = arith.constant dense<0.000000e+00> : vector<2x64xf32>
    %233 = tpu.matmul %228, %232, %cst_143 {dimension_numbers = #tpu.dot_dimension_numbers<[1], [0], [0], [1], [0, 0, 1, 1], [], []>} : vector<2x32xbf16>, vector<32x64xbf16>, vector<2x64xf32> -> vector<2x64xf32>
    %234 = arith.addf %224, %233 : vector<2x64xf32>
    %c21_i32 = arith.constant 21 : i32
    %c2_i32_144 = arith.constant 2 : i32
    %235 = arith.muli %c21_i32, %c2_i32_144 : i32
    %c2_i32_145 = arith.constant 2 : i32
    %236 = arith.muli %235, %c2_i32_145 : i32
    %237 = arith.index_cast %236 : i32 to index
    %c0_146 = arith.constant 0 : index
    %238 = vector.load %arg9[%237, %c0_146] : memref<198x32xbf16, #tpu.memory_space<vmem>>, vector<2x32xbf16>
    %c32_i32_147 = arith.constant 32 : i32
    %239 = arith.muli %c21_i32, %c32_i32_147 : i32
    %240 = tpu.assume_multiple %239, 32 : i32
    %241 = arith.index_cast %240 : i32 to index
    %c0_148 = arith.constant 0 : index
    %242 = vector.load %arg4[%241, %c0_148] : memref<1600x64xbf16, #tpu.memory_space<vmem>>, vector<32x64xbf16>
    %cst_149 = arith.constant dense<0.000000e+00> : vector<2x64xf32>
    %243 = tpu.matmul %238, %242, %cst_149 {dimension_numbers = #tpu.dot_dimension_numbers<[1], [0], [0], [1], [0, 0, 1, 1], [], []>} : vector<2x32xbf16>, vector<32x64xbf16>, vector<2x64xf32> -> vector<2x64xf32>
    %244 = arith.addf %234, %243 : vector<2x64xf32>
    %c22_i32 = arith.constant 22 : i32
    %c2_i32_150 = arith.constant 2 : i32
    %245 = arith.muli %c22_i32, %c2_i32_150 : i32
    %c2_i32_151 = arith.constant 2 : i32
    %246 = arith.muli %245, %c2_i32_151 : i32
    %247 = arith.index_cast %246 : i32 to index
    %c0_152 = arith.constant 0 : index
    %248 = vector.load %arg9[%247, %c0_152] : memref<198x32xbf16, #tpu.memory_space<vmem>>, vector<2x32xbf16>
    %c32_i32_153 = arith.constant 32 : i32
    %249 = arith.muli %c22_i32, %c32_i32_153 : i32
    %250 = tpu.assume_multiple %249, 32 : i32
    %251 = arith.index_cast %250 : i32 to index
    %c0_154 = arith.constant 0 : index
    %252 = vector.load %arg4[%251, %c0_154] : memref<1600x64xbf16, #tpu.memory_space<vmem>>, vector<32x64xbf16>
    %cst_155 = arith.constant dense<0.000000e+00> : vector<2x64xf32>
    %253 = tpu.matmul %248, %252, %cst_155 {dimension_numbers = #tpu.dot_dimension_numbers<[1], [0], [0], [1], [0, 0, 1, 1], [], []>} : vector<2x32xbf16>, vector<32x64xbf16>, vector<2x64xf32> -> vector<2x64xf32>
    %254 = arith.addf %244, %253 : vector<2x64xf32>
    %c23_i32 = arith.constant 23 : i32
    %c2_i32_156 = arith.constant 2 : i32
    %255 = arith.muli %c23_i32, %c2_i32_156 : i32
    %c2_i32_157 = arith.constant 2 : i32
    %256 = arith.muli %255, %c2_i32_157 : i32
    %257 = arith.index_cast %256 : i32 to index
    %c0_158 = arith.constant 0 : index
    %258 = vector.load %arg9[%257, %c0_158] : memref<198x32xbf16, #tpu.memory_space<vmem>>, vector<2x32xbf16>
    %c32_i32_159 = arith.constant 32 : i32
    %259 = arith.muli %c23_i32, %c32_i32_159 : i32
    %260 = tpu.assume_multiple %259, 32 : i32
    %261 = arith.index_cast %260 : i32 to index
    %c0_160 = arith.constant 0 : index
    %262 = vector.load %arg4[%261, %c0_160] : memref<1600x64xbf16, #tpu.memory_space<vmem>>, vector<32x64xbf16>
    %cst_161 = arith.constant dense<0.000000e+00> : vector<2x64xf32>
    %263 = tpu.matmul %258, %262, %cst_161 {dimension_numbers = #tpu.dot_dimension_numbers<[1], [0], [0], [1], [0, 0, 1, 1], [], []>} : vector<2x32xbf16>, vector<32x64xbf16>, vector<2x64xf32> -> vector<2x64xf32>
    %264 = arith.addf %254, %263 : vector<2x64xf32>
    %c24_i32 = arith.constant 24 : i32
    %c2_i32_162 = arith.constant 2 : i32
    %265 = arith.muli %c24_i32, %c2_i32_162 : i32
    %c2_i32_163 = arith.constant 2 : i32
    %266 = arith.muli %265, %c2_i32_163 : i32
    %267 = arith.index_cast %266 : i32 to index
    %c0_164 = arith.constant 0 : index
    %268 = vector.load %arg9[%267, %c0_164] : memref<198x32xbf16, #tpu.memory_space<vmem>>, vector<2x32xbf16>
    %c32_i32_165 = arith.constant 32 : i32
    %269 = arith.muli %c24_i32, %c32_i32_165 : i32
    %270 = tpu.assume_multiple %269, 32 : i32
    %271 = arith.index_cast %270 : i32 to index
    %c0_166 = arith.constant 0 : index
    %272 = vector.load %arg4[%271, %c0_166] : memref<1600x64xbf16, #tpu.memory_space<vmem>>, vector<32x64xbf16>
    %cst_167 = arith.constant dense<0.000000e+00> : vector<2x64xf32>
    %273 = tpu.matmul %268, %272, %cst_167 {dimension_numbers = #tpu.dot_dimension_numbers<[1], [0], [0], [1], [0, 0, 1, 1], [], []>} : vector<2x32xbf16>, vector<32x64xbf16>, vector<2x64xf32> -> vector<2x64xf32>
    %274 = arith.addf %264, %273 : vector<2x64xf32>
    %c25_i32 = arith.constant 25 : i32
    %c2_i32_168 = arith.constant 2 : i32
    %275 = arith.muli %c25_i32, %c2_i32_168 : i32
    %c2_i32_169 = arith.constant 2 : i32
    %276 = arith.muli %275, %c2_i32_169 : i32
    %277 = arith.index_cast %276 : i32 to index
    %c0_170 = arith.constant 0 : index
    %278 = vector.load %arg9[%277, %c0_170] : memref<198x32xbf16, #tpu.memory_space<vmem>>, vector<2x32xbf16>
    %c32_i32_171 = arith.constant 32 : i32
    %279 = arith.muli %c25_i32, %c32_i32_171 : i32
    %280 = tpu.assume_multiple %279, 32 : i32
    %281 = arith.index_cast %280 : i32 to index
    %c0_172 = arith.constant 0 : index
    %282 = vector.load %arg4[%281, %c0_172] : memref<1600x64xbf16, #tpu.memory_space<vmem>>, vector<32x64xbf16>
    %cst_173 = arith.constant dense<0.000000e+00> : vector<2x64xf32>
    %283 = tpu.matmul %278, %282, %cst_173 {dimension_numbers = #tpu.dot_dimension_numbers<[1], [0], [0], [1], [0, 0, 1, 1], [], []>} : vector<2x32xbf16>, vector<32x64xbf16>, vector<2x64xf32> -> vector<2x64xf32>
    %284 = arith.addf %274, %283 : vector<2x64xf32>
    %c26_i32 = arith.constant 26 : i32
    %c2_i32_174 = arith.constant 2 : i32
    %285 = arith.muli %c26_i32, %c2_i32_174 : i32
    %c2_i32_175 = arith.constant 2 : i32
    %286 = arith.muli %285, %c2_i32_175 : i32
    %287 = arith.index_cast %286 : i32 to index
    %c0_176 = arith.constant 0 : index
    %288 = vector.load %arg9[%287, %c0_176] : memref<198x32xbf16, #tpu.memory_space<vmem>>, vector<2x32xbf16>
    %c32_i32_177 = arith.constant 32 : i32
    %289 = arith.muli %c26_i32, %c32_i32_177 : i32
    %290 = tpu.assume_multiple %289, 32 : i32
    %291 = arith.index_cast %290 : i32 to index
    %c0_178 = arith.constant 0 : index
    %292 = vector.load %arg4[%291, %c0_178] : memref<1600x64xbf16, #tpu.memory_space<vmem>>, vector<32x64xbf16>
    %cst_179 = arith.constant dense<0.000000e+00> : vector<2x64xf32>
    %293 = tpu.matmul %288, %292, %cst_179 {dimension_numbers = #tpu.dot_dimension_numbers<[1], [0], [0], [1], [0, 0, 1, 1], [], []>} : vector<2x32xbf16>, vector<32x64xbf16>, vector<2x64xf32> -> vector<2x64xf32>
    %294 = arith.addf %284, %293 : vector<2x64xf32>
    %c27_i32 = arith.constant 27 : i32
    %c2_i32_180 = arith.constant 2 : i32
    %295 = arith.muli %c27_i32, %c2_i32_180 : i32
    %c2_i32_181 = arith.constant 2 : i32
    %296 = arith.muli %295, %c2_i32_181 : i32
    %297 = arith.index_cast %296 : i32 to index
    %c0_182 = arith.constant 0 : index
    %298 = vector.load %arg9[%297, %c0_182] : memref<198x32xbf16, #tpu.memory_space<vmem>>, vector<2x32xbf16>
    %c32_i32_183 = arith.constant 32 : i32
    %299 = arith.muli %c27_i32, %c32_i32_183 : i32
    %300 = tpu.assume_multiple %299, 32 : i32
    %301 = arith.index_cast %300 : i32 to index
    %c0_184 = arith.constant 0 : index
    %302 = vector.load %arg4[%301, %c0_184] : memref<1600x64xbf16, #tpu.memory_space<vmem>>, vector<32x64xbf16>
    %cst_185 = arith.constant dense<0.000000e+00> : vector<2x64xf32>
    %303 = tpu.matmul %298, %302, %cst_185 {dimension_numbers = #tpu.dot_dimension_numbers<[1], [0], [0], [1], [0, 0, 1, 1], [], []>} : vector<2x32xbf16>, vector<32x64xbf16>, vector<2x64xf32> -> vector<2x64xf32>
    %304 = arith.addf %294, %303 : vector<2x64xf32>
    %c28_i32 = arith.constant 28 : i32
    %c2_i32_186 = arith.constant 2 : i32
    %305 = arith.muli %c28_i32, %c2_i32_186 : i32
    %c2_i32_187 = arith.constant 2 : i32
    %306 = arith.muli %305, %c2_i32_187 : i32
    %307 = arith.index_cast %306 : i32 to index
    %c0_188 = arith.constant 0 : index
    %308 = vector.load %arg9[%307, %c0_188] : memref<198x32xbf16, #tpu.memory_space<vmem>>, vector<2x32xbf16>
    %c32_i32_189 = arith.constant 32 : i32
    %309 = arith.muli %c28_i32, %c32_i32_189 : i32
    %310 = tpu.assume_multiple %309, 32 : i32
    %311 = arith.index_cast %310 : i32 to index
    %c0_190 = arith.constant 0 : index
    %312 = vector.load %arg4[%311, %c0_190] : memref<1600x64xbf16, #tpu.memory_space<vmem>>, vector<32x64xbf16>
    %cst_191 = arith.constant dense<0.000000e+00> : vector<2x64xf32>
    %313 = tpu.matmul %308, %312, %cst_191 {dimension_numbers = #tpu.dot_dimension_numbers<[1], [0], [0], [1], [0, 0, 1, 1], [], []>} : vector<2x32xbf16>, vector<32x64xbf16>, vector<2x64xf32> -> vector<2x64xf32>
    %314 = arith.addf %304, %313 : vector<2x64xf32>
    %c29_i32 = arith.constant 29 : i32
    %c2_i32_192 = arith.constant 2 : i32
    %315 = arith.muli %c29_i32, %c2_i32_192 : i32
    %c2_i32_193 = arith.constant 2 : i32
    %316 = arith.muli %315, %c2_i32_193 : i32
    %317 = arith.index_cast %316 : i32 to index
    %c0_194 = arith.constant 0 : index
    %318 = vector.load %arg9[%317, %c0_194] : memref<198x32xbf16, #tpu.memory_space<vmem>>, vector<2x32xbf16>
    %c32_i32_195 = arith.constant 32 : i32
    %319 = arith.muli %c29_i32, %c32_i32_195 : i32
    %320 = tpu.assume_multiple %319, 32 : i32
    %321 = arith.index_cast %320 : i32 to index
    %c0_196 = arith.constant 0 : index
    %322 = vector.load %arg4[%321, %c0_196] : memref<1600x64xbf16, #tpu.memory_space<vmem>>, vector<32x64xbf16>
    %cst_197 = arith.constant dense<0.000000e+00> : vector<2x64xf32>
    %323 = tpu.matmul %318, %322, %cst_197 {dimension_numbers = #tpu.dot_dimension_numbers<[1], [0], [0], [1], [0, 0, 1, 1], [], []>} : vector<2x32xbf16>, vector<32x64xbf16>, vector<2x64xf32> -> vector<2x64xf32>
    %324 = arith.addf %314, %323 : vector<2x64xf32>
    %c30_i32 = arith.constant 30 : i32
    %c2_i32_198 = arith.constant 2 : i32
    %325 = arith.muli %c30_i32, %c2_i32_198 : i32
    %c2_i32_199 = arith.constant 2 : i32
    %326 = arith.muli %325, %c2_i32_199 : i32
    %327 = arith.index_cast %326 : i32 to index
    %c0_200 = arith.constant 0 : index
    %328 = vector.load %arg9[%327, %c0_200] : memref<198x32xbf16, #tpu.memory_space<vmem>>, vector<2x32xbf16>
    %c32_i32_201 = arith.constant 32 : i32
    %329 = arith.muli %c30_i32, %c32_i32_201 : i32
    %330 = tpu.assume_multiple %329, 32 : i32
    %331 = arith.index_cast %330 : i32 to index
    %c0_202 = arith.constant 0 : index
    %332 = vector.load %arg4[%331, %c0_202] : memref<1600x64xbf16, #tpu.memory_space<vmem>>, vector<32x64xbf16>
    %cst_203 = arith.constant dense<0.000000e+00> : vector<2x64xf32>
    %333 = tpu.matmul %328, %332, %cst_203 {dimension_numbers = #tpu.dot_dimension_numbers<[1], [0], [0], [1], [0, 0, 1, 1], [], []>} : vector<2x32xbf16>, vector<32x64xbf16>, vector<2x64xf32> -> vector<2x64xf32>
    %334 = arith.addf %324, %333 : vector<2x64xf32>
    %c31_i32 = arith.constant 31 : i32
    %c2_i32_204 = arith.constant 2 : i32
    %335 = arith.muli %c31_i32, %c2_i32_204 : i32
    %c2_i32_205 = arith.constant 2 : i32
    %336 = arith.muli %335, %c2_i32_205 : i32
    %337 = arith.index_cast %336 : i32 to index
    %c0_206 = arith.constant 0 : index
    %338 = vector.load %arg9[%337, %c0_206] : memref<198x32xbf16, #tpu.memory_space<vmem>>, vector<2x32xbf16>
    %c32_i32_207 = arith.constant 32 : i32
    %339 = arith.muli %c31_i32, %c32_i32_207 : i32
    %340 = tpu.assume_multiple %339, 32 : i32
    %341 = arith.index_cast %340 : i32 to index
    %c0_208 = arith.constant 0 : index
    %342 = vector.load %arg4[%341, %c0_208] : memref<1600x64xbf16, #tpu.memory_space<vmem>>, vector<32x64xbf16>
    %cst_209 = arith.constant dense<0.000000e+00> : vector<2x64xf32>
    %343 = tpu.matmul %338, %342, %cst_209 {dimension_numbers = #tpu.dot_dimension_numbers<[1], [0], [0], [1], [0, 0, 1, 1], [], []>} : vector<2x32xbf16>, vector<32x64xbf16>, vector<2x64xf32> -> vector<2x64xf32>
    %344 = arith.addf %334, %343 : vector<2x64xf32>
    %c32_i32_210 = arith.constant 32 : i32
    %c2_i32_211 = arith.constant 2 : i32
    %345 = arith.muli %c32_i32_210, %c2_i32_211 : i32
    %c2_i32_212 = arith.constant 2 : i32
    %346 = arith.muli %345, %c2_i32_212 : i32
    %347 = arith.index_cast %346 : i32 to index
    %c0_213 = arith.constant 0 : index
    %348 = vector.load %arg9[%347, %c0_213] : memref<198x32xbf16, #tpu.memory_space<vmem>>, vector<2x32xbf16>
    %c32_i32_214 = arith.constant 32 : i32
    %349 = arith.muli %c32_i32_210, %c32_i32_214 : i32
    %350 = tpu.assume_multiple %349, 32 : i32
    %351 = arith.index_cast %350 : i32 to index
    %c0_215 = arith.constant 0 : index
    %352 = vector.load %arg4[%351, %c0_215] : memref<1600x64xbf16, #tpu.memory_space<vmem>>, vector<32x64xbf16>
    %cst_216 = arith.constant dense<0.000000e+00> : vector<2x64xf32>
    %353 = tpu.matmul %348, %352, %cst_216 {dimension_numbers = #tpu.dot_dimension_numbers<[1], [0], [0], [1], [0, 0, 1, 1], [], []>} : vector<2x32xbf16>, vector<32x64xbf16>, vector<2x64xf32> -> vector<2x64xf32>
    %354 = arith.addf %344, %353 : vector<2x64xf32>
    %c33_i32 = arith.constant 33 : i32
    %c2_i32_217 = arith.constant 2 : i32
    %355 = arith.muli %c33_i32, %c2_i32_217 : i32
    %c2_i32_218 = arith.constant 2 : i32
    %356 = arith.muli %355, %c2_i32_218 : i32
    %357 = arith.index_cast %356 : i32 to index
    %c0_219 = arith.constant 0 : index
    %358 = vector.load %arg9[%357, %c0_219] : memref<198x32xbf16, #tpu.memory_space<vmem>>, vector<2x32xbf16>
    %c32_i32_220 = arith.constant 32 : i32
    %359 = arith.muli %c33_i32, %c32_i32_220 : i32
    %360 = tpu.assume_multiple %359, 32 : i32
    %361 = arith.index_cast %360 : i32 to index
    %c0_221 = arith.constant 0 : index
    %362 = vector.load %arg4[%361, %c0_221] : memref<1600x64xbf16, #tpu.memory_space<vmem>>, vector<32x64xbf16>
    %cst_222 = arith.constant dense<0.000000e+00> : vector<2x64xf32>
    %363 = tpu.matmul %358, %362, %cst_222 {dimension_numbers = #tpu.dot_dimension_numbers<[1], [0], [0], [1], [0, 0, 1, 1], [], []>} : vector<2x32xbf16>, vector<32x64xbf16>, vector<2x64xf32> -> vector<2x64xf32>
    %364 = arith.addf %354, %363 : vector<2x64xf32>
    %c34_i32 = arith.constant 34 : i32
    %c2_i32_223 = arith.constant 2 : i32
    %365 = arith.muli %c34_i32, %c2_i32_223 : i32
    %c2_i32_224 = arith.constant 2 : i32
    %366 = arith.muli %365, %c2_i32_224 : i32
    %367 = arith.index_cast %366 : i32 to index
    %c0_225 = arith.constant 0 : index
    %368 = vector.load %arg9[%367, %c0_225] : memref<198x32xbf16, #tpu.memory_space<vmem>>, vector<2x32xbf16>
    %c32_i32_226 = arith.constant 32 : i32
    %369 = arith.muli %c34_i32, %c32_i32_226 : i32
    %370 = tpu.assume_multiple %369, 32 : i32
    %371 = arith.index_cast %370 : i32 to index
    %c0_227 = arith.constant 0 : index
    %372 = vector.load %arg4[%371, %c0_227] : memref<1600x64xbf16, #tpu.memory_space<vmem>>, vector<32x64xbf16>
    %cst_228 = arith.constant dense<0.000000e+00> : vector<2x64xf32>
    %373 = tpu.matmul %368, %372, %cst_228 {dimension_numbers = #tpu.dot_dimension_numbers<[1], [0], [0], [1], [0, 0, 1, 1], [], []>} : vector<2x32xbf16>, vector<32x64xbf16>, vector<2x64xf32> -> vector<2x64xf32>
    %374 = arith.addf %364, %373 : vector<2x64xf32>
    %c35_i32 = arith.constant 35 : i32
    %c2_i32_229 = arith.constant 2 : i32
    %375 = arith.muli %c35_i32, %c2_i32_229 : i32
    %c2_i32_230 = arith.constant 2 : i32
    %376 = arith.muli %375, %c2_i32_230 : i32
    %377 = arith.index_cast %376 : i32 to index
    %c0_231 = arith.constant 0 : index
    %378 = vector.load %arg9[%377, %c0_231] : memref<198x32xbf16, #tpu.memory_space<vmem>>, vector<2x32xbf16>
    %c32_i32_232 = arith.constant 32 : i32
    %379 = arith.muli %c35_i32, %c32_i32_232 : i32
    %380 = tpu.assume_multiple %379, 32 : i32
    %381 = arith.index_cast %380 : i32 to index
    %c0_233 = arith.constant 0 : index
    %382 = vector.load %arg4[%381, %c0_233] : memref<1600x64xbf16, #tpu.memory_space<vmem>>, vector<32x64xbf16>
    %cst_234 = arith.constant dense<0.000000e+00> : vector<2x64xf32>
    %383 = tpu.matmul %378, %382, %cst_234 {dimension_numbers = #tpu.dot_dimension_numbers<[1], [0], [0], [1], [0, 0, 1, 1], [], []>} : vector<2x32xbf16>, vector<32x64xbf16>, vector<2x64xf32> -> vector<2x64xf32>
    %384 = arith.addf %374, %383 : vector<2x64xf32>
    %c36_i32 = arith.constant 36 : i32
    %c2_i32_235 = arith.constant 2 : i32
    %385 = arith.muli %c36_i32, %c2_i32_235 : i32
    %c2_i32_236 = arith.constant 2 : i32
    %386 = arith.muli %385, %c2_i32_236 : i32
    %387 = arith.index_cast %386 : i32 to index
    %c0_237 = arith.constant 0 : index
    %388 = vector.load %arg9[%387, %c0_237] : memref<198x32xbf16, #tpu.memory_space<vmem>>, vector<2x32xbf16>
    %c32_i32_238 = arith.constant 32 : i32
    %389 = arith.muli %c36_i32, %c32_i32_238 : i32
    %390 = tpu.assume_multiple %389, 32 : i32
    %391 = arith.index_cast %390 : i32 to index
    %c0_239 = arith.constant 0 : index
    %392 = vector.load %arg4[%391, %c0_239] : memref<1600x64xbf16, #tpu.memory_space<vmem>>, vector<32x64xbf16>
    %cst_240 = arith.constant dense<0.000000e+00> : vector<2x64xf32>
    %393 = tpu.matmul %388, %392, %cst_240 {dimension_numbers = #tpu.dot_dimension_numbers<[1], [0], [0], [1], [0, 0, 1, 1], [], []>} : vector<2x32xbf16>, vector<32x64xbf16>, vector<2x64xf32> -> vector<2x64xf32>
    %394 = arith.addf %384, %393 : vector<2x64xf32>
    %c37_i32 = arith.constant 37 : i32
    %c2_i32_241 = arith.constant 2 : i32
    %395 = arith.muli %c37_i32, %c2_i32_241 : i32
    %c2_i32_242 = arith.constant 2 : i32
    %396 = arith.muli %395, %c2_i32_242 : i32
    %397 = arith.index_cast %396 : i32 to index
    %c0_243 = arith.constant 0 : index
    %398 = vector.load %arg9[%397, %c0_243] : memref<198x32xbf16, #tpu.memory_space<vmem>>, vector<2x32xbf16>
    %c32_i32_244 = arith.constant 32 : i32
    %399 = arith.muli %c37_i32, %c32_i32_244 : i32
    %400 = tpu.assume_multiple %399, 32 : i32
    %401 = arith.index_cast %400 : i32 to index
    %c0_245 = arith.constant 0 : index
    %402 = vector.load %arg4[%401, %c0_245] : memref<1600x64xbf16, #tpu.memory_space<vmem>>, vector<32x64xbf16>
    %cst_246 = arith.constant dense<0.000000e+00> : vector<2x64xf32>
    %403 = tpu.matmul %398, %402, %cst_246 {dimension_numbers = #tpu.dot_dimension_numbers<[1], [0], [0], [1], [0, 0, 1, 1], [], []>} : vector<2x32xbf16>, vector<32x64xbf16>, vector<2x64xf32> -> vector<2x64xf32>
    %404 = arith.addf %394, %403 : vector<2x64xf32>
    %c38_i32 = arith.constant 38 : i32
    %c2_i32_247 = arith.constant 2 : i32
    %405 = arith.muli %c38_i32, %c2_i32_247 : i32
    %c2_i32_248 = arith.constant 2 : i32
    %406 = arith.muli %405, %c2_i32_248 : i32
    %407 = arith.index_cast %406 : i32 to index
    %c0_249 = arith.constant 0 : index
    %408 = vector.load %arg9[%407, %c0_249] : memref<198x32xbf16, #tpu.memory_space<vmem>>, vector<2x32xbf16>
    %c32_i32_250 = arith.constant 32 : i32
    %409 = arith.muli %c38_i32, %c32_i32_250 : i32
    %410 = tpu.assume_multiple %409, 32 : i32
    %411 = arith.index_cast %410 : i32 to index
    %c0_251 = arith.constant 0 : index
    %412 = vector.load %arg4[%411, %c0_251] : memref<1600x64xbf16, #tpu.memory_space<vmem>>, vector<32x64xbf16>
    %cst_252 = arith.constant dense<0.000000e+00> : vector<2x64xf32>
    %413 = tpu.matmul %408, %412, %cst_252 {dimension_numbers = #tpu.dot_dimension_numbers<[1], [0], [0], [1], [0, 0, 1, 1], [], []>} : vector<2x32xbf16>, vector<32x64xbf16>, vector<2x64xf32> -> vector<2x64xf32>
    %414 = arith.addf %404, %413 : vector<2x64xf32>
    %c39_i32 = arith.constant 39 : i32
    %c2_i32_253 = arith.constant 2 : i32
    %415 = arith.muli %c39_i32, %c2_i32_253 : i32
    %c2_i32_254 = arith.constant 2 : i32
    %416 = arith.muli %415, %c2_i32_254 : i32
    %417 = arith.index_cast %416 : i32 to index
    %c0_255 = arith.constant 0 : index
    %418 = vector.load %arg9[%417, %c0_255] : memref<198x32xbf16, #tpu.memory_space<vmem>>, vector<2x32xbf16>
    %c32_i32_256 = arith.constant 32 : i32
    %419 = arith.muli %c39_i32, %c32_i32_256 : i32
    %420 = tpu.assume_multiple %419, 32 : i32
    %421 = arith.index_cast %420 : i32 to index
    %c0_257 = arith.constant 0 : index
    %422 = vector.load %arg4[%421, %c0_257] : memref<1600x64xbf16, #tpu.memory_space<vmem>>, vector<32x64xbf16>
    %cst_258 = arith.constant dense<0.000000e+00> : vector<2x64xf32>
    %423 = tpu.matmul %418, %422, %cst_258 {dimension_numbers = #tpu.dot_dimension_numbers<[1], [0], [0], [1], [0, 0, 1, 1], [], []>} : vector<2x32xbf16>, vector<32x64xbf16>, vector<2x64xf32> -> vector<2x64xf32>
    %424 = arith.addf %414, %423 : vector<2x64xf32>
    %c40_i32 = arith.constant 40 : i32
    %c2_i32_259 = arith.constant 2 : i32
    %425 = arith.muli %c40_i32, %c2_i32_259 : i32
    %c2_i32_260 = arith.constant 2 : i32
    %426 = arith.muli %425, %c2_i32_260 : i32
    %427 = arith.index_cast %426 : i32 to index
    %c0_261 = arith.constant 0 : index
    %428 = vector.load %arg9[%427, %c0_261] : memref<198x32xbf16, #tpu.memory_space<vmem>>, vector<2x32xbf16>
    %c32_i32_262 = arith.constant 32 : i32
    %429 = arith.muli %c40_i32, %c32_i32_262 : i32
    %430 = tpu.assume_multiple %429, 32 : i32
    %431 = arith.index_cast %430 : i32 to index
    %c0_263 = arith.constant 0 : index
    %432 = vector.load %arg4[%431, %c0_263] : memref<1600x64xbf16, #tpu.memory_space<vmem>>, vector<32x64xbf16>
    %cst_264 = arith.constant dense<0.000000e+00> : vector<2x64xf32>
    %433 = tpu.matmul %428, %432, %cst_264 {dimension_numbers = #tpu.dot_dimension_numbers<[1], [0], [0], [1], [0, 0, 1, 1], [], []>} : vector<2x32xbf16>, vector<32x64xbf16>, vector<2x64xf32> -> vector<2x64xf32>
    %434 = arith.addf %424, %433 : vector<2x64xf32>
    %c41_i32 = arith.constant 41 : i32
    %c2_i32_265 = arith.constant 2 : i32
    %435 = arith.muli %c41_i32, %c2_i32_265 : i32
    %c2_i32_266 = arith.constant 2 : i32
    %436 = arith.muli %435, %c2_i32_266 : i32
    %437 = arith.index_cast %436 : i32 to index
    %c0_267 = arith.constant 0 : index
    %438 = vector.load %arg9[%437, %c0_267] : memref<198x32xbf16, #tpu.memory_space<vmem>>, vector<2x32xbf16>
    %c32_i32_268 = arith.constant 32 : i32
    %439 = arith.muli %c41_i32, %c32_i32_268 : i32
    %440 = tpu.assume_multiple %439, 32 : i32
    %441 = arith.index_cast %440 : i32 to index
    %c0_269 = arith.constant 0 : index
    %442 = vector.load %arg4[%441, %c0_269] : memref<1600x64xbf16, #tpu.memory_space<vmem>>, vector<32x64xbf16>
    %cst_270 = arith.constant dense<0.000000e+00> : vector<2x64xf32>
    %443 = tpu.matmul %438, %442, %cst_270 {dimension_numbers = #tpu.dot_dimension_numbers<[1], [0], [0], [1], [0, 0, 1, 1], [], []>} : vector<2x32xbf16>, vector<32x64xbf16>, vector<2x64xf32> -> vector<2x64xf32>
    %444 = arith.addf %434, %443 : vector<2x64xf32>
    %c42_i32 = arith.constant 42 : i32
    %c2_i32_271 = arith.constant 2 : i32
    %445 = arith.muli %c42_i32, %c2_i32_271 : i32
    %c2_i32_272 = arith.constant 2 : i32
    %446 = arith.muli %445, %c2_i32_272 : i32
    %447 = arith.index_cast %446 : i32 to index
    %c0_273 = arith.constant 0 : index
    %448 = vector.load %arg9[%447, %c0_273] : memref<198x32xbf16, #tpu.memory_space<vmem>>, vector<2x32xbf16>
    %c32_i32_274 = arith.constant 32 : i32
    %449 = arith.muli %c42_i32, %c32_i32_274 : i32
    %450 = tpu.assume_multiple %449, 32 : i32
    %451 = arith.index_cast %450 : i32 to index
    %c0_275 = arith.constant 0 : index
    %452 = vector.load %arg4[%451, %c0_275] : memref<1600x64xbf16, #tpu.memory_space<vmem>>, vector<32x64xbf16>
    %cst_276 = arith.constant dense<0.000000e+00> : vector<2x64xf32>
    %453 = tpu.matmul %448, %452, %cst_276 {dimension_numbers = #tpu.dot_dimension_numbers<[1], [0], [0], [1], [0, 0, 1, 1], [], []>} : vector<2x32xbf16>, vector<32x64xbf16>, vector<2x64xf32> -> vector<2x64xf32>
    %454 = arith.addf %444, %453 : vector<2x64xf32>
    %c43_i32 = arith.constant 43 : i32
    %c2_i32_277 = arith.constant 2 : i32
    %455 = arith.muli %c43_i32, %c2_i32_277 : i32
    %c2_i32_278 = arith.constant 2 : i32
    %456 = arith.muli %455, %c2_i32_278 : i32
    %457 = arith.index_cast %456 : i32 to index
    %c0_279 = arith.constant 0 : index
    %458 = vector.load %arg9[%457, %c0_279] : memref<198x32xbf16, #tpu.memory_space<vmem>>, vector<2x32xbf16>
    %c32_i32_280 = arith.constant 32 : i32
    %459 = arith.muli %c43_i32, %c32_i32_280 : i32
    %460 = tpu.assume_multiple %459, 32 : i32
    %461 = arith.index_cast %460 : i32 to index
    %c0_281 = arith.constant 0 : index
    %462 = vector.load %arg4[%461, %c0_281] : memref<1600x64xbf16, #tpu.memory_space<vmem>>, vector<32x64xbf16>
    %cst_282 = arith.constant dense<0.000000e+00> : vector<2x64xf32>
    %463 = tpu.matmul %458, %462, %cst_282 {dimension_numbers = #tpu.dot_dimension_numbers<[1], [0], [0], [1], [0, 0, 1, 1], [], []>} : vector<2x32xbf16>, vector<32x64xbf16>, vector<2x64xf32> -> vector<2x64xf32>
    %464 = arith.addf %454, %463 : vector<2x64xf32>
    %c44_i32 = arith.constant 44 : i32
    %c2_i32_283 = arith.constant 2 : i32
    %465 = arith.muli %c44_i32, %c2_i32_283 : i32
    %c2_i32_284 = arith.constant 2 : i32
    %466 = arith.muli %465, %c2_i32_284 : i32
    %467 = arith.index_cast %466 : i32 to index
    %c0_285 = arith.constant 0 : index
    %468 = vector.load %arg9[%467, %c0_285] : memref<198x32xbf16, #tpu.memory_space<vmem>>, vector<2x32xbf16>
    %c32_i32_286 = arith.constant 32 : i32
    %469 = arith.muli %c44_i32, %c32_i32_286 : i32
    %470 = tpu.assume_multiple %469, 32 : i32
    %471 = arith.index_cast %470 : i32 to index
    %c0_287 = arith.constant 0 : index
    %472 = vector.load %arg4[%471, %c0_287] : memref<1600x64xbf16, #tpu.memory_space<vmem>>, vector<32x64xbf16>
    %cst_288 = arith.constant dense<0.000000e+00> : vector<2x64xf32>
    %473 = tpu.matmul %468, %472, %cst_288 {dimension_numbers = #tpu.dot_dimension_numbers<[1], [0], [0], [1], [0, 0, 1, 1], [], []>} : vector<2x32xbf16>, vector<32x64xbf16>, vector<2x64xf32> -> vector<2x64xf32>
    %474 = arith.addf %464, %473 : vector<2x64xf32>
    %c45_i32 = arith.constant 45 : i32
    %c2_i32_289 = arith.constant 2 : i32
    %475 = arith.muli %c45_i32, %c2_i32_289 : i32
    %c2_i32_290 = arith.constant 2 : i32
    %476 = arith.muli %475, %c2_i32_290 : i32
    %477 = arith.index_cast %476 : i32 to index
    %c0_291 = arith.constant 0 : index
    %478 = vector.load %arg9[%477, %c0_291] : memref<198x32xbf16, #tpu.memory_space<vmem>>, vector<2x32xbf16>
    %c32_i32_292 = arith.constant 32 : i32
    %479 = arith.muli %c45_i32, %c32_i32_292 : i32
    %480 = tpu.assume_multiple %479, 32 : i32
    %481 = arith.index_cast %480 : i32 to index
    %c0_293 = arith.constant 0 : index
    %482 = vector.load %arg4[%481, %c0_293] : memref<1600x64xbf16, #tpu.memory_space<vmem>>, vector<32x64xbf16>
    %cst_294 = arith.constant dense<0.000000e+00> : vector<2x64xf32>
    %483 = tpu.matmul %478, %482, %cst_294 {dimension_numbers = #tpu.dot_dimension_numbers<[1], [0], [0], [1], [0, 0, 1, 1], [], []>} : vector<2x32xbf16>, vector<32x64xbf16>, vector<2x64xf32> -> vector<2x64xf32>
    %484 = arith.addf %474, %483 : vector<2x64xf32>
    %c46_i32 = arith.constant 46 : i32
    %c2_i32_295 = arith.constant 2 : i32
    %485 = arith.muli %c46_i32, %c2_i32_295 : i32
    %c2_i32_296 = arith.constant 2 : i32
    %486 = arith.muli %485, %c2_i32_296 : i32
    %487 = arith.index_cast %486 : i32 to index
    %c0_297 = arith.constant 0 : index
    %488 = vector.load %arg9[%487, %c0_297] : memref<198x32xbf16, #tpu.memory_space<vmem>>, vector<2x32xbf16>
    %c32_i32_298 = arith.constant 32 : i32
    %489 = arith.muli %c46_i32, %c32_i32_298 : i32
    %490 = tpu.assume_multiple %489, 32 : i32
    %491 = arith.index_cast %490 : i32 to index
    %c0_299 = arith.constant 0 : index
    %492 = vector.load %arg4[%491, %c0_299] : memref<1600x64xbf16, #tpu.memory_space<vmem>>, vector<32x64xbf16>
    %cst_300 = arith.constant dense<0.000000e+00> : vector<2x64xf32>
    %493 = tpu.matmul %488, %492, %cst_300 {dimension_numbers = #tpu.dot_dimension_numbers<[1], [0], [0], [1], [0, 0, 1, 1], [], []>} : vector<2x32xbf16>, vector<32x64xbf16>, vector<2x64xf32> -> vector<2x64xf32>
    %494 = arith.addf %484, %493 : vector<2x64xf32>
    %c47_i32 = arith.constant 47 : i32
    %c2_i32_301 = arith.constant 2 : i32
    %495 = arith.muli %c47_i32, %c2_i32_301 : i32
    %c2_i32_302 = arith.constant 2 : i32
    %496 = arith.muli %495, %c2_i32_302 : i32
    %497 = arith.index_cast %496 : i32 to index
    %c0_303 = arith.constant 0 : index
    %498 = vector.load %arg9[%497, %c0_303] : memref<198x32xbf16, #tpu.memory_space<vmem>>, vector<2x32xbf16>
    %c32_i32_304 = arith.constant 32 : i32
    %499 = arith.muli %c47_i32, %c32_i32_304 : i32
    %500 = tpu.assume_multiple %499, 32 : i32
    %501 = arith.index_cast %500 : i32 to index
    %c0_305 = arith.constant 0 : index
    %502 = vector.load %arg4[%501, %c0_305] : memref<1600x64xbf16, #tpu.memory_space<vmem>>, vector<32x64xbf16>
    %cst_306 = arith.constant dense<0.000000e+00> : vector<2x64xf32>
    %503 = tpu.matmul %498, %502, %cst_306 {dimension_numbers = #tpu.dot_dimension_numbers<[1], [0], [0], [1], [0, 0, 1, 1], [], []>} : vector<2x32xbf16>, vector<32x64xbf16>, vector<2x64xf32> -> vector<2x64xf32>
    %504 = arith.addf %494, %503 : vector<2x64xf32>
    %c48_i32 = arith.constant 48 : i32
    %c2_i32_307 = arith.constant 2 : i32
    %505 = arith.muli %c48_i32, %c2_i32_307 : i32
    %c2_i32_308 = arith.constant 2 : i32
    %506 = arith.muli %505, %c2_i32_308 : i32
    %507 = arith.index_cast %506 : i32 to index
    %c0_309 = arith.constant 0 : index
    %508 = vector.load %arg9[%507, %c0_309] : memref<198x32xbf16, #tpu.memory_space<vmem>>, vector<2x32xbf16>
    %c32_i32_310 = arith.constant 32 : i32
    %509 = arith.muli %c48_i32, %c32_i32_310 : i32
    %510 = tpu.assume_multiple %509, 32 : i32
    %511 = arith.index_cast %510 : i32 to index
    %c0_311 = arith.constant 0 : index
    %512 = vector.load %arg4[%511, %c0_311] : memref<1600x64xbf16, #tpu.memory_space<vmem>>, vector<32x64xbf16>
    %cst_312 = arith.constant dense<0.000000e+00> : vector<2x64xf32>
    %513 = tpu.matmul %508, %512, %cst_312 {dimension_numbers = #tpu.dot_dimension_numbers<[1], [0], [0], [1], [0, 0, 1, 1], [], []>} : vector<2x32xbf16>, vector<32x64xbf16>, vector<2x64xf32> -> vector<2x64xf32>
    %514 = arith.addf %504, %513 : vector<2x64xf32>
    %c49_i32 = arith.constant 49 : i32
    %c2_i32_313 = arith.constant 2 : i32
    %515 = arith.muli %c49_i32, %c2_i32_313 : i32
    %c2_i32_314 = arith.constant 2 : i32
    %516 = arith.muli %515, %c2_i32_314 : i32
    %517 = arith.index_cast %516 : i32 to index
    %c0_315 = arith.constant 0 : index
    %518 = vector.load %arg9[%517, %c0_315] : memref<198x32xbf16, #tpu.memory_space<vmem>>, vector<2x32xbf16>
    %c32_i32_316 = arith.constant 32 : i32
    %519 = arith.muli %c49_i32, %c32_i32_316 : i32
    %520 = tpu.assume_multiple %519, 32 : i32
    %521 = arith.index_cast %520 : i32 to index
    %c0_317 = arith.constant 0 : index
    %522 = vector.load %arg4[%521, %c0_317] : memref<1600x64xbf16, #tpu.memory_space<vmem>>, vector<32x64xbf16>
    %cst_318 = arith.constant dense<0.000000e+00> : vector<2x64xf32>
    %523 = tpu.matmul %518, %522, %cst_318 {dimension_numbers = #tpu.dot_dimension_numbers<[1], [0], [0], [1], [0, 0, 1, 1], [], []>} : vector<2x32xbf16>, vector<32x64xbf16>, vector<2x64xf32> -> vector<2x64xf32>
    %524 = arith.addf %514, %523 : vector<2x64xf32>
    %c50_i32 = arith.constant 50 : i32
    %c0_319 = arith.constant 0 : index
    %c0_320 = arith.constant 0 : index
    %525 = vector.load %arg5[%c0_319, %c0_320] : memref<1x64xf32, #tpu.memory_space<vmem>>, vector<1x64xf32>
    %526 = vector.broadcast %525 : vector<1x64xf32> to vector<2x64xf32>
    %527 = arith.addf %524, %526 : vector<2x64xf32>
    %cst_321 = arith.constant 0.000000e+00 : f32
    %528 = vector.broadcast %cst_321 : f32 to vector<2x64xf32>
    %529 = arith.maximumf %527, %528 : vector<2x64xf32>
    %c0_322 = arith.constant 0 : index
    %c0_323 = arith.constant 0 : index
    %530 = vector.load %arg6[%c0_322, %c0_323] : memref<1x64xf32, #tpu.memory_space<vmem>>, vector<1x64xf32>
    %531 = vector.broadcast %530 : vector<1x64xf32> to vector<2x64xf32>
    %532 = arith.mulf %529, %531 : vector<2x64xf32>
    %cst_324 = arith.constant dense<0.000000e+00> : vector<2xf32>
    %533 = vector.multi_reduction <add>, %532, %cst_324 [1] : vector<2x64xf32> to vector<2xf32>
    %534 = vector.shape_cast %533 : vector<2xf32> to vector<2x1xf32>
    %c0_325 = arith.constant 0 : index
    %c0_326 = arith.constant 0 : index
    %535 = vector.load %arg7[%c0_325, %c0_326] : memref<1x1xf32, #tpu.memory_space<vmem>>, vector<1x1xf32>
    %536 = vector.broadcast %535 : vector<1x1xf32> to vector<2x1xf32>
    %537 = arith.addf %534, %536 : vector<2x1xf32>
    %538 = arith.negf %537 : vector<2x1xf32>
    %539 = math.exp %538 : vector<2x1xf32>
    %cst_327 = arith.constant 1.000000e+00 : f32
    %540 = vector.broadcast %cst_327 : f32 to vector<2x1xf32>
    %541 = arith.addf %540, %539 : vector<2x1xf32>
    %542 = arith.divf %540, %541 : vector<2x1xf32>
    %c0_328 = arith.constant 0 : index
    %c0_329 = arith.constant 0 : index
    %543 = vector.load %arg8[%c0_328, %c0_329] : memref<2x1xf32, #tpu.memory_space<vmem>>, vector<2x1xf32>
    tpu.vector_store %arg8[%c0_328, %c0_329], %542 {strides = array<i32>} : memref<2x1xf32, #tpu.memory_space<vmem>>, vector<2x1xf32>,
    return
  }
  func.func @transform_0(%arg0: i32) -> (i32, i32) {
    %c0_i32 = arith.constant 0 : i32
    %c0_i32_0 = arith.constant 0 : i32
    %c0_i32_1 = arith.constant 0 : i32
    return %c0_i32, %c0_i32_0 : i32, i32
  }
  func.func @transform_1(%arg0: i32) -> (i32, i32, i32) {
    %c0_i32 = arith.constant 0 : i32
    %c0_i32_0 = arith.constant 0 : i32
    %c0_i32_1 = arith.constant 0 : i32
    %c0_i32_2 = arith.constant 0 : i32
    return %c0_i32, %c0_i32_0, %c0_i32_1 : i32, i32, i32
  }
  func.func @transform_2(%arg0: i32) -> (i32, i32) {
    %c0_i32 = arith.constant 0 : i32
    %c0_i32_0 = arith.constant 0 : i32
    %c0_i32_1 = arith.constant 0 : i32
    return %c0_i32, %c0_i32_0 : i32, i32
  }
  func.func @transform_3(%arg0: i32) -> (i32, i32) {
    %c0_i32 = arith.constant 0 : i32
    %c0_i32_0 = arith.constant 0 : i32
    %c0_i32_1 = arith.constant 0 : i32
    return %c0_i32, %c0_i32_0 : i32, i32
  }
  func.func @transform_4(%arg0: i32) -> (i32, i32) {
    %c0_i32 = arith.constant 0 : i32
    %c0_i32_0 = arith.constant 0 : i32
    %c0_i32_1 = arith.constant 0 : i32
    return %c0_i32, %c0_i32_0 : i32, i32
  }
  func.func @transform_5(%arg0: i32) -> (i32, i32) {
    %c0_i32 = arith.constant 0 : i32
    %c0_i32_0 = arith.constant 0 : i32
    %c0_i32_1 = arith.constant 0 : i32
    return %c0_i32, %c0_i32_0 : i32, i32
  }
  func.func @transform_6(%arg0: i32) -> (i32, i32) {
    %c0_i32 = arith.constant 0 : i32
    %c0_i32_0 = arith.constant 0 : i32
    %c0_i32_1 = arith.constant 0 : i32
    return %c0_i32, %c0_i32_0 : i32, i32
  }
  func.func @transform_7(%arg0: i32) -> (i32, i32) {
    %c0_i32 = arith.constant 0 : i32
    %c0_i32_0 = arith.constant 0 : i32
    %c0_i32_1 = arith.constant 0 : i32
    return %c0_i32, %c0_i32_0 : i32, i32
  }
}

</mosaic_0001>

<bundles_post_ra>
// kernel: audio_spelling_forward.1
= control target key start
LH: loop header
LB: loop body
LE: loop exit
PB: predicated region body
PF: predicated region fallthrough
CT: control target
= control target key end

     0   :  { %vm126_vm0 = vcmask 1046528   ;;  %vm197_vm1 = vcmask 1045504   ;;  %v5715_v0 = vmov 0.0   ;;  %v5716_v2 = vmov 65535   ;;  %s6787_s1 = inlined_call_operand.vmem [shape: bf16[3,13,32], index: 1, kind: input, shape index: {}]   ;;  %s6788_s0 = inlined_call_operand.vmem [shape: bf16[208,13], index: 0, kind: input, shape index: {}]   ;;  %s6789_s3 = inlined_call_operand.vmem [shape: bf16[1600,64], index: 3, kind: input, shape index: {}]   ;;  %s6790_s2 = inlined_call_operand.vmem [shape: f32[1,32], index: 2, kind: input, shape index: {}]   ;;  %s6791_s6 = inlined_call_operand.<no memory space> [shape: f32[1,1], index: 6, kind: input, shape index: {}]   ;;  %s6792_s4 = inlined_call_operand.vmem [shape: f32[1,64], index: 4, kind: input, shape index: {}]   ;;  %s6793_s5 = inlined_call_operand.vmem [shape: f32[1,64], index: 5, kind: input, shape index: {}]   ;;  %s6794_s7 = inlined_call_operand.vmem [shape: f32[2,1], index: 7, kind: output, shape index: {}]  }
   0x1   :  { %5001 = vmatprep.subr.bf16.mxu0 %v5715_v0  ;;  %5055 = vmatprep.subr.bf16.mxu1 %v5715_v0  ;;  %v5566_v1 = vld [vmem:[%s6787_s1 + $0x8] sm:$0x7f]   ;;  %v199_v3 = vsel %vm197_vm1, 4294967295, %v5716_v2  ;;  %v5567_v5 = vld [vmem:[%s6787_s1 + $0x10] sm:$0x7f]   ;;  %vm5717_vm2 = vmmov 0  }
   0x2   :  { %v200_v4 = vsel %vm126_vm0, %v199_v3, 0  ;;  %5003 = vmatprep.mubr.msk.bf16.mxu0 %vm5717_vm2, %v5715_v0  ;;  %5057 = vmatprep.mubr.msk.bf16.mxu1 %vm5717_vm2, %v5715_v0  ;;  %v5570_v6 = vld [vmem:[%s6788_s0 + $0x8] sm:$0xff]   ;;  %v5568_v8 = vld [vmem:[%s6787_s1] sm:$0x7f]   ;;  %vm157_vm3 = vcmask 105472   ;;  %v5573_v18 = vld [vmem:[%s6788_s0 + $0x10] sm:$0xff]  }
   0x3   :  { %v202_v7 = vand.u32 %v5566_v1, %v200_v4  ;;  %v30_v9 = vld [vmem:[%s6788_s0 + $0x4] sm:$0xf]  ;;  %v56_v10 = vld [vmem:[%s6788_s0] sm:$0xe]  ;;  %v389_v11 = vand.u32 %v5568_v8, %v200_v4  ;;  %v128_v13 = vrot.slane %v5570_v6, 1  ;;  %v609_v16 = vand.u32 %v5567_v5, %v200_v4  ;;  %v5574_v25 = vld [vmem:[%s6788_s0 + $0x18] sm:$0xff]  }
   0x4   :  { %v4322_v12 = vcombine.low %v56_v10, %v30_v9  ;;  %v29_v14 = vld [vmem:[%s6788_s0] sm:$0xf]  ;;  %v130_v21 = vrot.slane %v5573_v18, 1  ;;  %v540_v23 = vrot.slane %v5570_v6, 2  ;;  %v5576_v28 = vld [vmem:[%s6788_s0 + $0x28] sm:$0xff]   ;;  %v5577_v29 = vld [vmem:[%s6788_s0 + $0x30] sm:$0xff]  }
   0x5   :  { %5002 = vmatpush3.bf16.msra.mxu0 %v202_v7  ;;  %v4349_v15 = vcombine.low %v29_v14, %v30_v9  ;;  %5056 = vmatpush3.bf16.msra.mxu1 %v389_v11  ;;  %v527_v20 = vld [vmem:[%s6788_s0] sm:$0xc]  ;;  %v542_v31 = vrot.slane %v5573_v18, 2  ;;  %v544_v32 = vrot.slane %v5574_v25, 2  ;;  %v132_v33 = vrot.slane %v5574_v25, 1  ;;  %v5578_v43 = vld [vmem:[%s6788_s0 + $0x38] sm:$0xff]  }
   0x6   :  { %5109 = vmatprep.subr.bf16.mxu0 %v5715_v0  ;;  %v127_v17 = vrot.slane %v4322_v12, 1  ;;  %5163 = vmatprep.subr.bf16.mxu1 %v5715_v0  ;;  %v4367_v22 = vcombine.low %v527_v20, %v30_v9  ;;  %v131_v24 = vsel %vm126_vm0, %v128_v13, %v130_v21  ;;  %v5575_v27 = vld [vmem:[%s6788_s0 + $0x20] sm:$0xff]   ;;  %v548_v35 = vrot.slane %v5576_v28, 2  ;;  %v5897_v59 = vld [vmem:[%s6788_s0 + $0x48] sm:$0xff]   ;;  %v5910_v62 = vld [vmem:[%s6788_s0 + $0x50] sm:$0xff]  }
   0x7   :  { %v546_v34 = vrot.slane %v5575_v27, 2  ;;  %v5826_v36 = vsel %vm197_vm1, %v540_v23, %v542_v31  ;;  %v5829_v37 = vsel %vm197_vm1, %v542_v31, %v544_v32  ;;  %v550_v38 = vrot.slane %v5577_v29, 2  ;;  %v5857_v48 = vld [vmem:[%s6788_s0 + $0x40] sm:$0xff]   ;;  %v5924_v2 = vld [vmem:[%s6788_s0 + $0x58] sm:$0xff]  }
   0x8   :  { %v129_v19 = vsel %vm126_vm0, %v127_v17, %v128_v13  ;;  %5058 = vmatmul.mubr.msk.bf16.vlgmr.msra.gmra.mxu1 %vm157_vm3, %v4349_v15  ;;  %v539_v26 = vrot.slane %v4367_v22, 2  ;;  %v133_v42 = vsel %vm126_vm0, %v130_v21, %v132_v33  ;;  %v134_v44 = vrot.slane %v5575_v27, 1  ;;  %v53_v4 = vld [vmem:[%s6788_s0 + $0x60] sm:$0xf]  ;;  %v57_v5 = vld [vmem:[%s6788_s0 + $0x64] sm:$0x1] }
   0x9   :  { %5004 = vmatmul.mubr.msk.bf16.vlgmr.msra.gmra.mxu0 %vm157_vm3, %v129_v19  ;;  %5061 = vmatprep.mubr.msk.bf16.mxu1 %vm5717_vm2, %v5715_v0  ;;  %v5832_v39 = vsel %vm197_vm1, %v544_v32, %v546_v34  ;;  %v5835_v40 = vsel %vm197_vm1, %v546_v34, %v548_v35  ;;  %v5838_v41 = vsel %vm197_vm1, %v548_v35, %v550_v38  ;;  %v552_v45 = vrot.slane %v5578_v43, 2  ;;  %v5586_v11 = vld [vmem:[%s6789_s3 + $0x18] sm:$0xff]   ;;  %v5587_v13 = vld [vmem:[%s6789_s3 + $0x10] sm:$0xff]  }
   0xa   :  { %5110 = vmatpush3.bf16.msra.mxu0 %v609_v16  ;;  %5007 = vmatprep.mubr.msk.bf16.mxu0 %vm5717_vm2, %v5715_v0  ;;  %v5819_v30 = vsel %vm197_vm1, %v539_v26, %v540_v23  ;;  %v135_v47 = vsel %vm126_vm0, %v132_v33, %v134_v44  ;;  %v136_v49 = vrot.slane %v5576_v28, 1  ;;  %v554_v50 = vrot.slane %v5857_v48, 2 }
   0xb   :  { %5267 = vmatprep.subr.bf16.mxu0 %v5715_v0  ;;  %v5851_v46 = vsel %vm197_vm1, %v550_v38, %v552_v45  ;;  %v138_v53 = vrot.slane %v5577_v29, 1  ;;  %v140_v55 = vrot.slane %v5578_v43, 1  ;;  %v142_v57 = vrot.slane %v5857_v48, 1  ;;  %5164 = vmatpush3.bf16.msra.mxu1 %v5586_v11 }
   0xc   :  { %v5869_v51 = vsel %vm197_vm1, %v552_v45, %v554_v50  ;;  %v137_v52 = vsel %vm126_vm0, %v134_v44, %v136_v49  ;;  %v144_v60 = vrot.slane %v5897_v59, 1  ;;  %v146_v63 = vrot.slane %v5910_v62, 1  ;;  %5165 = vmatprep.subr.bf16.mxu1 %v5715_v0 }
   0xd   :  { %v139_v54 = vsel %vm126_vm0, %v136_v49, %v138_v53  ;;  %v141_v56 = vsel %vm126_vm0, %v138_v53, %v140_v55  ;;  %v143_v58 = vsel %vm126_vm0, %v140_v55, %v142_v57  ;;  %v148_v3 = vrot.slane %v5924_v2, 1 }
   0xe   :  { %v145_v61 = vsel %vm126_vm0, %v142_v57, %v144_v60  ;;  %v147_v1 = vsel %vm126_vm0, %v144_v60, %v146_v63  ;;  %v4334_v7 = vcombine.low %v53_v4, %v57_v5  ;;  %v4350_v10 = vcombine.low %v53_v4, %v53_v4  ;;  %v5596_v57 = vld [vmem:[%s6789_s3 + $0xd0] sm:$0xff]  }
   0xf   :  { %v556_v12 = vrot.slane %v5897_v59, 2  ;;  %5166 = vmatpush3.bf16.msra.mxu1 %v5587_v13  ;;  %v558_v15 = vrot.slane %v5910_v62, 2  ;;  %v560_v17 = vrot.slane %v5924_v2, 2  ;;  %vm1054_vm4 = vcmask 257024  }
  0x10   :  { %5062 = vmatmul.mubr.msk.bf16.gmra.mxu1 %vm157_vm3, %v5570_v6  ;;  %v149_v6 = vsel %vm126_vm0, %v146_v63, %v148_v3  ;;  %v150_v8 = vrot.slane %v4334_v7, 1  ;;  %5171 = vmatprep.subr.bf16.mxu1 %v5715_v0  ;;  %vm1108_vm5 = vcmask 261120   ;;  %vm1079_vm6 = vcmask 256000  }
  0x11   :  { %5008 = vmatmul.mubr.msk.bf16.gmra.mxu0 %vm157_vm3, %v131_v24  ;;  %5065 = vmatprep.mubr.msk.bf16.mxu1 %vm5717_vm2, %v5715_v0  ;;  %v557_v14 = vsel %vm197_vm1, %v554_v50, %v556_v12  ;;  %v559_v16 = vsel %vm197_vm1, %v556_v12, %v558_v15  ;;  %v561_v19 = vsel %vm197_vm1, %v558_v15, %v560_v17  ;;  %vm4296_vm7 = vcmask 517120  }
  0x12   :  { %5011 = vmatprep.mubr.msk.bf16.mxu0 %vm5717_vm2, %v5715_v0  ;;  %v151_v9 = vsel %vm126_vm0, %v148_v3, %v150_v8  ;;  %vm4314_vm8 = vcmask 1024  }
  0x18   :  { %5066 = vmatmul.mubr.msk.bf16.gmra.mxu1 %vm157_vm3, %v5573_v18  ;;  %v528_v18 = vld [vmem:[%s6788_s0 + $0x64] sm:$0x3] }
  0x19   :  { %5012 = vmatmul.mubr.msk.bf16.gmra.mxu0 %vm157_vm3, %v133_v42  ;;  %5069 = vmatprep.mubr.msk.bf16.mxu1 %vm5717_vm2, %v5715_v0  ;;  %v4368_v20 = vcombine.low %v53_v4, %v528_v18 }
  0x1a   :  { %5015 = vmatprep.mubr.msk.bf16.mxu0 %vm5717_vm2, %v5715_v0 }
  0x1b   :  { %v562_v21 = vrot.slane %v4368_v20, 2 }
  0x1d   :  { %v563_v22 = vsel %vm197_vm1, %v560_v17, %v562_v21 }
  0x20   :  { %5070 = vmatmul.mubr.msk.bf16.gmra.mxu1 %vm157_vm3, %v5574_v25 }
  0x21   :  { %5016 = vmatmul.mubr.msk.bf16.gmra.mxu0 %vm157_vm3, %v135_v47  ;;  %5073 = vmatprep.mubr.msk.bf16.mxu1 %vm5717_vm2, %v5715_v0 }
  0x22   :  { %5019 = vmatprep.mubr.msk.bf16.mxu0 %vm5717_vm2, %v5715_v0 }
  0x28   :  { %5074 = vmatmul.mubr.msk.bf16.gmra.mxu1 %vm157_vm3, %v5575_v27 }
  0x29   :  { %5020 = vmatmul.mubr.msk.bf16.gmra.mxu0 %vm157_vm3, %v137_v52  ;;  %5077 = vmatprep.mubr.msk.bf16.mxu1 %vm5717_vm2, %v5715_v0 }
  0x2a   :  { %5023 = vmatprep.mubr.msk.bf16.mxu0 %vm5717_vm2, %v5715_v0 }
  0x30   :  { %5078 = vmatmul.mubr.msk.bf16.gmra.mxu1 %vm157_vm3, %v5576_v28 }
  0x31   :  { %5024 = vmatmul.mubr.msk.bf16.gmra.mxu0 %vm157_vm3, %v139_v54  ;;  %5081 = vmatprep.mubr.msk.bf16.mxu1 %vm5717_vm2, %v5715_v0 }
  0x32   :  { %5027 = vmatprep.mubr.msk.bf16.mxu0 %vm5717_vm2, %v5715_v0 }
  0x38   :  { %5082 = vmatmul.mubr.msk.bf16.gmra.mxu1 %vm157_vm3, %v5577_v29 }
  0x39   :  { %5028 = vmatmul.mubr.msk.bf16.gmra.mxu0 %vm157_vm3, %v141_v56  ;;  %5085 = vmatprep.mubr.msk.bf16.mxu1 %vm5717_vm2, %v5715_v0 }
  0x3a   :  { %5031 = vmatprep.mubr.msk.bf16.mxu0 %vm5717_vm2, %v5715_v0 }
  0x40   :  { %5086 = vmatmul.mubr.msk.bf16.gmra.mxu1 %vm157_vm3, %v5578_v43  ;;  %v5588_v43 = vld [vmem:[%s6789_s3 + $0xd8] sm:$0xff]  }
  0x41   :  { %5032 = vmatmul.mubr.msk.bf16.gmra.mxu0 %vm157_vm3, %v143_v58  ;;  %5089 = vmatprep.mubr.msk.bf16.mxu1 %vm5717_vm2, %v5715_v0 }
  0x42   :  { %5035 = vmatprep.mubr.msk.bf16.mxu0 %vm5717_vm2, %v5715_v0 }
  0x48   :  { %5090 = vmatmul.mubr.msk.bf16.gmra.mxu1 %vm157_vm3, %v5857_v48 }
  0x49   :  { %5036 = vmatmul.mubr.msk.bf16.gmra.mxu0 %vm157_vm3, %v145_v61  ;;  %5093 = vmatprep.mubr.msk.bf16.mxu1 %vm5717_vm2, %v5715_v0 }
  0x4a   :  { %5039 = vmatprep.mubr.msk.bf16.mxu0 %vm5717_vm2, %v5715_v0 }
  0x50   :  { %5094 = vmatmul.mubr.msk.bf16.gmra.mxu1 %vm157_vm3, %v5897_v59 }
  0x51   :  { %5040 = vmatmul.mubr.msk.bf16.gmra.mxu0 %vm157_vm3, %v147_v1  ;;  %5097 = vmatprep.mubr.msk.bf16.mxu1 %vm5717_vm2, %v5715_v0 }
  0x52   :  { %5043 = vmatprep.mubr.msk.bf16.mxu0 %vm5717_vm2, %v5715_v0 }
  0x58   :  { %5098 = vmatmul.mubr.msk.bf16.gmra.mxu1 %vm157_vm3, %v5910_v62 }
  0x59   :  { %5044 = vmatmul.mubr.msk.bf16.gmra.mxu0 %vm157_vm3, %v149_v6  ;;  %5101 = vmatprep.mubr.msk.bf16.mxu1 %vm5717_vm2, %v5715_v0 }
  0x5a   :  { %5047 = vmatprep.mubr.msk.bf16.mxu0 %vm5717_vm2, %v5715_v0 }
  0x60   :  { %5102 = vmatmul.mubr.msk.bf16.gmra.mxu1 %vm157_vm3, %v5924_v2 }
  0x61   :  { %5048 = vmatmul.mubr.msk.bf16.gmra.mxu0 %vm157_vm3, %v151_v9  ;;  %5105 = vmatprep.mubr.msk.bf16.mxu1 %vm5717_vm2, %v5715_v0 }
  0x62   :  { %5051 = vmatprep.mubr.msk.bf16.mxu0 %vm5717_vm2, %v5715_v0 }
  0x68   :  { %5106 = vmatmul.mubr.msk.bf16.gmra.mxu1 %vm157_vm3, %v4350_v10 }
  0x69   :  { %5052 = vmatmul.mubr.msk.bf16.gmra.mxu0 %vm157_vm3, %v150_v8  ;;  %5167 = vmatprep.mubr.msk.bf16.mxu1 %vm5717_vm2, %v5715_v0 }
  0x6a   :  { %5111 = vmatprep.mubr.msk.bf16.mxu0 %vm5717_vm2, %v5715_v0 }
  0x71   :  { %5112 = vmatmul.mubr.msk.bf16.vlgmr.msra.gmra.mxu0 %vm157_vm3, %v5819_v30 }
  0x72   :  { %5115 = vmatprep.mubr.msk.bf16.mxu0 %vm5717_vm2, %v5715_v0  ;;  %5268 = vmatpush3.bf16.msra.mxu0 %v5588_v43 }
  0x73   :  { %5269 = vmatprep.subr.bf16.mxu0 %v5715_v0 }
  0x76   :  { %5270 = vmatpush3.bf16.msra.mxu0 %v5596_v57 }
  0x77   :  { %5283 = vmatprep.subr.bf16.mxu0 %v5715_v0 }
  0x79   :  { %5116 = vmatmul.mubr.msk.bf16.gmra.mxu0 %vm157_vm3, %v5826_v36 }
  0x7a   :  { %5119 = vmatprep.mubr.msk.bf16.mxu0 %vm5717_vm2, %v5715_v0 }
  0x81   :  { %5120 = vmatmul.mubr.msk.bf16.gmra.mxu0 %vm157_vm3, %v5829_v37 }
  0x82   :  { %5123 = vmatprep.mubr.msk.bf16.mxu0 %vm5717_vm2, %v5715_v0 }
  0x89   :  { %5124 = vmatmul.mubr.msk.bf16.gmra.mxu0 %vm157_vm3, %v5832_v39 }
  0x8a   :  { %5127 = vmatprep.mubr.msk.bf16.mxu0 %vm5717_vm2, %v5715_v0 }
  0x91   :  { %5128 = vmatmul.mubr.msk.bf16.gmra.mxu0 %vm157_vm3, %v5835_v40 }
  0x92   :  { %5131 = vmatprep.mubr.msk.bf16.mxu0 %vm5717_vm2, %v5715_v0 }
  0x99   :  { %5132 = vmatmul.mubr.msk.bf16.gmra.mxu0 %vm157_vm3, %v5838_v41 }
  0x9a   :  { %5135 = vmatprep.mubr.msk.bf16.mxu0 %vm5717_vm2, %v5715_v0 }
  0xa1   :  { %5136 = vmatmul.mubr.msk.bf16.gmra.mxu0 %vm157_vm3, %v5851_v46 }
  0xa2   :  { %5139 = vmatprep.mubr.msk.bf16.mxu0 %vm5717_vm2, %v5715_v0 }
  0xa9   :  { %5140 = vmatmul.mubr.msk.bf16.gmra.mxu0 %vm157_vm3, %v5869_v51 }
  0xaa   :  { %5143 = vmatprep.mubr.msk.bf16.mxu0 %vm5717_vm2, %v5715_v0 }
  0xb1   :  { %5144 = vmatmul.mubr.msk.bf16.gmra.mxu0 %vm157_vm3, %v557_v14 }
  0xb2   :  { %5147 = vmatprep.mubr.msk.bf16.mxu0 %vm5717_vm2, %v5715_v0 }
  0xb9   :  { %5148 = vmatmul.mubr.msk.bf16.gmra.mxu0 %vm157_vm3, %v559_v16 }
  0xba   :  { %5151 = vmatprep.mubr.msk.bf16.mxu0 %vm5717_vm2, %v5715_v0 }
  0xc1   :  { %5152 = vmatmul.mubr.msk.bf16.gmra.mxu0 %vm157_vm3, %v561_v19 }
  0xc2   :  { %5155 = vmatprep.mubr.msk.bf16.mxu0 %vm5717_vm2, %v5715_v0 }
  0xc8   :  { %v425_v24 = vpop.f32.mrf.mxu1 }
  0xc9   :  { %v238_v23 = vpop.f32.mrf.mxu0  ;;  %5156 = vmatmul.mubr.msk.bf16.gmra.mxu0 %vm157_vm3, %v563_v22 }
  0xca   :  { %v6024_v25 = vadd.f32 %v425_v24, %v238_v23  ;;  %5159 = vmatprep.mubr.msk.bf16.mxu0 %vm5717_vm2, %v5715_v0  ;;  %v5059_v27 = vpop.f32.mrf.mxu1 }
  0xcb   :  { %v5005_v26 = vpop.f32.mrf.mxu0 }
  0xcc   :  { %v428_v29 = vpop.f32.mrf.mxu1 }
  0xcd   :  { %v241_v28 = vpop.f32.mrf.mxu0 }
  0xce   :  { %v6028_v30 = vadd.f32 %v428_v29, %v241_v28  ;;  %v5060_v32 = vpop.f32.mrf.mxu1 }
  0xcf   :  { %v5006_v31 = vpop.f32.mrf.mxu0 }
  0xd0   :  { %v433_v34 = vpop.f32.mrf.mxu1 }
  0xd1   :  { %v246_v33 = vpop.f32.mrf.mxu0  ;;  %5160 = vmatmul.mubr.msk.bf16.gmra.mxu0 %vm157_vm3, %v562_v21 }
  0xd2   :  { %v6031_v35 = vadd.f32 %v433_v34, %v246_v33  ;;  %5271 = vmatprep.mubr.msk.bf16.mxu0 %vm5717_vm2, %v5715_v0  ;;  %v5063_v37 = vpop.f32.mrf.mxu1 }
  0xd3   :  { %v5009_v36 = vpop.f32.mrf.mxu0 }
  0xd4   :  { %v436_v39 = vpop.f32.mrf.mxu1 }
  0xd5   :  { %v249_v38 = vpop.f32.mrf.mxu0 }
  0xd6   :  { %v6035_v40 = vadd.f32 %v436_v39, %v249_v38  ;;  %v5064_v42 = vpop.f32.mrf.mxu1 }
  0xd7   :  { %v5010_v41 = vpop.f32.mrf.mxu0 }
  0xd8   :  { %v441_v45 = vpop.f32.mrf.mxu1 }
  0xd9   :  { %v254_v44 = vpop.f32.mrf.mxu0 }
  0xda   :  { %v6040_v46 = vadd.f32 %v441_v45, %v254_v44  ;;  %v5067_v48 = vpop.f32.mrf.mxu1 }
  0xdb   :  { %v5013_v47 = vpop.f32.mrf.mxu0 }
  0xdc   :  { %v444_v50 = vpop.f32.mrf.mxu1 }
  0xdd   :  { %v257_v49 = vpop.f32.mrf.mxu0 }
  0xde   :  { %v6043_v51 = vadd.f32 %v444_v50, %v257_v49  ;;  %v5068_v53 = vpop.f32.mrf.mxu1 }
  0xdf   :  { %v5014_v52 = vpop.f32.mrf.mxu0 }
  0xe0   :  { %v449_v55 = vpop.f32.mrf.mxu1 }
  0xe1   :  { %v262_v54 = vpop.f32.mrf.mxu0 }
  0xe2   :  { %v6045_v56 = vadd.f32 %v449_v55, %v262_v54  ;;  %v5071_v59 = vpop.f32.mrf.mxu1 }
  0xe3   :  { %v5017_v58 = vpop.f32.mrf.mxu0 }
  0xe4   :  { %v452_v61 = vpop.f32.mrf.mxu1 }
  0xe5   :  { %v265_v60 = vpop.f32.mrf.mxu0 }
  0xe6   :  { %v6051_v62 = vadd.f32 %v452_v61, %v265_v60  ;;  %v5072_v1 = vpop.f32.mrf.mxu1 }
  0xe7   :  { %v5018_v63 = vpop.f32.mrf.mxu0 }
  0xe8   :  { %v457_v3 = vpop.f32.mrf.mxu1 }
  0xe9   :  { %v270_v2 = vpop.f32.mrf.mxu0 }
  0xea   :  { %v6053_v4 = vadd.f32 %v457_v3, %v270_v2  ;;  %v5075_v6 = vpop.f32.mrf.mxu1 }
  0xeb   :  { %v5021_v5 = vpop.f32.mrf.mxu0 }
  0xec   :  { %v460_v8 = vpop.f32.mrf.mxu1 }
  0xed   :  { %v273_v7 = vpop.f32.mrf.mxu0 }
  0xee   :  { %v6055_v9 = vadd.f32 %v460_v8, %v273_v7  ;;  %v5076_v11 = vpop.f32.mrf.mxu1 }
  0xef   :  { %v5022_v10 = vpop.f32.mrf.mxu0 }
  0xf0   :  { %v465_v13 = vpop.f32.mrf.mxu1 }
  0xf1   :  { %v278_v12 = vpop.f32.mrf.mxu0 }
  0xf2   :  { %v6057_v14 = vadd.f32 %v465_v13, %v278_v12  ;;  %v5079_v16 = vpop.f32.mrf.mxu1 }
  0xf3   :  { %v5025_v15 = vpop.f32.mrf.mxu0 }
  0xf4   :  { %v468_v18 = vpop.f32.mrf.mxu1 }
  0xf5   :  { %v281_v17 = vpop.f32.mrf.mxu0 }
  0xf6   :  { %v6059_v19 = vadd.f32 %v468_v18, %v281_v17  ;;  %v5080_v21 = vpop.f32.mrf.mxu1 }
  0xf7   :  { %v5026_v20 = vpop.f32.mrf.mxu0 }
  0xf8   :  { %v473_v23 = vpop.f32.mrf.mxu1 }
  0xf9   :  { %v286_v22 = vpop.f32.mrf.mxu0 }
  0xfa   :  { %v6061_v24 = vadd.f32 %v473_v23, %v286_v22  ;;  %v5083_v27 = vpop.f32.mrf.mxu1 }
  0xfb   :  { %v5029_v26 = vpop.f32.mrf.mxu0 }
  0xfc   :  { %v476_v29 = vpop.f32.mrf.mxu1 }
  0xfd   :  { %v289_v28 = vpop.f32.mrf.mxu0 }
  0xfe   :  { %v6063_v31 = vadd.f32 %v476_v29, %v289_v28  ;;  %v5084_v33 = vpop.f32.mrf.mxu1 }
  0xff   :  { %v5030_v32 = vpop.f32.mrf.mxu0 }
 0x100   :  { %v481_v36 = vpop.f32.mrf.mxu1 }
 0x101   :  { %v294_v34 = vpop.f32.mrf.mxu0 }
 0x102   :  { %v6065_v37 = vadd.f32 %v481_v36, %v294_v34  ;;  %v5087_v39 = vpop.f32.mrf.mxu1 }
 0x103   :  { %v5033_v38 = vpop.f32.mrf.mxu0 }
 0x104   :  { %v484_v42 = vpop.f32.mrf.mxu1 }
 0x105   :  { %v297_v41 = vpop.f32.mrf.mxu0 }
 0x106   :  { %v6067_v43 = vadd.f32 %v484_v42, %v297_v41  ;;  %v5088_v45 = vpop.f32.mrf.mxu1 }
 0x107   :  { %v5034_v44 = vpop.f32.mrf.mxu0 }
 0x108   :  { %v489_v48 = vpop.f32.mrf.mxu1 }
 0x109   :  { %v302_v47 = vpop.f32.mrf.mxu0 }
 0x10a   :  { %v6069_v49 = vadd.f32 %v489_v48, %v302_v47  ;;  %v5091_v52 = vpop.f32.mrf.mxu1 }
 0x10b   :  { %v5037_v50 = vpop.f32.mrf.mxu0  ;;  %v6090_v52 = vld [vmem:[%s6790_s2] ss:$0 sm:$0xff] }
 0x10c   :  { %v492_v54 = vpop.f32.mrf.mxu1 }
 0x10d   :  { %v305_v53 = vpop.f32.mrf.mxu0 }
 0x10e   :  { %v6071_v55 = vadd.f32 %v492_v54, %v305_v53  ;;  %v5092_v58 = vpop.f32.mrf.mxu1 }
 0x10f   :  { %v5038_v57 = vpop.f32.mrf.mxu0 }
 0x110   :  { %v497_v60 = vpop.f32.mrf.mxu1 }
 0x111   :  { %v310_v59 = vpop.f32.mrf.mxu0 }
 0x112   :  { %v6073_v61 = vadd.f32 %v497_v60, %v310_v59  ;;  %v5095_v1 = vpop.f32.mrf.mxu1 }
 0x113   :  { %v5041_v63 = vpop.f32.mrf.mxu0 }
 0x114   :  { %v500_v3 = vpop.f32.mrf.mxu1 }
 0x115   :  { %v313_v2 = vpop.f32.mrf.mxu0 }
 0x116   :  { %v6075_v5 = vadd.f32 %v500_v3, %v313_v2  ;;  %v5096_v7 = vpop.f32.mrf.mxu1 }
 0x117   :  { %v5042_v6 = vpop.f32.mrf.mxu0 }
 0x118   :  { %v505_v10 = vpop.f32.mrf.mxu1 }
 0x119   :  { %v318_v8 = vpop.f32.mrf.mxu0 }
 0x11a   :  { %v6077_v11 = vadd.f32 %v505_v10, %v318_v8  ;;  %v5099_v13 = vpop.f32.mrf.mxu1 }
 0x11b   :  { %v5045_v12 = vpop.f32.mrf.mxu0 }
 0x11c   :  { %v508_v16 = vpop.f32.mrf.mxu1 }
 0x11d   :  { %v321_v15 = vpop.f32.mrf.mxu0 }
 0x11e   :  { %v6079_v17 = vadd.f32 %v508_v16, %v321_v15  ;;  %v5100_v20 = vpop.f32.mrf.mxu1 }
 0x11f   :  { %v5046_v18 = vpop.f32.mrf.mxu0 }
 0x120   :  { %v513_v22 = vpop.f32.mrf.mxu1 }
 0x121   :  { %v326_v21 = vpop.f32.mrf.mxu0 }
 0x122   :  { %v6081_v23 = vadd.f32 %v513_v22, %v326_v21  ;;  %v5103_v27 = vpop.f32.mrf.mxu1 }
 0x123   :  { %v5049_v26 = vpop.f32.mrf.mxu0 }
 0x124   :  { %v516_v29 = vpop.f32.mrf.mxu1 }
 0x125   :  { %v329_v28 = vpop.f32.mrf.mxu0 }
 0x126   :  { %v6083_v32 = vadd.f32 %v516_v29, %v329_v28  ;;  %v5104_v34 = vpop.f32.mrf.mxu1 }
 0x127   :  { %v5050_v33 = vpop.f32.mrf.mxu0 }
 0x128   :  { %v521_v38 = vpop.f32.mrf.mxu1 }
 0x129   :  { %v334_v36 = vpop.f32.mrf.mxu0 }
 0x12a   :  { %v6085_v39 = vadd.f32 %v521_v38, %v334_v36  ;;  %v5107_v42 = vpop.f32.mrf.mxu1 }
 0x12b   :  { %v5053_v41 = vpop.f32.mrf.mxu0 }
 0x12c   :  { %v524_v45 = vpop.f32.mrf.mxu1 }
 0x12d   :  { %v337_v44 = vpop.f32.mrf.mxu0 }
 0x12e   :  { %v5108_v48 = vpop.f32.mrf.mxu1 }
 0x12f   :  { %v5054_v47 = vpop.f32.mrf.mxu0 }
 0x131   :  { %v645_v50 = vpop.f32.mrf.mxu0 }
 0x132   :  { %v747_v53 = vadd.f32 %v645_v50, %v6024_v25 }
 0x133   :  { %v5113_v54 = vpop.f32.mrf.mxu0 }
 0x134   :  { %v779_v57 = vadd.f32 %v6090_v52, %v747_v53 }
 0x135   :  { %v648_v58 = vpop.f32.mrf.mxu0 }
 0x136   :  { %v748_v59 = vadd.f32 %v648_v58, %v6028_v30  ;;  %v804_v63 = vmax.f32 %v779_v57, 0.0 }
 0x137   :  { %v5114_v60 = vpop.f32.mrf.mxu0 }
 0x138   :  { %v780_v1 = vadd.f32 %v6090_v52, %v748_v59  ;;  %v854_v8 = vrot.slane %v804_v63, 2 }
 0x139   :  { %v653_v2 = vpop.f32.mrf.mxu0 }
 0x13a   :  { %v805_v3 = vmax.f32 %v780_v1, 0.0  ;;  %v749_v6 = vadd.f32 %v653_v2, %v6031_v35 }
 0x13b   :  { %v5117_v7 = vpop.f32.mrf.mxu0 }
 0x13c   :  { %v855_v10 = vrot.slane %v805_v3, 2  ;;  %v781_v12 = vadd.f32 %v6090_v52, %v749_v6 }
 0x13d   :  { %v656_v25 = vpop.f32.mrf.mxu0 }
 0x13e   :  { %v856_v13 = vsel %vm197_vm1, %v854_v8, %v855_v10  ;;  %v806_v15 = vmax.f32 %v781_v12, 0.0  ;;  %v750_v16 = vadd.f32 %v656_v25, %v6035_v40 }
 0x13f   :  { %v928_v30 = vmax.f32 %v804_v63, %v856_v13  ;;  %v5118_v18 = vpop.f32.mrf.mxu0  ;;  %v5591_v13 = vld [vmem:[%s6789_s3] sm:$0xff]  }
 0x140   :  { %v857_v20 = vrot.slane %v806_v15, 2  ;;  %v782_v21 = vadd.f32 %v6090_v52, %v750_v16 }
 0x141   :  { %v4784_v22 = vpack.c.bf16 %v928_v30, %v928_v30  ;;  %v661_v26 = vpop.f32.mrf.mxu0 }
 0x142   :  { %v858_v35 = vsel %vm197_vm1, %v855_v10, %v857_v20  ;;  %v807_v27 = vmax.f32 %v782_v21, 0.0  ;;  %v751_v28 = vadd.f32 %v661_v26, %v6040_v46 }
 0x143   :  { %1055 = vst.msk [vmem:[#allocation2] sm:$0xf] %vm1054_vm4, %v4784_v22  ;;  %v929_v29 = vmax.f32 %v805_v3, %v858_v35  ;;  %v5121_v33 = vpop.f32.mrf.mxu0  ;;  %v5592_v35 = vld [vmem:[%s6789_s3 + $0x28] sm:$0xff]  }
 0x144   :  { %v859_v34 = vrot.slane %v807_v27, 2  ;;  %v783_v40 = vadd.f32 %v6090_v52, %v751_v28 }
 0x145   :  { %v4785_v36 = vpack.c.bf16 %v929_v29, %v929_v29  ;;  %v664_v38 = vpop.f32.mrf.mxu0 }
 0x146   :  { %v860_v41 = vsel %vm197_vm1, %v857_v20, %v859_v34  ;;  %v808_v42 = vmax.f32 %v783_v40, 0.0  ;;  %v752_v44 = vadd.f32 %v664_v38, %v6043_v51  ;;  %v5590_v51 = vld [vmem:[%s6789_s3 + $0x8] sm:$0xff]  }
 0x147   :  { %1056 = vst.msk [vmem:[#allocation2 + $0x4] sm:$0xf] %vm1054_vm4, %v4785_v36  ;;  %v930_v45 = vmax.f32 %v806_v15, %v860_v41  ;;  %v5122_v47 = vpop.f32.mrf.mxu0 }
 0x148   :  { %v861_v48 = vrot.slane %v808_v42, 2  ;;  %v784_v46 = vadd.f32 %v6090_v52, %v752_v44 }
 0x149   :  { %v4786_v50 = vpack.c.bf16 %v930_v45, %v930_v45  ;;  %v669_v53 = vpop.f32.mrf.mxu0 }
 0x14a   :  { %v862_v54 = vsel %vm197_vm1, %v859_v34, %v861_v48  ;;  %v809_v57 = vmax.f32 %v784_v46, 0.0  ;;  %v753_v58 = vadd.f32 %v669_v53, %v6045_v56  ;;  %v5589_v59 = vld [vmem:[#allocation2] ss:$0 sps:$4 sm:$0x44]  }
 0x14b   :  { %1057 = vst.msk [vmem:[#allocation2 + $0x8] sm:$0xf] %vm1054_vm4, %v4786_v50  ;;  %v931_v60 = vmax.f32 %v807_v27, %v862_v54  ;;  %v5125_v63 = vpop.f32.mrf.mxu0  ;;  %v1095_v3 = vrot.slane %v5589_v59, 2  ;;  %v1081_v34 = vld [vmem:[#allocation2] sm:$0x1] }
 0x14c   :  { %v863_v1 = vrot.slane %v809_v57, 2  ;;  %v785_v2 = vadd.f32 %v6090_v52, %v753_v58 }
 0x14d   :  { %v4787_v6 = vpack.c.bf16 %v931_v60, %v931_v60  ;;  %v672_v7 = vpop.f32.mrf.mxu0  ;;  %5168 = vmatmul.mubr.msk.bf16.vlgmr.msra.gmra.mxu1 %vm1108_vm5, %v1095_v3 }
 0x14e   :  { %v864_v8 = vsel %vm197_vm1, %v861_v48, %v863_v1  ;;  %v810_v10 = vmax.f32 %v785_v2, 0.0  ;;  %v754_v56 = vadd.f32 %v672_v7, %v6051_v62  ;;  %5172 = vmatpush3.bf16.msra.mxu1 %v5590_v51  ;;  %5175 = vmatprep.mubr.msk.bf16.mxu1 %vm5717_vm2, %v5715_v0  ;;  %v1207_v51 = vld [vmem:[#allocation2 + $0x4] sm:$0x1]  ;;  %v5595_v7 = vld [vmem:[%s6789_s3 + $0x30] sm:$0xff]  }
 0x14f   :  { %1058 = vst.msk [vmem:[#allocation2 + $0xc] sm:$0xf] %vm1054_vm4, %v4787_v6  ;;  %v932_v12 = vmax.f32 %v808_v42, %v864_v8  ;;  %v5126_v25 = vpop.f32.mrf.mxu0  ;;  %5173 = vmatprep.subr.bf16.mxu1 %v5715_v0  ;;  %v5593_v42 = vld [vmem:[%s6789_s3 + $0x20] sm:$0xff]  }
 0x150   :  { %v865_v15 = vrot.slane %v810_v10, 2  ;;  %v786_v16 = vadd.f32 %v6090_v52, %v754_v56 }
 0x151   :  { %v4788_v62 = vpack.c.bf16 %v932_v12, %v932_v12  ;;  %v677_v30 = vpop.f32.mrf.mxu0 }
 0x152   :  { %v866_v18 = vsel %vm197_vm1, %v863_v1, %v865_v15  ;;  %v811_v20 = vmax.f32 %v786_v16, 0.0  ;;  %v755_v21 = vadd.f32 %v677_v30, %v6053_v4  ;;  %5174 = vmatpush3.bf16.msra.mxu1 %v5591_v13 }
 0x153   :  { %1059 = vst.msk [vmem:[#allocation2 + $0x10] sm:$0xf] %vm1054_vm4, %v4788_v62  ;;  %v933_v22 = vmax.f32 %v809_v57, %v866_v18  ;;  %v5129_v26 = vpop.f32.mrf.mxu0  ;;  %5179 = vmatprep.subr.bf16.mxu1 %v5715_v0  ;;  %v5594_v57 = vld [vmem:[%s6789_s3 + $0x38] sm:$0xff]   ;;  %v5599_v18 = vld [vmem:[%s6789_s3 + $0x48] sm:$0xff]  }
 0x154   :  { %v867_v27 = vrot.slane %v811_v20, 2  ;;  %v787_v28 = vadd.f32 %v6090_v52, %v755_v21 }
 0x155   :  { %v4789_v29 = vpack.c.bf16 %v933_v22, %v933_v22  ;;  %v680_v33 = vpop.f32.mrf.mxu0  ;;  %5176 = vmatmul.mubr.msk.bf16.vlgmr.msra.gmra.mxu1 %vm1108_vm5, %v1081_v34 }
 0x156   :  { %v868_v40 = vsel %vm197_vm1, %v865_v15, %v867_v27  ;;  %v812_v4 = vmax.f32 %v787_v28, 0.0  ;;  %v756_v36 = vadd.f32 %v680_v33, %v6055_v9  ;;  %5180 = vmatpush3.bf16.msra.mxu1 %v5592_v35  ;;  %5183 = vmatprep.mubr.msk.bf16.mxu1 %vm5717_vm2, %v5715_v0 }
 0x157   :  { %1060 = vst.msk [vmem:[#allocation2 + $0x14] sm:$0xf] %vm1054_vm4, %v4789_v29  ;;  %v934_v38 = vmax.f32 %v810_v10, %v868_v40  ;;  %v5130_v41 = vpop.f32.mrf.mxu0  ;;  %5181 = vmatprep.subr.bf16.mxu1 %v5715_v0 }
 0x158   :  { %v869_v44 = vrot.slane %v812_v4, 2  ;;  %v788_v45 = vadd.f32 %v6090_v52, %v756_v36  ;;  %v5602_v36 = vld [vmem:[%s6789_s3 + $0xf0] sm:$0xff]  }
 0x159   :  { %v4790_v9 = vpack.c.bf16 %v934_v38, %v934_v38  ;;  %v685_v47 = vpop.f32.mrf.mxu0 }
 0x15a   :  { %v870_v48 = vsel %vm197_vm1, %v867_v27, %v869_v44  ;;  %v813_v46 = vmax.f32 %v788_v45, 0.0  ;;  %v757_v50 = vadd.f32 %v685_v47, %v6057_v14  ;;  %5182 = vmatpush3.bf16.msra.mxu1 %v5593_v42 }
 0x15b   :  { %1061 = vst.msk [vmem:[#allocation2 + $0x18] sm:$0xf] %vm1054_vm4, %v4790_v9  ;;  %v935_v53 = vmax.f32 %v811_v20, %v870_v48  ;;  %v5133_v54 = vpop.f32.mrf.mxu0  ;;  %5187 = vmatprep.subr.bf16.mxu1 %v5715_v0  ;;  %v5600_v20 = vld [vmem:[%s6789_s3 + $0xf8] sm:$0xff]  }
 0x15c   :  { %v871_v58 = vrot.slane %v813_v46, 2  ;;  %v789_v59 = vadd.f32 %v6090_v52, %v757_v50  ;;  %v5604_v50 = vld [vmem:[%s6789_s3 + $0x58] sm:$0xff]  }
 0x15d   :  { %v4791_v60 = vpack.c.bf16 %v935_v53, %v935_v53  ;;  %v688_v63 = vpop.f32.mrf.mxu0  ;;  %5184 = vmatmul.mubr.msk.bf16.vlgmr.msra.gmra.mxu1 %vm1108_vm5, %v1207_v51  ;;  %v5605_v53 = vld [vmem:[%s6789_s3 + $0x118] sm:$0xff]  }
 0x15e   :  { %v872_v1 = vsel %vm197_vm1, %v869_v44, %v871_v58  ;;  %v814_v14 = vmax.f32 %v789_v59, 0.0  ;;  %v758_v2 = vadd.f32 %v688_v63, %v6059_v19  ;;  %5188 = vmatpush3.bf16.msra.mxu1 %v5594_v57  ;;  %5191 = vmatprep.mubr.msk.bf16.mxu1 %vm5717_vm2, %v5715_v0  ;;  %v5597_v19 = vld [vmem:[#allocation2 + $0x4] ss:$0 sps:$4 sm:$0x44]  }
 0x15f   :  { %1062 = vst.msk [vmem:[#allocation2 + $0x1c] sm:$0xf] %vm1054_vm4, %v4791_v60  ;;  %v936_v3 = vmax.f32 %v812_v4, %v872_v1  ;;  %v5134_v6 = vpop.f32.mrf.mxu0  ;;  %5189 = vmatprep.subr.bf16.mxu1 %v5715_v0  ;;  %v1278_v26 = vrot.slane %v5597_v19, 2  ;;  %v5601_v4 = vld [vmem:[%s6789_s3 + $0x40] sm:$0xff]   ;;  %v1335_v60 = vld [vmem:[#allocation2 + $0x8] sm:$0x1] }
 0x160   :  { %v873_v8 = vrot.slane %v814_v14, 2  ;;  %v790_v10 = vadd.f32 %v6090_v52, %v758_v2  ;;  %v5607_v6 = vld [vmem:[%s6789_s3 + $0x110] sm:$0xff]  }
 0x161   :  { %v4792_v56 = vpack.c.bf16 %v936_v3, %v936_v3  ;;  %v693_v12 = vpop.f32.mrf.mxu0  ;;  %v5606_v3 = vld [vmem:[%s6789_s3 + $0x50] sm:$0xff]  }
 0x162   :  { %v874_v25 = vsel %vm197_vm1, %v871_v58, %v873_v8  ;;  %v815_v13 = vmax.f32 %v790_v10, 0.0  ;;  %v759_v15 = vadd.f32 %v693_v12, %v6061_v24  ;;  %v5598_v16 = vld [vmem:[#allocation2 + $0x18] ss:$0 sps:$4 sm:$0x44]   ;;  %5190 = vmatpush3.bf16.msra.mxu1 %v5595_v7 }
 0x163   :  { %1063 = vst.msk [vmem:[#allocation2 + $0x20] sm:$0xf] %vm1054_vm4, %v4792_v56  ;;  %v937_v62 = vmax.f32 %v813_v46, %v874_v25  ;;  %v5137_v30 = vpop.f32.mrf.mxu0  ;;  %5195 = vmatprep.subr.bf16.mxu1 %v5715_v0  ;;  %v1918_v24 = vrot.slane %v5598_v16, 2  ;;  %v5608_v7 = vld [vmem:[#allocation2 + $0x8] ss:$0 sps:$4 sm:$0x44]  }
 0x164   :  { %v875_v21 = vrot.slane %v815_v13, 2  ;;  %v791_v22 = vadd.f32 %v6090_v52, %v759_v15  ;;  %v5611_v30 = vld [vmem:[%s6789_s3 + $0x138] sm:$0xff]  }
 0x165   :  { %v4793_v35 = vpack.c.bf16 %v937_v62, %v937_v62  ;;  %v696_v27 = vpop.f32.mrf.mxu0  ;;  %5192 = vmatmul.mubr.msk.bf16.vlgmr.msra.gmra.mxu1 %vm1108_vm5, %v1278_v26  ;;  %5272 = vmatmul.mubr.msk.bf16.vlgmr.msra.gmra.mxu0 %vm1108_vm5, %v1918_v24  ;;  %v5610_v62 = vld [vmem:[%s6789_s3 + $0x68] sm:$0xff]  }
 0x166   :  { %v876_v28 = vsel %vm197_vm1, %v873_v8, %v875_v21  ;;  %v816_v29 = vmax.f32 %v791_v22, 0.0  ;;  %v760_v33 = vadd.f32 %v696_v27, %v6063_v31  ;;  %5196 = vmatpush3.bf16.msra.mxu1 %v5599_v18  ;;  %5284 = vmatpush3.bf16.msra.mxu0 %v5600_v20  ;;  %v5603_v41 = vld [vmem:[#allocation2 + $0x1c] ss:$0 sps:$4 sm:$0x44]  }
 0x167   :  { %1064 = vst.msk [vmem:[#allocation2 + $0x24] sm:$0xf] %vm1054_vm4, %v4793_v35  ;;  %v938_v34 = vmax.f32 %v814_v14, %v876_v28  ;;  %v5138_v40 = vpop.f32.mrf.mxu0  ;;  %5197 = vmatprep.subr.bf16.mxu1 %v5715_v0  ;;  %5285 = vmatprep.subr.bf16.mxu0 %v5715_v0 }
 0x168   :  { %v877_v38 = vrot.slane %v816_v29, 2  ;;  %v792_v31 = vadd.f32 %v6090_v52, %v760_v33  ;;  %5199 = vmatprep.mubr.msk.bf16.mxu1 %vm5717_vm2, %v5715_v0  ;;  %5287 = vmatprep.mubr.msk.bf16.mxu0 %vm5717_vm2, %v5715_v0  ;;  %v5612_v33 = vld [vmem:[%s6789_s3 + $0x60] sm:$0xff]  }
 0x169   :  { %v4794_v42 = vpack.c.bf16 %v938_v34, %v938_v34  ;;  %v701_v44 = vpop.f32.mrf.mxu0  ;;  %v5613_v34 = vld [vmem:[%s6789_s3 + $0x130] sm:$0xff]  }
 0x16a   :  { %v878_v45 = vsel %vm197_vm1, %v875_v21, %v877_v38  ;;  %v817_v9 = vmax.f32 %v792_v31, 0.0  ;;  %v761_v47 = vadd.f32 %v701_v44, %v6065_v37  ;;  %5198 = vmatpush3.bf16.msra.mxu1 %v5601_v4  ;;  %5286 = vmatpush3.bf16.msra.mxu0 %v5602_v36  ;;  %v2046_v37 = vrot.slane %v5603_v41, 2  ;;  %v5609_v10 = vld [vmem:[#allocation2 + $0x20] ss:$0 sps:$4 sm:$0x44]  }
 0x16b   :  { %1065 = vst.msk [vmem:[#allocation2 + $0x28] sm:$0xf] %vm1054_vm4, %v4794_v42  ;;  %v939_v48 = vmax.f32 %v815_v13, %v878_v45  ;;  %v5141_v46 = vpop.f32.mrf.mxu0  ;;  %5203 = vmatprep.subr.bf16.mxu1 %v5715_v0  ;;  %5299 = vmatprep.subr.bf16.mxu0 %v5715_v0  ;;  %v1406_v21 = vrot.slane %v5608_v7, 2 }
 0x16c   :  { %v879_v54 = vrot.slane %v817_v9, 2  ;;  %v793_v57 = vadd.f32 %v6090_v52, %v761_v47  ;;  %v5616_v47 = vld [vmem:[%s6789_s3 + $0x158] sm:$0xff]  }
 0x16d   :  { %v4795_v58 = vpack.c.bf16 %v939_v48, %v939_v48  ;;  %v704_v59 = vpop.f32.mrf.mxu0  ;;  %5200 = vmatmul.mubr.msk.bf16.vlgmr.msra.gmra.mxu1 %vm1108_vm5, %v1335_v60  ;;  %5288 = vmatmul.mubr.msk.bf16.vlgmr.msra.gmra.mxu0 %vm1108_vm5, %v2046_v37 }
 0x16e   :  { %v880_v63 = vsel %vm197_vm1, %v877_v38, %v879_v54  ;;  %v818_v51 = vmax.f32 %v793_v57, 0.0  ;;  %v762_v1 = vadd.f32 %v704_v59, %v6067_v43  ;;  %5204 = vmatpush3.bf16.msra.mxu1 %v5604_v50  ;;  %5300 = vmatpush3.bf16.msra.mxu0 %v5605_v53  ;;  %v5614_v4 = vld [vmem:[#allocation2 + $0x24] ss:$0 sps:$4 sm:$0x44]  }
 0x16f   :  { %1066 = vst.msk [vmem:[#allocation2 + $0x2c] sm:$0xf] %vm1054_vm4, %v4795_v58  ;;  %v940_v14 = vmax.f32 %v816_v29, %v880_v63  ;;  %v5142_v2 = vpop.f32.mrf.mxu0  ;;  %5205 = vmatprep.subr.bf16.mxu1 %v5715_v0  ;;  %5301 = vmatprep.subr.bf16.mxu0 %v5715_v0  ;;  %v5617_v63 = vld [vmem:[%s6789_s3 + $0x70] sm:$0xff]  }
 0x170   :  { %v881_v43 = vrot.slane %v818_v51, 2  ;;  %v794_v8 = vadd.f32 %v6090_v52, %v762_v1  ;;  %5207 = vmatprep.mubr.msk.bf16.mxu1 %vm5717_vm2, %v5715_v0  ;;  %5303 = vmatprep.mubr.msk.bf16.mxu0 %vm5717_vm2, %v5715_v0  ;;  %v5619_v1 = vld [vmem:[#allocation2 + $0xc] ss:$0 sps:$4 sm:$0x44]  }
 0x171   :  { %v4796_v19 = vpack.c.bf16 %v940_v14, %v940_v14  ;;  %v709_v56 = vpop.f32.mrf.mxu0 }
 0x172   :  { %v882_v12 = vsel %vm197_vm1, %v879_v54, %v881_v43  ;;  %v819_v25 = vmax.f32 %v794_v8, 0.0  ;;  %v763_v13 = vadd.f32 %v709_v56, %v6069_v49  ;;  %5206 = vmatpush3.bf16.msra.mxu1 %v5606_v3  ;;  %5302 = vmatpush3.bf16.msra.mxu0 %v5607_v6  ;;  %v2174_v49 = vrot.slane %v5609_v10, 2  ;;  %v1463_v54 = vld [vmem:[#allocation2 + $0xc] sm:$0x1] }
 0x173   :  { %1067 = vst.msk [vmem:[#allocation2 + $0x30] sm:$0xf] %vm1054_vm4, %v4796_v19  ;;  %v941_v15 = vmax.f32 %v817_v9, %v882_v12  ;;  %v5145_v16 = vpop.f32.mrf.mxu0  ;;  %5211 = vmatprep.subr.bf16.mxu1 %v5715_v0  ;;  %5315 = vmatprep.subr.bf16.mxu0 %v5715_v0  ;;  %v5615_v9 = vld [vmem:[%s6789_s3 + $0x78] sm:$0xff]   ;;  %v5620_v2 = vld [vmem:[#allocation2 + $0x28] ss:$0 sps:$4 sm:$0x44]  }
 0x174   :  { %v883_v18 = vrot.slane %v819_v25, 2  ;;  %v795_v20 = vadd.f32 %v6090_v52, %v763_v13  ;;  %v5621_v56 = vld [vmem:[%s6789_s3 + $0x88] sm:$0xff]   ;;  %v5622_v12 = vld [vmem:[%s6789_s3 + $0x178] sm:$0xff]  }
 0x175   :  { %v4797_v22 = vpack.c.bf16 %v941_v15, %v941_v15  ;;  %v712_v26 = vpop.f32.mrf.mxu0  ;;  %5208 = vmatmul.mubr.msk.bf16.vlgmr.msra.gmra.mxu1 %vm1108_vm5, %v1406_v21  ;;  %5304 = vmatmul.mubr.msk.bf16.vlgmr.msra.gmra.mxu0 %vm1108_vm5, %v2174_v49  ;;  %v1534_v15 = vrot.slane %v5619_v1, 2  ;;  %v5632_v1 = vld [vmem:[%s6789_s3 + $0xa8] sm:$0xff]  }
 0x176   :  { %v884_v24 = vsel %vm197_vm1, %v881_v43, %v883_v18  ;;  %v820_v35 = vmax.f32 %v795_v20, 0.0  ;;  %v764_v27 = vadd.f32 %v712_v26, %v6071_v55  ;;  %5212 = vmatpush3.bf16.msra.mxu1 %v5610_v62  ;;  %5316 = vmatpush3.bf16.msra.mxu0 %v5611_v30  ;;  %v5624_v26 = vld [vmem:[%s6789_s3 + $0x170] sm:$0xff]  }
 0x177   :  { %1068 = vst.msk [vmem:[#allocation2 + $0x34] sm:$0xf] %vm1054_vm4, %v4797_v22  ;;  %v942_v28 = vmax.f32 %v818_v51, %v884_v24  ;;  %v5146_v29 = vpop.f32.mrf.mxu0  ;;  %5213 = vmatprep.subr.bf16.mxu1 %v5715_v0  ;;  %5317 = vmatprep.subr.bf16.mxu0 %v5715_v0  ;;  %v5618_v51 = vld [vmem:[%s6789_s3 + $0x150] sm:$0xff]   ;;  %v5623_v22 = vld [vmem:[%s6789_s3 + $0x80] sm:$0xff]  }
 0x178   :  { %v885_v40 = vrot.slane %v820_v35, 2  ;;  %v796_v55 = vadd.f32 %v6090_v52, %v764_v27  ;;  %5215 = vmatprep.mubr.msk.bf16.mxu1 %vm5717_vm2, %v5715_v0  ;;  %5319 = vmatprep.mubr.msk.bf16.mxu0 %vm5717_vm2, %v5715_v0 }
 0x179   :  { %v4798_v36 = vpack.c.bf16 %v942_v28, %v942_v28  ;;  %v717_v38 = vpop.f32.mrf.mxu0 }
 0x17a   :  { %v886_v31 = vsel %vm197_vm1, %v883_v18, %v885_v40  ;;  %v821_v41 = vmax.f32 %v796_v55, 0.0  ;;  %v765_v42 = vadd.f32 %v717_v38, %v6073_v61  ;;  %5214 = vmatpush3.bf16.msra.mxu1 %v5612_v33  ;;  %5318 = vmatpush3.bf16.msra.mxu0 %v5613_v34  ;;  %v2302_v61 = vrot.slane %v5614_v4, 2  ;;  %v5626_v4 = vld [vmem:[%s6789_s3 + $0x98] sm:$0xff]  }
 0x17b   :  { %1069 = vst.msk [vmem:[#allocation2 + $0x38] sm:$0xf] %vm1054_vm4, %v4798_v36  ;;  %v943_v44 = vmax.f32 %v819_v25, %v886_v31  ;;  %v5149_v45 = vpop.f32.mrf.mxu0  ;;  %5219 = vmatprep.subr.bf16.mxu1 %v5715_v0  ;;  %5331 = vmatprep.subr.bf16.mxu0 %v5715_v0  ;;  %v5627_v36 = vld [vmem:[%s6789_s3 + $0x198] sm:$0xff]  }
 0x17c   :  { %v887_v48 = vrot.slane %v821_v41, 2  ;;  %v797_v46 = vadd.f32 %v6090_v52, %v765_v42 }
 0x17d   :  { %v4799_v50 = vpack.c.bf16 %v943_v44, %v943_v44  ;;  %v720_v53 = vpop.f32.mrf.mxu0  ;;  %5216 = vmatmul.mubr.msk.bf16.vlgmr.msra.gmra.mxu1 %vm1108_vm5, %v1463_v54  ;;  %5320 = vmatmul.mubr.msk.bf16.vlgmr.msra.gmra.mxu0 %vm1108_vm5, %v2302_v61  ;;  %v1591_v44 = vld [vmem:[#allocation2 + $0x10] sm:$0x1] }
 0x17e   :  { %v888_v57 = vsel %vm197_vm1, %v885_v40, %v887_v48  ;;  %v822_v37 = vmax.f32 %v797_v46, 0.0  ;;  %v766_v58 = vadd.f32 %v720_v53, %v6075_v5  ;;  %5220 = vmatpush3.bf16.msra.mxu1 %v5615_v9  ;;  %5332 = vmatpush3.bf16.msra.mxu0 %v5616_v47  ;;  %v5628_v61 = vld [vmem:[%s6789_s3 + $0x90] sm:$0xff]  }
 0x17f   :  { %1070 = vst.msk [vmem:[#allocation2 + $0x3c] sm:$0xf] %vm1054_vm4, %v4799_v50  ;;  %v944_v59 = vmax.f32 %v820_v35, %v888_v57  ;;  %v5150_v60 = vpop.f32.mrf.mxu0  ;;  %5221 = vmatprep.subr.bf16.mxu1 %v5715_v0  ;;  %5333 = vmatprep.subr.bf16.mxu0 %v5715_v0  ;;  %v5625_v35 = vld [vmem:[#allocation2 + $0x2c] ss:$0 sps:$4 sm:$0x44]   ;;  %v5629_v50 = vld [vmem:[%s6789_s3 + $0x190] sm:$0xff]  }
 0x180   :  { %v889_v5 = vrot.slane %v822_v37, 2  ;;  %v798_v14 = vadd.f32 %v6090_v52, %v766_v58  ;;  %5223 = vmatprep.mubr.msk.bf16.mxu1 %vm5717_vm2, %v5715_v0  ;;  %5335 = vmatprep.mubr.msk.bf16.mxu0 %vm5717_vm2, %v5715_v0  ;;  %v5630_v53 = vld [vmem:[#allocation2 + $0x10] ss:$0 sps:$4 sm:$0x44]  }
 0x181   :  { %v4800_v3 = vpack.c.bf16 %v944_v59, %v944_v59  ;;  %v725_v6 = vpop.f32.mrf.mxu0  ;;  %v5631_v57 = vld [vmem:[#allocation2 + $0x30] ss:$0 sps:$4 sm:$0x44]  }
 0x182   :  { %v890_v7 = vsel %vm197_vm1, %v887_v48, %v889_v5  ;;  %v823_v43 = vmax.f32 %v798_v14, 0.0  ;;  %v767_v8 = vadd.f32 %v725_v6, %v6077_v11  ;;  %5222 = vmatpush3.bf16.msra.mxu1 %v5617_v63  ;;  %5334 = vmatpush3.bf16.msra.mxu0 %v5618_v51  ;;  %v2430_v11 = vrot.slane %v5620_v2, 2 }
 0x183   :  { %1071 = vst.msk [vmem:[#allocation2 + $0x40] sm:$0xf] %vm1054_vm4, %v4800_v3  ;;  %v945_v10 = vmax.f32 %v821_v41, %v890_v7  ;;  %v5153_v19 = vpop.f32.mrf.mxu0  ;;  %5227 = vmatprep.subr.bf16.mxu1 %v5715_v0  ;;  %5347 = vmatprep.subr.bf16.mxu0 %v5715_v0  ;;  %v1662_v6 = vrot.slane %v5630_v53, 2  ;;  %v5659_v53 = vld [vmem:[%s6789_s3 + $0x258] sm:$0xff]  }
 0x184   :  { %v891_v25 = vrot.slane %v823_v43, 2  ;;  %v799_v13 = vadd.f32 %v6090_v52, %v767_v8 }
 0x185   :  { %v4801_v16 = vpack.c.bf16 %v945_v10, %v945_v10  ;;  %v728_v62 = vpop.f32.mrf.mxu0  ;;  %5224 = vmatmul.mubr.msk.bf16.vlgmr.msra.gmra.mxu1 %vm1108_vm5, %v1534_v15  ;;  %5336 = vmatmul.mubr.msk.bf16.vlgmr.msra.gmra.mxu0 %vm1108_vm5, %v2430_v11 }
 0x186   :  { %v892_v30 = vsel %vm197_vm1, %v889_v5, %v891_v25  ;;  %v824_v18 = vmax.f32 %v799_v13, 0.0  ;;  %v768_v20 = vadd.f32 %v728_v62, %v6079_v17  ;;  %5228 = vmatpush3.bf16.msra.mxu1 %v5621_v56  ;;  %5348 = vmatpush3.bf16.msra.mxu0 %v5622_v12  ;;  %v5633_v5 = vld [vmem:[%s6789_s3 + $0x1b8] sm:$0xff]   ;;  %v5635_v56 = vld [vmem:[%s6789_s3 + $0x1b0] sm:$0xff]  }
 0x187   :  { %1072 = vst.msk [vmem:[#allocation2 + $0x44] sm:$0xf] %vm1054_vm4, %v4801_v16  ;;  %v946_v21 = vmax.f32 %v822_v37, %v892_v30  ;;  %v5154_v49 = vpop.f32.mrf.mxu0  ;;  %5229 = vmatprep.subr.bf16.mxu1 %v5715_v0  ;;  %5349 = vmatprep.subr.bf16.mxu0 %v5715_v0  ;;  %v5636_v13 = vld [vmem:[#allocation2 + $0x34] ss:$0 sps:$4 sm:$0x44]   ;;  %v5637_v30 = vld [vmem:[%s6789_s3 + $0xb8] sm:$0xff]  }
 0x188   :  { %v893_v24 = vrot.slane %v824_v18, 2  ;;  %v800_v17 = vadd.f32 %v6090_v52, %v768_v20  ;;  %5231 = vmatprep.mubr.msk.bf16.mxu1 %vm5717_vm2, %v5715_v0  ;;  %5351 = vmatprep.mubr.msk.bf16.mxu0 %vm5717_vm2, %v5715_v0 }
 0x189   :  { %v4802_v27 = vpack.c.bf16 %v946_v21, %v946_v21  ;;  %v733_v28 = vpop.f32.mrf.mxu0  ;;  %v2814_v21 = vrot.slane %v5636_v13, 2 }
 0x18a   :  { %v894_v29 = vsel %vm197_vm1, %v891_v25, %v893_v24  ;;  %v825_v33 = vmax.f32 %v800_v17, 0.0  ;;  %v769_v34 = vadd.f32 %v733_v28, %v6081_v23  ;;  %5230 = vmatpush3.bf16.msra.mxu1 %v5623_v22  ;;  %5350 = vmatpush3.bf16.msra.mxu0 %v5624_v26  ;;  %v2558_v23 = vrot.slane %v5625_v35, 2  ;;  %v1719_v22 = vld [vmem:[#allocation2 + $0x14] sm:$0x1]  ;;  %v5644_v28 = vld [vmem:[%s6789_s3 + $0x1f8] sm:$0xff]  }
 0x18b   :  { %1073 = vst.msk [vmem:[#allocation2 + $0x48] sm:$0xf] %vm1054_vm4, %v4802_v27  ;;  %v947_v40 = vmax.f32 %v823_v43, %v894_v29  ;;  %v5157_v55 = vpop.f32.mrf.mxu0  ;;  %5235 = vmatprep.subr.bf16.mxu1 %v5715_v0  ;;  %5363 = vmatprep.subr.bf16.mxu0 %v5715_v0  ;;  %v5639_v26 = vld [vmem:[%s6789_s3 + $0xb0] sm:$0xff]   ;;  %v5642_v35 = vld [vmem:[#allocation2 + $0x38] ss:$0 sps:$4 sm:$0x44]  }
 0x18c   :  { %v895_v38 = vrot.slane %v825_v33, 2  ;;  %v801_v31 = vadd.f32 %v6090_v52, %v769_v34  ;;  %v5641_v17 = vld [vmem:[#allocation2 + $0x14] ss:$0 sps:$4 sm:$0x44]   ;;  %v5643_v27 = vld [vmem:[%s6789_s3 + $0xc8] sm:$0xff]   ;;  %v5645_v34 = vld [vmem:[%s6789_s3 + $0xc0] sm:$0xff]  }
 0x18d   :  { %v4803_v41 = vpack.c.bf16 %v947_v40, %v947_v40  ;;  %v736_v42 = vpop.f32.mrf.mxu0  ;;  %5232 = vmatmul.mubr.msk.bf16.vlgmr.msra.gmra.mxu1 %vm1108_vm5, %v1591_v44  ;;  %5352 = vmatmul.mubr.msk.bf16.vlgmr.msra.gmra.mxu0 %vm1108_vm5, %v2558_v23  ;;  %v1790_v29 = vrot.slane %v5641_v17, 2  ;;  %v5646_v40 = vld [vmem:[%s6789_s3 + $0x1f0] sm:$0xff]   ;;  %v5647_v55 = vld [vmem:[#allocation2 + $0x3c] ss:$0 sps:$4 sm:$0x44]   ;;  %v5650_v23 = vld [vmem:[%s6789_s3 + $0xe0] sm:$0xff]  }
 0x18e   :  { %v896_v45 = vsel %vm197_vm1, %v893_v24, %v895_v38  ;;  %v826_v9 = vmax.f32 %v801_v31, 0.0  ;;  %v770_v47 = vadd.f32 %v736_v42, %v6083_v32  ;;  %5236 = vmatpush3.bf16.msra.mxu1 %v5626_v4  ;;  %5364 = vmatpush3.bf16.msra.mxu0 %v5627_v36  ;;  %v5640_v24 = vld [vmem:[%s6789_s3 + $0x1d0] sm:$0xff]   ;;  %v5648_v4 = vld [vmem:[%s6789_s3 + $0xe8] sm:$0xff]   ;;  %v5649_v36 = vld [vmem:[%s6789_s3 + $0x218] sm:$0xff]  }
 0x18f   :  { %1074 = vst.msk [vmem:[#allocation2 + $0x4c] sm:$0xf] %vm1054_vm4, %v4803_v41  ;;  %v948_v48 = vmax.f32 %v824_v18, %v896_v45  ;;  %v5158_v46 = vpop.f32.mrf.mxu0  ;;  %5237 = vmatprep.subr.bf16.mxu1 %v5715_v0  ;;  %5365 = vmatprep.subr.bf16.mxu0 %v5715_v0  ;;  %v5638_v18 = vld [vmem:[%s6789_s3 + $0x1d8] sm:$0xff]   ;;  %v5651_v41 = vld [vmem:[%s6789_s3 + $0x210] sm:$0xff]   ;;  %v5653_v44 = vld [vmem:[%s6789_s3 + $0x108] sm:$0xff]  }
 0x190   :  { %v897_v32 = vrot.slane %v826_v9, 2  ;;  %v802_v54 = vadd.f32 %v6090_v52, %v770_v47  ;;  %5239 = vmatprep.mubr.msk.bf16.mxu1 %vm5717_vm2, %v5715_v0  ;;  %5367 = vmatprep.mubr.msk.bf16.mxu0 %vm5717_vm2, %v5715_v0  ;;  %v1847_v31 = vld [vmem:[#allocation2 + $0x18] sm:$0x1]  ;;  %v5652_v42 = vld [vmem:[#allocation2 + $0x40] ss:$0 sps:$4 sm:$0x44]  }
 0x191   :  { %v4804_v37 = vpack.c.bf16 %v948_v48, %v948_v48  ;;  %v741_v58 = vpop.f32.mrf.mxu0  ;;  %v5654_v45 = vld [vmem:[%s6789_s3 + $0x238] sm:$0xff]   ;;  %v5655_v48 = vld [vmem:[%s6789_s3 + $0x100] sm:$0xff]   ;;  %v5656_v46 = vld [vmem:[%s6789_s3 + $0x230] sm:$0xff]  }
 0x192   :  { %v898_v59 = vsel %vm197_vm1, %v895_v38, %v897_v32  ;;  %v827_v60 = vmax.f32 %v802_v54, 0.0  ;;  %v771_v63 = vadd.f32 %v741_v58, %v6085_v39  ;;  %5238 = vmatpush3.bf16.msra.mxu1 %v5628_v61  ;;  %5366 = vmatpush3.bf16.msra.mxu0 %v5629_v50  ;;  %v2686_v39 = vrot.slane %v5631_v57, 2  ;;  %v1975_v47 = vld [vmem:[#allocation2 + $0x1c] sm:$0x1]  ;;  %v5658_v50 = vld [vmem:[%s6789_s3 + $0x128] sm:$0xff]   ;;  %v5660_v57 = vld [vmem:[%s6789_s3 + $0x120] sm:$0xff]  }
 0x193   :  { %1075 = vst.msk [vmem:[#allocation2 + $0x50] sm:$0xf] %vm1054_vm4, %v4804_v37  ;;  %v949_v51 = vmax.f32 %v825_v33, %v898_v59  ;;  %v5161_v14 = vpop.f32.mrf.mxu0  ;;  %5243 = vmatprep.subr.bf16.mxu1 %v5715_v0  ;;  %5379 = vmatprep.subr.bf16.mxu0 %v5715_v0  ;;  %v2942_v33 = vrot.slane %v5642_v35, 2  ;;  %v3070_v38 = vrot.slane %v5647_v55, 2  ;;  %v2103_v54 = vld [vmem:[#allocation2 + $0x20] sm:$0x1] }
 0x194   :  { %v899_v2 = vrot.slane %v827_v60, 2  ;;  %v803_v3 = vadd.f32 %v6090_v52, %v771_v63  ;;  %v5634_v52 = vld [vmem:[%s6789_s3 + $0xa0] sm:$0xff]   ;;  %v5661_v37 = vld [vmem:[%s6789_s3 + $0x250] sm:$0xff]   ;;  %v5662_v58 = vld [vmem:[#allocation2 + $0x48] ss:$0 sps:$4 sm:$0x44]  }
 0x195   :  { %v4805_v7 = vpack.c.bf16 %v949_v51, %v949_v51  ;;  %v744_v43 = vpop.f32.mrf.mxu0  ;;  %5240 = vmatmul.mubr.msk.bf16.vlgmr.msra.gmra.mxu1 %vm1108_vm5, %v1662_v6  ;;  %5368 = vmatmul.mubr.msk.bf16.vlgmr.msra.gmra.mxu0 %vm1108_vm5, %v2686_v39  ;;  %v5657_v61 = vld [vmem:[#allocation2 + $0x44] ss:$0 sps:$4 sm:$0x44]   ;;  %v5663_v59 = vld [vmem:[%s6789_s3 + $0x148] sm:$0xff]   ;;  %v3454_v63 = vrot.slane %v5662_v58, 2  ;;  %v5686_v17 = vld [vmem:[%s6789_s3 + $0x2f0] sm:$0xff]  }
 0x196   :  { %v900_v8 = vsel %vm197_vm1, %v897_v32, %v899_v2  ;;  %v828_v10 = vmax.f32 %v803_v3, 0.0  ;;  %5244 = vmatpush3.bf16.msra.mxu1 %v5632_v1  ;;  %5380 = vmatpush3.bf16.msra.mxu0 %v5633_v5  ;;  %v3326_v32 = vrot.slane %v5657_v61, 2  ;;  %v2231_v51 = vld [vmem:[#allocation2 + $0x24] sm:$0x1]  ;;  %v5666_v5 = vld [vmem:[%s6789_s3 + $0x270] sm:$0xff]   ;;  %v5669_v3 = vld [vmem:[%s6789_s3 + $0x298] sm:$0xff]  }
 0x197   :  { %1076 = vst.msk [vmem:[#allocation2 + $0x54] sm:$0xf] %vm1054_vm4, %v4805_v7  ;;  %v950_v19 = vmax.f32 %v826_v9, %v900_v8  ;;  %v5162_v12 = vpop.f32.mrf.mxu0  ;;  %5245 = vmatprep.subr.bf16.mxu1 %v5715_v0  ;;  %5381 = vmatprep.subr.bf16.mxu0 %v5715_v0  ;;  %v3198_v9 = vrot.slane %v5652_v42, 2  ;;  %v5665_v1 = vld [vmem:[%s6789_s3 + $0x140] sm:$0xff]   ;;  %v2359_v39 = vld [vmem:[#allocation2 + $0x28] sm:$0x1] }
 0x198   :  { %v901_v25 = vrot.slane %v828_v10, 2  ;;  %5247 = vmatprep.mubr.msk.bf16.mxu1 %vm5717_vm2, %v5715_v0  ;;  %5383 = vmatprep.mubr.msk.bf16.mxu0 %vm5717_vm2, %v5715_v0  ;;  %v5667_v14 = vld [vmem:[#allocation2 + $0x4c] ss:$0 sps:$4 sm:$0x44]   ;;  %v5670_v7 = vld [vmem:[%s6789_s3 + $0x160] sm:$0xff]   ;;  %v5671_v43 = vld [vmem:[%s6789_s3 + $0x290] sm:$0xff]  }
 0x199   :  { %v4806_v15 = vpack.c.bf16 %v950_v19, %v950_v19  ;;  %v3582_v6 = vrot.slane %v5667_v14, 2  ;;  %v5674_v19 = vld [vmem:[%s6789_s3 + $0x2b8] sm:$0xff]   ;;  %v5675_v12 = vld [vmem:[%s6789_s3 + $0x180] sm:$0xff]  }
 0x19a   :  { %v902_v11 = vsel %vm197_vm1, %v899_v2, %v901_v25  ;;  %v952_v16 = vmax.f32 %v828_v10, %v901_v25  ;;  %5246 = vmatpush3.bf16.msra.mxu1 %v5634_v52  ;;  %5382 = vmatpush3.bf16.msra.mxu0 %v5635_v56  ;;  %v5668_v2 = vld [vmem:[%s6789_s3 + $0x168] sm:$0xff]   ;;  %v5672_v8 = vld [vmem:[#allocation2 + $0x50] ss:$0 sps:$4 sm:$0x44]   ;;  %v5696_v42 = vld [vmem:[%s6789_s3 + $0x220] sm:$0xff]  }
 0x19b   :  { %1077 = vst.msk [vmem:[#allocation2 + $0x58] sm:$0xf] %vm1054_vm4, %v4806_v15  ;;  %v951_v62 = vmax.f32 %v827_v60, %v902_v11  ;;  %5251 = vmatprep.subr.bf16.mxu1 %v5715_v0  ;;  %5395 = vmatprep.subr.bf16.mxu0 %v5715_v0  ;;  %v5664_v60 = vld [vmem:[%s6789_s3 + $0x278] sm:$0xff]   ;;  %v5673_v10 = vld [vmem:[%s6789_s3 + $0x188] sm:$0xff]   ;;  %v3710_v52 = vrot.slane %v5672_v8, 2  ;;  %v5676_v25 = vld [vmem:[%s6789_s3 + $0x2b0] sm:$0xff]  }
 0x19c   :  { %v4808_v20 = vpack.c.bf16 %v952_v16, %v952_v16  ;;  %v2487_v56 = vld [vmem:[#allocation2 + $0x2c] sm:$0x1]  ;;  %v5679_v11 = vld [vmem:[%s6789_s3 + $0x2d8] sm:$0xff]   ;;  %v5700_v61 = vld [vmem:[%s6789_s3 + $0x260] sm:$0xff]  }
 0x19d   :  { %v4807_v49 = vpack.c.bf16 %v951_v62, %v951_v62  ;;  %5248 = vmatmul.mubr.msk.bf16.vlgmr.msra.gmra.mxu1 %vm1108_vm5, %v1719_v22  ;;  %5384 = vmatmul.mubr.msk.bf16.vlgmr.msra.gmra.mxu0 %vm1108_vm5, %v2814_v21  ;;  %v5678_v15 = vld [vmem:[%s6789_s3 + $0x1a8] sm:$0xff]   ;;  %v2615_v62 = vld [vmem:[#allocation2 + $0x30] sm:$0x1] }
 0x19e   :  { %1080 = vst.msk [vmem:[#allocation2 + $0x60] sm:$0x7] %vm1079_vm6, %v4808_v20  ;;  %5252 = vmatpush3.bf16.msra.mxu1 %v5637_v30  ;;  %5396 = vmatpush3.bf16.msra.mxu0 %v5638_v18  ;;  %v5677_v13 = vld [vmem:[#allocation2 + $0x54] ss:$0 sps:$4 sm:$0x44]   ;;  %v5680_v30 = vld [vmem:[%s6789_s3 + $0x1a0] sm:$0xff]  }
 0x19f   :  { %1078 = vst.msk [vmem:[#allocation2 + $0x5c] sm:$0xf] %vm1054_vm4, %v4807_v49  ;;  %5253 = vmatprep.subr.bf16.mxu1 %v5715_v0  ;;  %5397 = vmatprep.subr.bf16.mxu0 %v5715_v0  ;;  %v3838_v16 = vrot.slane %v5677_v13, 2  ;;  %v5681_v18 = vld [vmem:[%s6789_s3 + $0x2d0] sm:$0xff]   ;;  %v5683_v21 = vld [vmem:[%s6789_s3 + $0x1c8] sm:$0xff]   ;;  %v5684_v49 = vld [vmem:[%s6789_s3 + $0x2f8] sm:$0xff]  }
 0x1a0   :  { %5255 = vmatprep.mubr.msk.bf16.mxu1 %vm5717_vm2, %v5715_v0  ;;  %5399 = vmatprep.mubr.msk.bf16.mxu0 %vm5717_vm2, %v5715_v0  ;;  %v3767_v8 = vld [vmem:[#allocation2 + $0x54] sm:$0x1] }
 0x1a2   :  { %5254 = vmatpush3.bf16.msra.mxu1 %v5639_v26  ;;  %5398 = vmatpush3.bf16.msra.mxu0 %v5640_v24  ;;  %v5682_v20 = vld [vmem:[#allocation2 + $0x58] ss:$0 sps:$4 sm:$0x44]   ;;  %v2743_v26 = vld [vmem:[#allocation2 + $0x34] sm:$0x1]  ;;  %v5685_v24 = vld [vmem:[%s6789_s3 + $0x1c0] sm:$0xff]  }
 0x1a3   :  { %5259 = vmatprep.subr.bf16.mxu1 %v5715_v0  ;;  %5411 = vmatprep.subr.bf16.mxu0 %v5715_v0  ;;  %v3966_v22 = vrot.slane %v5682_v20, 2 }
 0x1a5   :  { %5256 = vmatmul.mubr.msk.bf16.vlgmr.msra.gmra.mxu1 %vm1108_vm5, %v1790_v29  ;;  %5400 = vmatmul.mubr.msk.bf16.vlgmr.msra.gmra.mxu0 %vm1108_vm5, %v2942_v33  ;;  %v2871_v33 = vld [vmem:[#allocation2 + $0x38] sm:$0x1]  ;;  %v5692_v55 = vld [vmem:[#allocation2 + $0x60] ss:$0 sps:$4 sm:$0x44]  }
 0x1a6   :  { %5260 = vmatpush3.bf16.msra.mxu1 %v5643_v27  ;;  %5412 = vmatpush3.bf16.msra.mxu0 %v5644_v28  ;;  %v5687_v35 = vld [vmem:[#allocation2 + $0x5c] ss:$0 sps:$4 sm:$0x44]   ;;  %v5688_v27 = vld [vmem:[%s6789_s3 + $0x1e8] sm:$0xff]  }
 0x1a7   :  { %5261 = vmatprep.subr.bf16.mxu1 %v5715_v0  ;;  %5413 = vmatprep.subr.bf16.mxu0 %v5715_v0  ;;  %v5689_v28 = vld [vmem:[%s6789_s3 + $0x318] sm:$0xff]   ;;  %v4094_v29 = vrot.slane %v5687_v35, 2  ;;  %v5709_v35 = vld [vmem:[%s6789_s3 + $0x308] sm:$0xff]  }
 0x1a8   :  { %5263 = vmatprep.mubr.msk.bf16.mxu1 %vm5717_vm2, %v5715_v0  ;;  %5415 = vmatprep.mubr.msk.bf16.mxu0 %vm5717_vm2, %v5715_v0 }
 0x1aa   :  { %5262 = vmatpush3.bf16.msra.mxu1 %v5645_v34  ;;  %5414 = vmatpush3.bf16.msra.mxu0 %v5646_v40  ;;  %v5690_v34 = vld [vmem:[%s6789_s3 + $0x1e0] sm:$0xff]   ;;  %v5691_v40 = vld [vmem:[%s6789_s3 + $0x310] sm:$0xff]  }
 0x1ab   :  { %5275 = vmatprep.subr.bf16.mxu1 %v5715_v0  ;;  %5427 = vmatprep.subr.bf16.mxu0 %v5715_v0 }
 0x1ad   :  { %5264 = vmatmul.mubr.msk.bf16.vlgmr.msra.gmra.mxu1 %vm1108_vm5, %v1847_v31  ;;  %5416 = vmatmul.mubr.msk.bf16.vlgmr.msra.gmra.mxu0 %vm1108_vm5, %v3070_v38  ;;  %v2999_v38 = vld [vmem:[#allocation2 + $0x3c] sm:$0x1]  ;;  %v5694_v31 = vld [vmem:[%s6789_s3 + $0x200] sm:$0xff]  }
 0x1ae   :  { %5276 = vmatpush3.bf16.msra.mxu1 %v5648_v4  ;;  %5428 = vmatpush3.bf16.msra.mxu0 %v5649_v36  ;;  %v5693_v4 = vld [vmem:[%s6789_s3 + $0x208] sm:$0xff]   ;;  %v4222_v36 = vrot.slane %v5692_v55, 2  ;;  %v5710_v55 = vld [vmem:[%s6789_s3 + $0x300] sm:$0xff]  }
 0x1af   :  { %5277 = vmatprep.subr.bf16.mxu1 %v5715_v0  ;;  %5429 = vmatprep.subr.bf16.mxu0 %v5715_v0 }
 0x1b0   :  { %5279 = vmatprep.mubr.msk.bf16.mxu1 %vm5717_vm2, %v5715_v0  ;;  %5431 = vmatprep.mubr.msk.bf16.mxu0 %vm5717_vm2, %v5715_v0 }
 0x1b2   :  { %5278 = vmatpush3.bf16.msra.mxu1 %v5650_v23  ;;  %5430 = vmatpush3.bf16.msra.mxu0 %v5651_v41  ;;  %v5695_v23 = vld [vmem:[%s6789_s3 + $0x228] sm:$0xff]   ;;  %v3127_v41 = vld [vmem:[#allocation2 + $0x40] sm:$0x1] }
 0x1b3   :  { %5291 = vmatprep.subr.bf16.mxu1 %v5715_v0  ;;  %5443 = vmatprep.subr.bf16.mxu0 %v5715_v0 }
 0x1b5   :  { %5280 = vmatmul.mubr.msk.bf16.vlgmr.msra.gmra.mxu1 %vm1108_vm5, %v1975_v47  ;;  %5432 = vmatmul.mubr.msk.bf16.vlgmr.msra.gmra.mxu0 %vm1108_vm5, %v3198_v9  ;;  %v5698_v9 = vld [vmem:[%s6789_s3 + $0x240] sm:$0xff]   ;;  %v5699_v47 = vld [vmem:[%s6789_s3 + $0x268] sm:$0xff]  }
 0x1b6   :  { %5292 = vmatpush3.bf16.msra.mxu1 %v5653_v44  ;;  %5444 = vmatpush3.bf16.msra.mxu0 %v5654_v45  ;;  %v5697_v44 = vld [vmem:[%s6789_s3 + $0x248] sm:$0xff]   ;;  %v3255_v45 = vld [vmem:[#allocation2 + $0x44] sm:$0x1] }
 0x1b7   :  { %5293 = vmatprep.subr.bf16.mxu1 %v5715_v0  ;;  %5445 = vmatprep.subr.bf16.mxu0 %v5715_v0 }
 0x1b8   :  { %5295 = vmatprep.mubr.msk.bf16.mxu1 %vm5717_vm2, %v5715_v0  ;;  %5447 = vmatprep.mubr.msk.bf16.mxu0 %vm5717_vm2, %v5715_v0 }
 0x1ba   :  { %5294 = vmatpush3.bf16.msra.mxu1 %v5655_v48  ;;  %5446 = vmatpush3.bf16.msra.mxu0 %v5656_v46  ;;  %v3383_v48 = vld [vmem:[#allocation2 + $0x48] sm:$0x1] }
 0x1bb   :  { %5307 = vmatprep.subr.bf16.mxu1 %v5715_v0  ;;  %5459 = vmatprep.subr.bf16.mxu0 %v5715_v0 }
 0x1bd   :  { %5296 = vmatmul.mubr.msk.bf16.vlgmr.msra.gmra.mxu1 %vm1108_vm5, %v2103_v54  ;;  %5448 = vmatmul.mubr.msk.bf16.vlgmr.msra.gmra.mxu0 %vm1108_vm5, %v3326_v32  ;;  %v5701_v32 = vld [vmem:[%s6789_s3 + $0x288] sm:$0xff]  }
 0x1be   :  { %5308 = vmatpush3.bf16.msra.mxu1 %v5658_v50  ;;  %5460 = vmatpush3.bf16.msra.mxu0 %v5659_v53 }
 0x1bf   :  { %5309 = vmatprep.subr.bf16.mxu1 %v5715_v0  ;;  %5461 = vmatprep.subr.bf16.mxu0 %v5715_v0 }
 0x1c0   :  { %5311 = vmatprep.mubr.msk.bf16.mxu1 %vm5717_vm2, %v5715_v0  ;;  %5463 = vmatprep.mubr.msk.bf16.mxu0 %vm5717_vm2, %v5715_v0 }
 0x1c2   :  { %5310 = vmatpush3.bf16.msra.mxu1 %v5660_v57  ;;  %5462 = vmatpush3.bf16.msra.mxu0 %v5661_v37  ;;  %v3511_v57 = vld [vmem:[#allocation2 + $0x4c] sm:$0x1] }
 0x1c3   :  { %5323 = vmatprep.subr.bf16.mxu1 %v5715_v0  ;;  %5475 = vmatprep.subr.bf16.mxu0 %v5715_v0 }
 0x1c5   :  { %5312 = vmatmul.mubr.msk.bf16.vlgmr.msra.gmra.mxu1 %vm1108_vm5, %v2231_v51  ;;  %5464 = vmatmul.mubr.msk.bf16.vlgmr.msra.gmra.mxu0 %vm1108_vm5, %v3454_v63  ;;  %v5703_v51 = vld [vmem:[%s6789_s3 + $0x2a8] sm:$0xff]  }
 0x1c6   :  { %5324 = vmatpush3.bf16.msra.mxu1 %v5663_v59  ;;  %5476 = vmatpush3.bf16.msra.mxu0 %v5664_v60  ;;  %v5702_v59 = vld [vmem:[%s6789_s3 + $0x280] sm:$0xff]  }
 0x1c7   :  { %5325 = vmatprep.subr.bf16.mxu1 %v5715_v0  ;;  %5477 = vmatprep.subr.bf16.mxu0 %v5715_v0 }
 0x1c8   :  { %5327 = vmatprep.mubr.msk.bf16.mxu1 %vm5717_vm2, %v5715_v0  ;;  %5479 = vmatprep.mubr.msk.bf16.mxu0 %vm5717_vm2, %v5715_v0 }
 0x1ca   :  { %5326 = vmatpush3.bf16.msra.mxu1 %v5665_v1  ;;  %5478 = vmatpush3.bf16.msra.mxu0 %v5666_v5  ;;  %v3639_v5 = vld [vmem:[#allocation2 + $0x50] sm:$0x1] }
 0x1cb   :  { %5339 = vmatprep.subr.bf16.mxu1 %v5715_v0  ;;  %5491 = vmatprep.subr.bf16.mxu0 %v5715_v0 }
 0x1cd   :  { %5328 = vmatmul.mubr.msk.bf16.vlgmr.msra.gmra.mxu1 %vm1108_vm5, %v2359_v39  ;;  %5480 = vmatmul.mubr.msk.bf16.vlgmr.msra.gmra.mxu0 %vm1108_vm5, %v3582_v6 }
 0x1ce   :  { %5340 = vmatpush3.bf16.msra.mxu1 %v5668_v2  ;;  %5492 = vmatpush3.bf16.msra.mxu0 %v5669_v3  ;;  %v5704_v3 = vld [vmem:[%s6789_s3 + $0x2a0] sm:$0xff]  }
 0x1cf   :  { %5341 = vmatprep.subr.bf16.mxu1 %v5715_v0  ;;  %5493 = vmatprep.subr.bf16.mxu0 %v5715_v0 }
 0x1d0   :  { %5343 = vmatprep.mubr.msk.bf16.mxu1 %vm5717_vm2, %v5715_v0  ;;  %5495 = vmatprep.mubr.msk.bf16.mxu0 %vm5717_vm2, %v5715_v0 }
 0x1d2   :  { %5342 = vmatpush3.bf16.msra.mxu1 %v5670_v7  ;;  %5494 = vmatpush3.bf16.msra.mxu0 %v5671_v43  ;;  %v5705_v7 = vld [vmem:[%s6789_s3 + $0x2c8] sm:$0xff]  }
 0x1d3   :  { %5355 = vmatprep.subr.bf16.mxu1 %v5715_v0  ;;  %5507 = vmatprep.subr.bf16.mxu0 %v5715_v0 }
 0x1d5   :  { %5344 = vmatmul.mubr.msk.bf16.vlgmr.msra.gmra.mxu1 %vm1108_vm5, %v2487_v56  ;;  %5496 = vmatmul.mubr.msk.bf16.vlgmr.msra.gmra.mxu0 %vm1108_vm5, %v3710_v52  ;;  %v5706_v56 = vld [vmem:[%s6789_s3 + $0x2c0] sm:$0xff]  }
 0x1d6   :  { %5356 = vmatpush3.bf16.msra.mxu1 %v5673_v10  ;;  %5508 = vmatpush3.bf16.msra.mxu0 %v5674_v19 }
 0x1d7   :  { %5357 = vmatprep.subr.bf16.mxu1 %v5715_v0  ;;  %5509 = vmatprep.subr.bf16.mxu0 %v5715_v0 }
 0x1d8   :  { %5359 = vmatprep.mubr.msk.bf16.mxu1 %vm5717_vm2, %v5715_v0  ;;  %5511 = vmatprep.mubr.msk.bf16.mxu0 %vm5717_vm2, %v5715_v0 }
 0x1da   :  { %5358 = vmatpush3.bf16.msra.mxu1 %v5675_v12  ;;  %5510 = vmatpush3.bf16.msra.mxu0 %v5676_v25 }
 0x1db   :  { %5371 = vmatprep.subr.bf16.mxu1 %v5715_v0  ;;  %5523 = vmatprep.subr.bf16.mxu0 %v5715_v0 }
 0x1dd   :  { %5360 = vmatmul.mubr.msk.bf16.vlgmr.msra.gmra.mxu1 %vm1108_vm5, %v2615_v62  ;;  %5512 = vmatmul.mubr.msk.bf16.vlgmr.msra.gmra.mxu0 %vm1108_vm5, %v3838_v16 }
 0x1de   :  { %5372 = vmatpush3.bf16.msra.mxu1 %v5678_v15  ;;  %5524 = vmatpush3.bf16.msra.mxu0 %v5679_v11  ;;  %v5707_v11 = vld [vmem:[%s6789_s3 + $0x2e8] sm:$0xff]  }
 0x1df   :  { %5373 = vmatprep.subr.bf16.mxu1 %v5715_v0  ;;  %5525 = vmatprep.subr.bf16.mxu0 %v5715_v0 }
 0x1e0   :  { %5375 = vmatprep.mubr.msk.bf16.mxu1 %vm5717_vm2, %v5715_v0  ;;  %5527 = vmatprep.mubr.msk.bf16.mxu0 %vm5717_vm2, %v5715_v0 }
 0x1e2   :  { %5374 = vmatpush3.bf16.msra.mxu1 %v5680_v30  ;;  %5526 = vmatpush3.bf16.msra.mxu0 %v5681_v18  ;;  %v3895_v30 = vld [vmem:[#allocation2 + $0x58] sm:$0x1] }
 0x1e3   :  { %5387 = vmatprep.subr.bf16.mxu1 %v5715_v0  ;;  %5539 = vmatprep.subr.bf16.mxu0 %v5715_v0 }
 0x1e5   :  { %5376 = vmatmul.mubr.msk.bf16.vlgmr.msra.gmra.mxu1 %vm1108_vm5, %v2743_v26  ;;  %5528 = vmatmul.mubr.msk.bf16.vlgmr.msra.gmra.mxu0 %vm1108_vm5, %v3966_v22 }
 0x1e6   :  { %5388 = vmatpush3.bf16.msra.mxu1 %v5683_v21  ;;  %5540 = vmatpush3.bf16.msra.mxu0 %v5684_v49  ;;  %v5708_v49 = vld [vmem:[%s6789_s3 + $0x2e0] sm:$0xff]  }
 0x1e7   :  { %5389 = vmatprep.subr.bf16.mxu1 %v5715_v0  ;;  %5541 = vmatprep.subr.bf16.mxu0 %v5715_v0 }
 0x1e8   :  { %5391 = vmatprep.mubr.msk.bf16.mxu1 %vm5717_vm2, %v5715_v0  ;;  %5543 = vmatprep.mubr.msk.bf16.mxu0 %vm5717_vm2, %v5715_v0 }
 0x1ea   :  { %5390 = vmatpush3.bf16.msra.mxu1 %v5685_v24  ;;  %5542 = vmatpush3.bf16.msra.mxu0 %v5686_v17 }
 0x1eb   :  { %5403 = vmatprep.subr.bf16.mxu1 %v5715_v0  ;;  %5555 = vmatprep.subr.bf16.mxu0 %v5715_v0 }
 0x1ed   :  { %5392 = vmatmul.mubr.msk.bf16.vlgmr.msra.gmra.mxu1 %vm1108_vm5, %v2871_v33  ;;  %5544 = vmatmul.mubr.msk.bf16.vlgmr.msra.gmra.mxu0 %vm1108_vm5, %v4094_v29  ;;  %v4023_v29 = vld [vmem:[#allocation2 + $0x5c] sm:$0x1] }
 0x1ee   :  { %5404 = vmatpush3.bf16.msra.mxu1 %v5688_v27  ;;  %5556 = vmatpush3.bf16.msra.mxu0 %v5689_v28 }
 0x1ef   :  { %5405 = vmatprep.subr.bf16.mxu1 %v5715_v0  ;;  %5557 = vmatprep.subr.bf16.mxu0 %v5715_v0 }
 0x1f0   :  { %5407 = vmatprep.mubr.msk.bf16.mxu1 %vm5717_vm2, %v5715_v0  ;;  %5559 = vmatprep.mubr.msk.bf16.mxu0 %vm5717_vm2, %v5715_v0 }
 0x1f2   :  { %5406 = vmatpush3.bf16.msra.mxu1 %v5690_v34  ;;  %5558 = vmatpush3.bf16.msra.mxu0 %v5691_v40 }
 0x1f3   :  { %5419 = vmatprep.subr.bf16.mxu1 %v5715_v0 }
 0x1f5   :  { %5408 = vmatmul.mubr.msk.bf16.vlgmr.msra.gmra.mxu1 %vm1108_vm5, %v2999_v38  ;;  %5560 = vmatmul.mubr.msk.bf16.vlgmr.msra.gmra.mxu0 %vm1108_vm5, %v4222_v36 }
 0x1f6   :  { %5420 = vmatpush3.bf16.msra.mxu1 %v5693_v4  ;;  %5423 = vmatprep.mubr.msk.bf16.mxu1 %vm5717_vm2, %v5715_v0 }
 0x1f7   :  { %5421 = vmatprep.subr.bf16.mxu1 %v5715_v0 }
 0x1fa   :  { %5422 = vmatpush3.bf16.msra.mxu1 %v5694_v31 }
 0x1fb   :  { %5435 = vmatprep.subr.bf16.mxu1 %v5715_v0 }
 0x1fd   :  { %5424 = vmatmul.mubr.msk.bf16.vlgmr.msra.gmra.mxu1 %vm1108_vm5, %v3127_v41 }
 0x1fe   :  { %5436 = vmatpush3.bf16.msra.mxu1 %v5695_v23  ;;  %5439 = vmatprep.mubr.msk.bf16.mxu1 %vm5717_vm2, %v5715_v0 }
 0x1ff   :  { %5437 = vmatprep.subr.bf16.mxu1 %v5715_v0 }
 0x202   :  { %5438 = vmatpush3.bf16.msra.mxu1 %v5696_v42  ;;  %v4151_v42 = vld [vmem:[#allocation2 + $0x60] sm:$0x1] }
 0x203   :  { %5451 = vmatprep.subr.bf16.mxu1 %v5715_v0 }
 0x205   :  { %5440 = vmatmul.mubr.msk.bf16.vlgmr.msra.gmra.mxu1 %vm1108_vm5, %v3255_v45 }
 0x206   :  { %5452 = vmatpush3.bf16.msra.mxu1 %v5697_v44  ;;  %5455 = vmatprep.mubr.msk.bf16.mxu1 %vm5717_vm2, %v5715_v0 }
 0x207   :  { %5453 = vmatprep.subr.bf16.mxu1 %v5715_v0 }
 0x20a   :  { %5454 = vmatpush3.bf16.msra.mxu1 %v5698_v9 }
 0x20b   :  { %5467 = vmatprep.subr.bf16.mxu1 %v5715_v0 }
 0x20d   :  { %v1146_v46 = vpop.f32.mrf.mxu1  ;;  %5456 = vmatmul.mubr.msk.bf16.vlgmr.msra.gmra.mxu1 %vm1108_vm5, %v3383_v48 }
 0x20e   :  { %5468 = vmatpush3.bf16.msra.mxu1 %v5699_v47  ;;  %5471 = vmatprep.mubr.msk.bf16.mxu1 %vm5717_vm2, %v5715_v0 }
 0x20f   :  { %v5169_v50 = vpop.f32.mrf.mxu1  ;;  %5469 = vmatprep.subr.bf16.mxu1 %v5715_v0 }
 0x211   :  { %v1149_v53 = vpop.f32.mrf.mxu1 }
 0x212   :  { %5470 = vmatpush3.bf16.msra.mxu1 %v5700_v61 }
 0x213   :  { %v5170_v54 = vpop.f32.mrf.mxu1  ;;  %5483 = vmatprep.subr.bf16.mxu1 %v5715_v0 }
 0x215   :  { %v1201_v37 = vpop.f32.mrf.mxu1  ;;  %5472 = vmatmul.mubr.msk.bf16.vlgmr.msra.gmra.mxu1 %vm1108_vm5, %v3511_v57 }
 0x216   :  { %v1202_v58 = vadd.f32 %v1201_v37, %v1146_v46  ;;  %5484 = vmatpush3.bf16.msra.mxu1 %v5701_v32  ;;  %5487 = vmatprep.mubr.msk.bf16.mxu1 %vm5717_vm2, %v5715_v0 }
 0x217   :  { %v5177_v60 = vpop.f32.mrf.mxu1  ;;  %5485 = vmatprep.subr.bf16.mxu1 %v5715_v0 }
 0x219   :  { %v1204_v63 = vpop.f32.mrf.mxu1 }
 0x21a   :  { %5486 = vmatpush3.bf16.msra.mxu1 %v5702_v59 }
 0x21b   :  { %v5178_v1 = vpop.f32.mrf.mxu1  ;;  %5499 = vmatprep.subr.bf16.mxu1 %v5715_v0 }
 0x21d   :  { %v1262_v14 = vpop.f32.mrf.mxu1  ;;  %5488 = vmatmul.mubr.msk.bf16.vlgmr.msra.gmra.mxu1 %vm1108_vm5, %v3639_v5 }
 0x21e   :  { %v1268_v2 = vadd.f32 %v1262_v14, %v1202_v58  ;;  %5500 = vmatpush3.bf16.msra.mxu1 %v5703_v51  ;;  %5503 = vmatprep.mubr.msk.bf16.mxu1 %vm5717_vm2, %v5715_v0 }
 0x21f   :  { %v5185_v6 = vpop.f32.mrf.mxu1  ;;  %5501 = vmatprep.subr.bf16.mxu1 %v5715_v0 }
 0x221   :  { %v1265_v39 = vpop.f32.mrf.mxu1 }
 0x222   :  { %5502 = vmatpush3.bf16.msra.mxu1 %v5704_v3 }
 0x223   :  { %v5186_v43 = vpop.f32.mrf.mxu1  ;;  %5515 = vmatprep.subr.bf16.mxu1 %v5715_v0 }
 0x225   :  { %v1328_v10 = vpop.f32.mrf.mxu1  ;;  %v6688_v19 = vpop.f32.mrf.mxu0  ;;  %5504 = vmatmul.mubr.msk.bf16.vlgmr.msra.gmra.mxu1 %vm1108_vm5, %v3767_v8 }
 0x226   :  { %v1334_v52 = vadd.f32 %v1328_v10, %v1268_v2  ;;  %5516 = vmatpush3.bf16.msra.mxu1 %v5705_v7  ;;  %5519 = vmatprep.mubr.msk.bf16.mxu1 %vm5717_vm2, %v5715_v0 }
 0x227   :  { %v5193_v12 = vpop.f32.mrf.mxu1  ;;  %v5273_v25 = vpop.f32.mrf.mxu0  ;;  %5517 = vmatprep.subr.bf16.mxu1 %v5715_v0 }
 0x229   :  { %v1331_v13 = vpop.f32.mrf.mxu1  ;;  %v1971_v15 = vpop.f32.mrf.mxu0 }
 0x22a   :  { %5518 = vmatpush3.bf16.msra.mxu1 %v5706_v56 }
 0x22b   :  { %v5194_v16 = vpop.f32.mrf.mxu1  ;;  %v5274_v62 = vpop.f32.mrf.mxu0  ;;  %5531 = vmatprep.subr.bf16.mxu1 %v5715_v0 }
 0x22d   :  { %v1390_v18 = vpop.f32.mrf.mxu1  ;;  %v6701_v20 = vpop.f32.mrf.mxu0  ;;  %5520 = vmatmul.mubr.msk.bf16.vlgmr.msra.gmra.mxu1 %vm1108_vm5, %v3895_v30 }
 0x22e   :  { %v1396_v21 = vadd.f32 %v1390_v18, %v1334_v52  ;;  %5532 = vmatpush3.bf16.msra.mxu1 %v5707_v11  ;;  %5535 = vmatprep.mubr.msk.bf16.mxu1 %vm5717_vm2, %v5715_v0 }
 0x22f   :  { %v5201_v22 = vpop.f32.mrf.mxu1  ;;  %v5289_v26 = vpop.f32.mrf.mxu0  ;;  %5533 = vmatprep.subr.bf16.mxu1 %v5715_v0 }
 0x231   :  { %v1393_v24 = vpop.f32.mrf.mxu1  ;;  %v2099_v17 = vpop.f32.mrf.mxu0 }
 0x232   :  { %5534 = vmatpush3.bf16.msra.mxu1 %v5708_v49 }
 0x233   :  { %v5202_v27 = vpop.f32.mrf.mxu1  ;;  %v5290_v28 = vpop.f32.mrf.mxu0  ;;  %5547 = vmatprep.subr.bf16.mxu1 %v5715_v0 }
 0x235   :  { %v1456_v33 = vpop.f32.mrf.mxu1  ;;  %v6714_v34 = vpop.f32.mrf.mxu0  ;;  %5536 = vmatmul.mubr.msk.bf16.vlgmr.msra.gmra.mxu1 %vm1108_vm5, %v4023_v29 }
 0x236   :  { %v1462_v40 = vadd.f32 %v1456_v33, %v1396_v21  ;;  %5548 = vmatpush3.bf16.msra.mxu1 %v5709_v35  ;;  %5551 = vmatprep.mubr.msk.bf16.mxu1 %vm5717_vm2, %v5715_v0 }
 0x237   :  { %v5209_v4 = vpop.f32.mrf.mxu1  ;;  %v5305_v36 = vpop.f32.mrf.mxu0  ;;  %5549 = vmatprep.subr.bf16.mxu1 %v5715_v0 }
 0x239   :  { %v1459_v38 = vpop.f32.mrf.mxu1  ;;  %v2227_v31 = vpop.f32.mrf.mxu0 }
 0x23a   :  { %5550 = vmatpush3.bf16.msra.mxu1 %v5710_v55 }
 0x23b   :  { %v5210_v23 = vpop.f32.mrf.mxu1  ;;  %v5306_v41 = vpop.f32.mrf.mxu0 }
 0x23d   :  { %v1518_v44 = vpop.f32.mrf.mxu1  ;;  %v6723_v45 = vpop.f32.mrf.mxu0  ;;  %5552 = vmatmul.mubr.msk.bf16.vlgmr.msra.gmra.mxu1 %vm1108_vm5, %v4151_v42 }
 0x23e   :  { %v1524_v9 = vadd.f32 %v1518_v44, %v1462_v40 }
 0x23f   :  { %v5217_v47 = vpop.f32.mrf.mxu1  ;;  %v5321_v48 = vpop.f32.mrf.mxu0 }
 0x241   :  { %v1521_v46 = vpop.f32.mrf.mxu1  ;;  %v2355_v61 = vpop.f32.mrf.mxu0 }
 0x243   :  { %v5218_v50 = vpop.f32.mrf.mxu1  ;;  %v5322_v53 = vpop.f32.mrf.mxu0 }
 0x245   :  { %v1584_v32 = vpop.f32.mrf.mxu1  ;;  %v6726_v0 = vpop.f32.mrf.mxu0 }
 0x246   :  { %v1590_v54 = vadd.f32 %v1584_v32, %v1524_v9 }
 0x247   :  { %v5225_v57 = vpop.f32.mrf.mxu1  ;;  %v5337_v37 = vpop.f32.mrf.mxu0 }
 0x249   :  { %v1587_v58 = vpop.f32.mrf.mxu1  ;;  %v2483_v59 = vpop.f32.mrf.mxu0 }
 0x24b   :  { %v5226_v60 = vpop.f32.mrf.mxu1  ;;  %v5338_v63 = vpop.f32.mrf.mxu0 }
 0x24d   :  { %v1646_v51 = vpop.f32.mrf.mxu1  ;;  %v6728_v1 = vpop.f32.mrf.mxu0 }
 0x24e   :  { %v1652_v5 = vadd.f32 %v1646_v51, %v1590_v54 }
 0x24f   :  { %v5233_v14 = vpop.f32.mrf.mxu1  ;;  %v5353_v2 = vpop.f32.mrf.mxu0 }
 0x251   :  { %v1649_v3 = vpop.f32.mrf.mxu1  ;;  %v2611_v6 = vpop.f32.mrf.mxu0 }
 0x253   :  { %v5234_v39 = vpop.f32.mrf.mxu1  ;;  %v5354_v7 = vpop.f32.mrf.mxu0 }
 0x255   :  { %v1712_v43 = vpop.f32.mrf.mxu1  ;;  %v6730_v8 = vpop.f32.mrf.mxu0 }
 0x256   :  { %v1718_v10 = vadd.f32 %v1712_v43, %v1652_v5 }
 0x257   :  { %v5241_v52 = vpop.f32.mrf.mxu1  ;;  %v5369_v56 = vpop.f32.mrf.mxu0 }
 0x259   :  { %v1715_v12 = vpop.f32.mrf.mxu1  ;;  %v2739_v25 = vpop.f32.mrf.mxu0 }
 0x25b   :  { %v5242_v13 = vpop.f32.mrf.mxu1  ;;  %v5370_v15 = vpop.f32.mrf.mxu0 }
 0x25d   :  { %v1774_v11 = vpop.f32.mrf.mxu1  ;;  %v6732_v16 = vpop.f32.mrf.mxu0 }
 0x25e   :  { %v1780_v62 = vadd.f32 %v1774_v11, %v1718_v10 }
 0x25f   :  { %v5249_v30 = vpop.f32.mrf.mxu1  ;;  %v5385_v18 = vpop.f32.mrf.mxu0 }
 0x261   :  { %v1777_v21 = vpop.f32.mrf.mxu1  ;;  %v2867_v49 = vpop.f32.mrf.mxu0 }
 0x263   :  { %v5250_v22 = vpop.f32.mrf.mxu1  ;;  %v5386_v26 = vpop.f32.mrf.mxu0 }
 0x265   :  { %v1840_v24 = vpop.f32.mrf.mxu1  ;;  %v6734_v17 = vpop.f32.mrf.mxu0 }
 0x266   :  { %v1846_v35 = vadd.f32 %v1840_v24, %v1780_v62 }
 0x267   :  { %v5257_v27 = vpop.f32.mrf.mxu1  ;;  %v5401_v28 = vpop.f32.mrf.mxu0 }
 0x269   :  { %v1843_v29 = vpop.f32.mrf.mxu1  ;;  %v2995_v33 = vpop.f32.mrf.mxu0 }
 0x26b   :  { %v5258_v40 = vpop.f32.mrf.mxu1  ;;  %v5402_v55 = vpop.f32.mrf.mxu0 }
 0x26d   :  { %v1902_v4 = vpop.f32.mrf.mxu1  ;;  %v6736_v36 = vpop.f32.mrf.mxu0 }
 0x26e   :  { %v1908_v38 = vadd.f32 %v1902_v4, %v1846_v35 }
 0x26f   :  { %v5265_v31 = vpop.f32.mrf.mxu1  ;;  %v5417_v23 = vpop.f32.mrf.mxu0 }
 0x270   :  { %v1974_v47 = vadd.f32 %v6688_v19, %v1908_v38 }
 0x271   :  { %v1905_v41 = vpop.f32.mrf.mxu1  ;;  %v3123_v42 = vpop.f32.mrf.mxu0 }
 0x273   :  { %v5266_v44 = vpop.f32.mrf.mxu1  ;;  %v5418_v9 = vpop.f32.mrf.mxu0 }
 0x275   :  { %v2030_v48 = vpop.f32.mrf.mxu1  ;;  %v6739_v46 = vpop.f32.mrf.mxu0 }
 0x276   :  { %v2036_v61 = vadd.f32 %v2030_v48, %v1974_v47 }
 0x277   :  { %v5281_v50 = vpop.f32.mrf.mxu1  ;;  %v5433_v53 = vpop.f32.mrf.mxu0 }
 0x278   :  { %v2102_v58 = vadd.f32 %v6701_v20, %v2036_v61  ;;  %v12_v20 = vstv %s6791_s6 }
 0x279   :  { %v2033_v32 = vpop.f32.mrf.mxu1  ;;  %v3251_v54 = vpop.f32.mrf.mxu0  ;;  %13 = vst [vmem:[#allocation3] sm:$0x1] %v12_v20 }
 0x27b   :  { %v5282_v57 = vpop.f32.mrf.mxu1  ;;  %v5434_v37 = vpop.f32.mrf.mxu0 }
 0x27d   :  { %v2158_v59 = vpop.f32.mrf.mxu1  ;;  %v6742_v60 = vpop.f32.mrf.mxu0 }
 0x27e   :  { %v2164_v63 = vadd.f32 %v2158_v59, %v2102_v58 }
 0x27f   :  { %v5297_v51 = vpop.f32.mrf.mxu1  ;;  %v5449_v5 = vpop.f32.mrf.mxu0 }
 0x280   :  { %v2230_v23 = vadd.f32 %v6714_v34, %v2164_v63 }
 0x281   :  { %v2161_v14 = vpop.f32.mrf.mxu1  ;;  %v3379_v19 = vpop.f32.mrf.mxu0 }
 0x283   :  { %v5298_v2 = vpop.f32.mrf.mxu1  ;;  %v5450_v3 = vpop.f32.mrf.mxu0 }
 0x285   :  { %v2286_v6 = vpop.f32.mrf.mxu1  ;;  %v6744_v39 = vpop.f32.mrf.mxu0 }
 0x286   :  { %v2292_v44 = vadd.f32 %v2286_v6, %v2230_v23 }
 0x287   :  { %v5313_v7 = vpop.f32.mrf.mxu1  ;;  %v5465_v43 = vpop.f32.mrf.mxu0 }
 0x288   :  { %v2358_v50 = vadd.f32 %v6723_v45, %v2292_v44 }
 0x289   :  { %v2289_v10 = vpop.f32.mrf.mxu1  ;;  %v3507_v52 = vpop.f32.mrf.mxu0 }
 0x28b   :  { %v5314_v56 = vpop.f32.mrf.mxu1  ;;  %v5466_v12 = vpop.f32.mrf.mxu0 }
 0x28d   :  { %v2414_v25 = vpop.f32.mrf.mxu1  ;;  %v6749_v13 = vpop.f32.mrf.mxu0 }
 0x28e   :  { %v2420_v54 = vadd.f32 %v2414_v25, %v2358_v50 }
 0x28f   :  { %v5329_v15 = vpop.f32.mrf.mxu1  ;;  %v5481_v11 = vpop.f32.mrf.mxu0 }
 0x290   :  { %v2486_v34 = vadd.f32 %v6726_v0, %v2420_v54 }
 0x291   :  { %v2417_v62 = vpop.f32.mrf.mxu1  ;;  %v3635_v30 = vpop.f32.mrf.mxu0 }
 0x293   :  { %v5330_v18 = vpop.f32.mrf.mxu1  ;;  %v5482_v21 = vpop.f32.mrf.mxu0 }
 0x295   :  { %v2542_v49 = vpop.f32.mrf.mxu1  ;;  %v6751_v22 = vpop.f32.mrf.mxu0 }
 0x296   :  { %v2548_v5 = vadd.f32 %v2542_v49, %v2486_v34 }
 0x297   :  { %v5345_v26 = vpop.f32.mrf.mxu1  ;;  %v5497_v24 = vpop.f32.mrf.mxu0 }
 0x298   :  { %v2614_v6 = vadd.f32 %v6728_v1, %v2548_v5 }
 0x299   :  { %v2545_v35 = vpop.f32.mrf.mxu1  ;;  %v3763_v27 = vpop.f32.mrf.mxu0 }
 0x29b   :  { %v5346_v28 = vpop.f32.mrf.mxu1  ;;  %v5498_v29 = vpop.f32.mrf.mxu0 }
 0x29d   :  { %v2670_v33 = vpop.f32.mrf.mxu1  ;;  %v6753_v40 = vpop.f32.mrf.mxu0 }
 0x29e   :  { %v2676_v43 = vadd.f32 %v2670_v33, %v2614_v6 }
 0x29f   :  { %v5361_v55 = vpop.f32.mrf.mxu1  ;;  %v5513_v4 = vpop.f32.mrf.mxu0 }
 0x2a0   :  { %v2742_v12 = vadd.f32 %v6730_v8, %v2676_v43 }
 0x2a1   :  { %v2673_v38 = vpop.f32.mrf.mxu1  ;;  %v3891_v31 = vpop.f32.mrf.mxu0 }
 0x2a3   :  { %v5362_v41 = vpop.f32.mrf.mxu1  ;;  %v5514_v42 = vpop.f32.mrf.mxu0 }
 0x2a5   :  { %v2798_v9 = vpop.f32.mrf.mxu1  ;;  %v6756_v47 = vpop.f32.mrf.mxu0 }
 0x2a6   :  { %v2804_v15 = vadd.f32 %v2798_v9, %v2742_v12  ;;  %v4780_v12 = vld [vmem:[%s6792_s4] ss:$0 sm:$0xff] }
 0x2a7   :  { %v5377_v48 = vpop.f32.mrf.mxu1  ;;  %v5529_v61 = vpop.f32.mrf.mxu0 }
 0x2a8   :  { %v2870_v30 = vadd.f32 %v6732_v16, %v2804_v15 }
 0x2a9   :  { %v2801_v53 = vpop.f32.mrf.mxu1  ;;  %v4019_v32 = vpop.f32.mrf.mxu0 }
 0x2ab   :  { %v5378_v57 = vpop.f32.mrf.mxu1  ;;  %v5530_v37 = vpop.f32.mrf.mxu0 }
 0x2ad   :  { %v2926_v58 = vpop.f32.mrf.mxu1  ;;  %v6759_v59 = vpop.f32.mrf.mxu0 }
 0x2ae   :  { %v2932_v21 = vadd.f32 %v2926_v58, %v2870_v30  ;;  %v4782_v30 = vld [vmem:[#allocation3] ss:$0 sm:$0xff] }
 0x2af   :  { %v5393_v63 = vpop.f32.mrf.mxu1  ;;  %v5545_v51 = vpop.f32.mrf.mxu0 }
 0x2b0   :  { %v2998_v26 = vadd.f32 %v6734_v17, %v2932_v21 }
 0x2b1   :  { %v2929_v14 = vpop.f32.mrf.mxu1  ;;  %v4147_v19 = vpop.f32.mrf.mxu0 }
 0x2b3   :  { %v5394_v2 = vpop.f32.mrf.mxu1  ;;  %v5546_v3 = vpop.f32.mrf.mxu0 }
 0x2b5   :  { %v3054_v45 = vpop.f32.mrf.mxu1  ;;  %v6763_v7 = vpop.f32.mrf.mxu0 }
 0x2b6   :  { %v3060_v35 = vadd.f32 %v3054_v45, %v2998_v26 }
 0x2b7   :  { %v5409_v10 = vpop.f32.mrf.mxu1  ;;  %v5561_v52 = vpop.f32.mrf.mxu0 }
 0x2b8   :  { %v3126_v29 = vadd.f32 %v6736_v36, %v3060_v35 }
 0x2b9   :  { %v3057_v20 = vpop.f32.mrf.mxu1  ;;  %v4275_v56 = vpop.f32.mrf.mxu0 }
 0x2bb   :  { %v5410_v0 = vpop.f32.mrf.mxu1  ;;  %v5562_v25 = vpop.f32.mrf.mxu0 }
 0x2bd   :  { %v3182_v11 = vpop.f32.mrf.mxu1 }
 0x2be   :  { %v3188_v33 = vadd.f32 %v3182_v11, %v3126_v29 }
 0x2bf   :  { %v5425_v62 = vpop.f32.mrf.mxu1 }
 0x2c0   :  { %v3254_v38 = vadd.f32 %v6739_v46, %v3188_v33 }
 0x2c1   :  { %v3185_v18 = vpop.f32.mrf.mxu1 }
 0x2c3   :  { %v5426_v1 = vpop.f32.mrf.mxu1 }
 0x2c5   :  { %v3310_v49 = vpop.f32.mrf.mxu1 }
 0x2c6   :  { %v3316_v16 = vadd.f32 %v3310_v49, %v3254_v38 }
 0x2c7   :  { %v5441_v24 = vpop.f32.mrf.mxu1 }
 0x2c8   :  { %v3382_v42 = vadd.f32 %v6742_v60, %v3316_v16 }
 0x2c9   :  { %v3313_v27 = vpop.f32.mrf.mxu1 }
 0x2cb   :  { %v5442_v28 = vpop.f32.mrf.mxu1 }
 0x2cd   :  { %v3438_v8 = vpop.f32.mrf.mxu1 }
 0x2ce   :  { %v3444_v17 = vadd.f32 %v3438_v8, %v3382_v42 }
 0x2cf   :  { %v5457_v55 = vpop.f32.mrf.mxu1 }
 0x2d0   :  { %v3510_v61 = vadd.f32 %v6744_v39, %v3444_v17 }
 0x2d1   :  { %v3441_v4 = vpop.f32.mrf.mxu1 }
 0x2d3   :  { %v5458_v31 = vpop.f32.mrf.mxu1 }
 0x2d5   :  { %v3566_v23 = vpop.f32.mrf.mxu1 }
 0x2d6   :  { %v3572_v36 = vadd.f32 %v3566_v23, %v3510_v61 }
 0x2d7   :  { %v5473_v41 = vpop.f32.mrf.mxu1 }
 0x2d8   :  { %v3638_v54 = vadd.f32 %v6749_v13, %v3572_v36 }
 0x2d9   :  { %v3569_v44 = vpop.f32.mrf.mxu1 }
 0x2db   :  { %v5474_v9 = vpop.f32.mrf.mxu1 }
 0x2dd   :  { %v3694_v48 = vpop.f32.mrf.mxu1 }
 0x2de   :  { %v3700_v46 = vadd.f32 %v3694_v48, %v3638_v54 }
 0x2df   :  { %v5489_v50 = vpop.f32.mrf.mxu1 }
 0x2e0   :  { %v3766_v34 = vadd.f32 %v6751_v22, %v3700_v46 }
 0x2e1   :  { %v3697_v53 = vpop.f32.mrf.mxu1 }
 0x2e3   :  { %v5490_v32 = vpop.f32.mrf.mxu1 }
 0x2e5   :  { %v3822_v57 = vpop.f32.mrf.mxu1 }
 0x2e6   :  { %v3828_v60 = vadd.f32 %v3822_v57, %v3766_v34 }
 0x2e7   :  { %v5505_v37 = vpop.f32.mrf.mxu1 }
 0x2e8   :  { %v3894_v14 = vadd.f32 %v6753_v40, %v3828_v60 }
 0x2e9   :  { %v3825_v58 = vpop.f32.mrf.mxu1 }
 0x2eb   :  { %v5506_v63 = vpop.f32.mrf.mxu1 }
 0x2ed   :  { %v3950_v51 = vpop.f32.mrf.mxu1 }
 0x2ee   :  { %v3956_v39 = vadd.f32 %v3950_v51, %v3894_v14 }
 0x2ef   :  { %v5521_v5 = vpop.f32.mrf.mxu1 }
 0x2f0   :  { %v4022_v6 = vadd.f32 %v6756_v47, %v3956_v39  ;;  %v4781_v47 = vld [vmem:[%s6793_s5] ss:$0 sm:$0xff] }
 0x2f1   :  { %v3953_v19 = vpop.f32.mrf.mxu1 }
 0x2f3   :  { %v5522_v2 = vpop.f32.mrf.mxu1 }
 0x2f5   :  { %v4078_v3 = vpop.f32.mrf.mxu1 }
 0x2f6   :  { %v4084_v13 = vadd.f32 %v4078_v3, %v4022_v6 }
 0x2f7   :  { %v5537_v45 = vpop.f32.mrf.mxu1 }
 0x2f8   :  { %v4150_v52 = vadd.f32 %v6759_v59, %v4084_v13 }
 0x2f9   :  { %v4081_v43 = vpop.f32.mrf.mxu1 }
 0x2fb   :  { %v5538_v10 = vpop.f32.mrf.mxu1 }
 0x2fd   :  { %v4206_v20 = vpop.f32.mrf.mxu1 }
 0x2fe   :  { %v4212_v22 = vadd.f32 %v4206_v20, %v4150_v52 }
 0x2ff   :  { %v5553_v56 = vpop.f32.mrf.mxu1 }
 0x300   :  { %v4278_v40 = vadd.f32 %v6763_v7, %v4212_v22 }
 0x301   :  { %v4209_v0 = vpop.f32.mrf.mxu1 }
 0x302   :  { %v4286_v25 = vadd.f32 %v4780_v12, %v4278_v40 }
 0x303   :  { %v5554_v15 = vpop.f32.mrf.mxu1 }
 0x304   :  { %v4287_v11 = vmax.f32 %v4286_v25, 0.0 }
 0x306   :  { %v4295_v62 = vmul.f32 %v4781_v47, %v4287_v11 }
 0x308   :  { %v4297_v59 = vsel %vm4296_vm7, %v4295_v62, 0.0 }
 0x309   :  { %4298 = vadd.xlane.f32.xlu0 %v4297_v59 }
 0x392   :  { %v4299_v18 = vpop.xlane.xlu0 %4298 }
 0x393   :  { %v4307_v21 = vadd.f32 %v4782_v30, %v4299_v18 }
 0x395   :  { %v4783_v1 = vmul.f32 -1.442695, %v4307_v21 }
 0x397   :  { %5711 = vpow2.f32 %v4783_v1 }
 0x3a4   :  { %v5712_v49 = vpop.eup %5711 }
 0x3a5   :  { %v4311_v26 = vadd.f32 1.0, %v5712_v49 }
 0x3a7   :  { %5713 = vrcp.f32 %v4311_v26 }
 0x3b4   :  { %v5714_v7 = vpop.eup %5713 }
 0x3b5   :  { %4315 = vst.msk [vmem:[%s6794_s7] sm:$0x3] %vm4314_vm8, %v5714_v7 }

</bundles_post_ra>
